<compile_context>
chip_gen: v7x
topology: tpu7x:2x2x1
jax: 0.10.0
libtpu: 0.0.40
codegen_flags: <defaults>
</compile_context>

<pallas_src>
from itertools import combinations

import jax
import jax.numpy as jnp
from jax.experimental import pallas as pl
from jax.experimental.pallas import tpu as pltpu
from jax.scipy.linalg import block_diag


def _round_up(x, m):
    return ((x + m - 1) // m) * m


def _smooth_gate(z, gamma):
    """Vectorized get_smooth_z / get_smooth_z_pairs (f32, pack-time only)."""
    s = (-2.0 / gamma ** 3) * z ** 3 + (3.0 / (2.0 * gamma)) * z + 0.5
    return jnp.where(z <= -gamma / 2.0,
                     jnp.zeros_like(z),
                     jnp.where(z >= gamma / 2.0, jnp.ones_like(z), s))


def _make_kernel(n_mid, compute_dtype):
    """Kernel body; n_mid = n_layers - 1 block-diagonal hidden layers."""

    def kernel(*refs):
        if n_mid > 0:
            (xm_ref, xp_ref, w_in_m_ref, w_in_p_ref, b_in_ref,
             w_mid_ref, b_mid_ref, w_out_ref, b_out_ref, out_ref) = refs
        else:
            (xm_ref, xp_ref, w_in_m_ref, w_in_p_ref, b_in_ref,
             w_out_ref, b_out_ref, out_ref) = refs
            w_mid_ref = b_mid_ref = None

        # First layers of every feature / pair sub-net: two lane-dense
        # matmuls against the block-structured (pre-cast) input weights.
        h = (jnp.dot(xm_ref[...], w_in_m_ref[...],
                     preferred_element_type=jnp.float32)
             + jnp.dot(xp_ref[...], w_in_p_ref[...],
                       preferred_element_type=jnp.float32))
        h = jnp.maximum(h + b_in_ref[...], 0.0)

        # Hidden layers: block-diagonal (D_pad, D_pad) matmuls (static unroll).
        for l in range(n_mid):
            h = jnp.dot(h.astype(compute_dtype), w_mid_ref[l],
                        preferred_element_type=jnp.float32)
            h = jnp.maximum(h + b_mid_ref[l], 0.0)

        # Gated reduction — gates already folded into W_out / b_out at pack
        # time, so this is one matmul + broadcast bias add.
        out = jnp.dot(h.astype(compute_dtype), w_out_ref[...],
                      preferred_element_type=jnp.float32)
        out_ref[...] = (out + b_out_ref[...]).astype(out_ref.dtype)

    return kernel


def pack_params(params, n_layers, gamma, compute_dtype=jnp.float32):
    """Pack PyTorch-shaped per-feature params into block-structured,
    lane-padded, gate-folded arrays (folding done in f32, cast last)."""
    mw, mb, pw, pb, z_main, z_pairs = params
    F = mw[0].shape[0]
    P = pw[0].shape[0]
    H = mw[0].shape[-1]
    O = mw[-1].shape[-1]
    n_mid = max(n_layers - 1, 0)
    D_hid = (F + P) * H
    D_pad = _round_up(D_hid, 128)          # lane-aligned fused hidden width

    f32 = lambda a: jnp.asarray(a, jnp.float32)
    cast = lambda a: a.astype(compute_dtype)

    # --- Input layer, split into main / pair blocks (exact block structure).
    w_in_main = block_diag(*[f32(mw[0][f]) for f in range(F)])   # (F,  F*H)
    w_in_pair = block_diag(*[f32(pw[0][q]) for q in range(P)])   # (2P, P*H)
    w_in_m = jnp.pad(w_in_main, ((0, 0), (0, D_pad - F * H)))            # (F, D_pad)
    w_in_p = jnp.pad(w_in_pair, ((0, 0), (F * H, D_pad - D_hid)))        # (2P, D_pad)
    b_in = jnp.pad(
        jnp.concatenate([f32(mb[0]).reshape(1, F * H),
                         f32(pb[0]).reshape(1, P * H)], axis=1),
        ((0, 0), (0, D_pad - D_hid)))                                    # (1, D_pad)

    # --- Hidden layers: block-diagonal per layer, zero-padded to D_pad.
    if n_mid > 0:
        w_mid = jnp.stack([
            jnp.pad(block_diag(*([f32(mw[l + 1][f]) for f in range(F)] +
                                 [f32(pw[l + 1][q]) for q in range(P)])),
                    ((0, D_pad - D_hid), (0, D_pad - D_hid)))
            for l in range(n_mid)], axis=0)                      # (n_mid, D_pad, D_pad)
        b_mid = jnp.stack([
            jnp.pad(jnp.concatenate([f32(mb[l + 1]).reshape(1, F * H),
                                     f32(pb[l + 1]).reshape(1, P * H)], axis=1),
                    ((0, 0), (0, D_pad - D_hid)))
            for l in range(n_mid)], axis=0)                      # (n_mid, 1, D_pad)
        w_mid = cast(w_mid)
    else:
        w_mid = b_mid = None

    # --- Output layer with the smooth gates folded in (f32, cast last).
    gate = _smooth_gate(jnp.concatenate([f32(z_main), f32(z_pairs)]),
                        float(gamma))                            # (F+P,)
    gate_exp = jnp.repeat(gate, H)                               # (D_hid,)
    w_out = jnp.concatenate([f32(mw[-1]).reshape(F * H, O),
                             f32(pw[-1]).reshape(P * H, O)], axis=0)     # (D_hid, O)
    w_out_eff = jnp.pad(w_out * gate_exp[:, None],
                        ((0, D_pad - D_hid), (0, 0)))                    # (D_pad, O)
    b_out_cat = jnp.concatenate([f32(mb[-1]), f32(pb[-1])], axis=0)      # (F+P, O)
    b_out_const = gate[None, :] @ b_out_cat                              # (1, O)

    packed = dict(
        w_in_m=cast(w_in_m), w_in_p=cast(w_in_p), b_in=b_in,
        w_mid=w_mid, b_mid=b_mid,
        w_out=cast(w_out_eff), b_out=b_out_const,
        D_pad=D_pad, F=F, P=P, O=O, n_mid=n_mid)
    return packed


def nam_forward(mains, pairs, params, *, n_layers, gamma,
                block_b=None, compute_dtype=jnp.float32):
    """Pallas-backed equivalent of NAM.forward(mains, pairs) (exu=False).

    compute_dtype=jnp.bfloat16 halves weight DMA/VMEM and uses the MXU's
    native bf16 rate; accumulation stays f32.
    """
    B, F = mains.shape
    P = pairs.shape[1]

    pk = pack_params(params, n_layers, gamma, compute_dtype=compute_dtype)
    D_pad, O, n_mid = pk["D_pad"], pk["O"], pk["n_mid"]

    x_main = mains.astype(compute_dtype)                       # (B, F)
    x_pair = pairs.reshape(B, 2 * P).astype(compute_dtype)     # (B, 2P)

    # Batch tiling: aim for >= 4 grid steps so the pipeline overlaps and
    # v7x's two TensorCores can both get "parallel" work; 8-row granularity.
    if block_b is None:
        desired_steps = 4
        block_b = min(512, max(8, _round_up(-(-B // desired_steps), 8)))
    block_b = max(8, _round_up(block_b, 8))
    B_pad = _round_up(B, block_b)
    if B_pad != B:
        x_main = jnp.pad(x_main, ((0, B_pad - B), (0, 0)))
        x_pair = jnp.pad(x_pair, ((0, B_pad - B), (0, 0)))
    n_blocks = B_pad // block_b

    kernel = _make_kernel(n_mid, compute_dtype)

    in_specs = [
        pl.BlockSpec((block_b, F), lambda i: (i, 0)),            # mains
        pl.BlockSpec((block_b, 2 * P), lambda i: (i, 0)),        # pairs (flat)
        pl.BlockSpec((F, D_pad), lambda i: (0, 0)),              # W_in_main
        pl.BlockSpec((2 * P, D_pad), lambda i: (0, 0)),          # W_in_pair
        pl.BlockSpec((1, D_pad), lambda i: (0, 0)),              # b_in
    ]
    args = [x_main, x_pair, pk["w_in_m"], pk["w_in_p"], pk["b_in"]]
    if n_mid > 0:
        in_specs += [
            pl.BlockSpec((n_mid, D_pad, D_pad), lambda i: (0, 0, 0)),  # W_mid
            pl.BlockSpec((n_mid, 1, D_pad), lambda i: (0, 0, 0)),      # b_mid
        ]
        args += [pk["w_mid"], pk["b_mid"]]
    in_specs += [
        pl.BlockSpec((D_pad, O), lambda i: (0, 0)),              # W_out (gated)
        pl.BlockSpec((1, O), lambda i: (0, 0)),                  # b_out (gated)
    ]
    args += [pk["w_out"], pk["b_out"]]

    # VMEM budget: weights are double-buffered by default, plus IO tiles and
    # a few f32 activation slabs.  Never go below the default scoped limit.
    itemsize = jnp.dtype(compute_dtype).itemsize
    weight_bytes = sum(int(a.size) * a.dtype.itemsize
                       for a in args[2:])
    io_bytes = 2 * (block_b * (F + 2 * P) * itemsize + block_b * O * 4)
    act_bytes = 4 * block_b * D_pad * 4
    vmem_limit = int(min(100 * 2 ** 20,
                         max(32 * 2 ** 20,
                             2 * weight_bytes + io_bytes + act_bytes + (1 << 20))))

    grid_spec = pltpu.PrefetchScalarGridSpec(
        num_scalar_prefetch=0,
        grid=(n_blocks,),
        in_specs=in_specs,
        out_specs=pl.BlockSpec((block_b, O), lambda i: (i, 0)),
    )

    out = pl.pallas_call(
        kernel,
        out_shape=jax.ShapeDtypeStruct((B_pad, O), jnp.float32),
        grid_spec=grid_spec,
        compiler_params=pltpu.CompilerParams(
            dimension_semantics=("parallel",),
            vmem_limit_bytes=vmem_limit),
    )(*args)

    return out[:B]


def init_params(key, F, P, H, O, n_layers, gamma):
    """Deterministic synthetic init mirroring the module's parameter shapes."""
    main_dims = [(1, H)] + [(H, H)] * (n_layers - 1) + [(H, O)]
    pair_dims = [(2, H)] + [(H, H)] * (n_layers - 1) + [(H, O)]
    n_mats = n_layers + 1
    keys = jax.random.split(key, 4 * n_mats + 2)
    ki = iter(range(4 * n_mats + 2))

    def uni(k, shape, bound):
        return jax.random.uniform(k, shape, jnp.float32, -bound, bound)

    mw, mb, pw, pb = [], [], [], []
    for (kin, kout) in main_dims:
        bound = 1.0 / jnp.sqrt(float(kin))
        mw.append(uni(keys[next(ki)], (F, kin, kout), bound))
        mb.append(uni(keys[next(ki)], (F, kout), bound))
    for (kin, kout) in pair_dims:
        bound = 1.0 / jnp.sqrt(float(kin))
        pw.append(uni(keys[next(ki)], (P, kin, kout), bound))
        pb.append(uni(keys[next(ki)], (P, kout), bound))
    z_main = uni(keys[next(ki)], (F,), gamma / 100.0)
    z_pairs = uni(keys[next(ki)], (P,), gamma / 100.0)
    return mw, mb, pw, pb, z_main, z_pairs


def nam_reference(mains, pairs, params, gamma):
    """Pure-JAX reference reproducing the PyTorch forward() exactly."""
    mw, mb, pw, pb, z_main, z_pairs = params

    def gate(z):
        s = (-2.0 / gamma ** 3) * z ** 3 + (3.0 / (2.0 * gamma)) * z + 0.5
        return jnp.where(z <= -gamma / 2.0, 0.0,
                         jnp.where(z >= gamma / 2.0, 1.0, s))

    h = mains[:, :, None]
    for i, (w, b) in enumerate(zip(mw, mb)):
        h = jnp.einsum('ijk,jkl->ijl', h, w) + b
        if i < len(mw) - 1:
            h = jnp.maximum(h, 0.0)
    out_main = jnp.einsum('ijk,j->ik', h, gate(z_main))

    h = pairs
    for i, (w, b) in enumerate(zip(pw, pb)):
        h = jnp.einsum('ijk,jkl->ijl', h, w) + b
        if i < len(pw) - 1:
            h = jnp.maximum(h, 0.0)
    out_pairs = jnp.einsum('ijk,j->ik', h, gate(z_pairs))
    return out_main + out_pairs


if __name__ == "__main__":
    # Keep kernel and reference matmuls at full f32 precision for comparison.
    jax.config.update("jax_default_matmul_precision", "highest")

    # n_features=4, n_hidden=32, n_output=1, n_layers=2, all (4 choose 2)=6
    # pairs, batch=64, gamma=1  (module defaults, exu=False).
    F, H, O, n_layers, gamma = 4, 32, 1, 2, 1.0
    B = 64
    pairs_list = list(combinations(range(F), 2))
    P = len(pairs_list)

    key = jax.random.PRNGKey(0)
    k_params, k_x = jax.random.split(key)
    params = init_params(k_params, F, P, H, O, n_layers, gamma)

    mains = jax.random.normal(k_x, (B, F), jnp.float32)
    # pairs input as expected by forward(): (B, n_pairs, 2)
    pairs = mains[:, jnp.array(pairs_list)]

    ref = nam_reference(mains, pairs, params, gamma)

    # f32 compute path (strict check against the reference).
    out = nam_forward(mains, pairs, params, n_layers=n_layers, gamma=gamma)
    out = jax.block_until_ready(out)
    assert out.shape == (B, O)
    assert jnp.allclose(out, ref, atol=1e-3, rtol=1e-3), (out, ref)

    # bf16 compute path (MXU-native on v5e/v6e/v7x; f32 accumulation) —
    # looser tolerance since per-layer activations are downcast to bf16.
    out_bf16 = nam_forward(mains, pairs, params, n_layers=n_layers,
                           gamma=gamma, compute_dtype=jnp.bfloat16)
    out_bf16 = jax.block_until_ready(out_bf16)
    assert jnp.all(jnp.isfinite(out_bf16))
    assert jnp.allclose(out_bf16, ref, atol=1e-1, rtol=1e-1), (out_bf16, ref)

    print("KERNEL_OK")
</pallas_src>

<mosaic_0001>
module attributes {stable_mosaic.version = 11 : i64} {
  func.func @kernel(%arg0: i32, %arg1: memref<16x4xf32, #tpu.memory_space<vmem>>, %arg2: memref<16x12xf32, #tpu.memory_space<vmem>>, %arg3: memref<4x384xf32, #tpu.memory_space<vmem>>, %arg4: memref<12x384xf32, #tpu.memory_space<vmem>>, %arg5: memref<1x384xf32, #tpu.memory_space<vmem>>, %arg6: memref<1x384x384xf32, #tpu.memory_space<vmem>>, %arg7: memref<1x1x384xf32, #tpu.memory_space<vmem>>, %arg8: memref<384x1xf32, #tpu.memory_space<vmem>>, %arg9: memref<1x1xf32, #tpu.memory_space<vmem>>, %arg10: memref<16x1xf32, #tpu.memory_space<vmem>>) attributes {dimension_semantics = [#tpu.dimension_semantics<parallel>], iteration_bounds = array<i64: 4>, scalar_prefetch = 0 : i64, scratch_operands = 0 : i64, tpu.core_type = #tpu.core_type<tc>, window_params = [{transform_indices = @transform_0, window_bounds = array<i64: 16, 4>}, {transform_indices = @transform_1, window_bounds = array<i64: 16, 12>}, {pipeline_mode = #tpu.pipeline_mode<synchronous>, transform_indices = @transform_2, window_bounds = array<i64: 4, 384>}, {pipeline_mode = #tpu.pipeline_mode<synchronous>, transform_indices = @transform_3, window_bounds = array<i64: 12, 384>}, {pipeline_mode = #tpu.pipeline_mode<synchronous>, transform_indices = @transform_4, window_bounds = array<i64: 1, 384>}, {pipeline_mode = #tpu.pipeline_mode<synchronous>, transform_indices = @transform_5, window_bounds = array<i64: 1, 384, 384>}, {pipeline_mode = #tpu.pipeline_mode<synchronous>, transform_indices = @transform_6, window_bounds = array<i64: 1, 1, 384>}, {pipeline_mode = #tpu.pipeline_mode<synchronous>, transform_indices = @transform_7, window_bounds = array<i64: 384, 1>}, {pipeline_mode = #tpu.pipeline_mode<synchronous>, transform_indices = @transform_8, window_bounds = array<i64: 1, 1>}, {transform_indices = @transform_9, window_bounds = array<i64: 16, 1>}]} {
    %c0 = arith.constant 0 : index
    %c0_0 = arith.constant 0 : index
    %0 = vector.load %arg1[%c0, %c0_0] : memref<16x4xf32, #tpu.memory_space<vmem>>, vector<16x4xf32>
    %c0_1 = arith.constant 0 : index
    %c0_2 = arith.constant 0 : index
    %1 = vector.load %arg3[%c0_1, %c0_2] : memref<4x384xf32, #tpu.memory_space<vmem>>, vector<4x384xf32>
    %cst = arith.constant dense<0.000000e+00> : vector<16x384xf32>
    %2 = tpu.matmul %0, %1, %cst {dimension_numbers = #tpu.dot_dimension_numbers<[1], [0], [0], [1], [0, 0, 1, 1], [], []>, precision = #tpu.contract_precision<fp32>} : vector<16x4xf32>, vector<4x384xf32>, vector<16x384xf32> -> vector<16x384xf32>
    %c0_3 = arith.constant 0 : index
    %c0_4 = arith.constant 0 : index
    %3 = vector.load %arg2[%c0_3, %c0_4] : memref<16x12xf32, #tpu.memory_space<vmem>>, vector<16x12xf32>
    %c0_5 = arith.constant 0 : index
    %c0_6 = arith.constant 0 : index
    %4 = vector.load %arg4[%c0_5, %c0_6] : memref<12x384xf32, #tpu.memory_space<vmem>>, vector<12x384xf32>
    %cst_7 = arith.constant dense<0.000000e+00> : vector<16x384xf32>
    %5 = tpu.matmul %3, %4, %cst_7 {dimension_numbers = #tpu.dot_dimension_numbers<[1], [0], [0], [1], [0, 0, 1, 1], [], []>, precision = #tpu.contract_precision<fp32>} : vector<16x12xf32>, vector<12x384xf32>, vector<16x384xf32> -> vector<16x384xf32>
    %6 = arith.addf %2, %5 : vector<16x384xf32>
    %c0_8 = arith.constant 0 : index
    %c0_9 = arith.constant 0 : index
    %7 = vector.load %arg5[%c0_8, %c0_9] : memref<1x384xf32, #tpu.memory_space<vmem>>, vector<1x384xf32>
    %8 = vector.broadcast %7 : vector<1x384xf32> to vector<16x384xf32>
    %9 = arith.addf %6, %8 : vector<16x384xf32>
    %cst_10 = arith.constant 0.000000e+00 : f32
    %10 = vector.broadcast %cst_10 : f32 to vector<16x384xf32>
    %11 = arith.maximumf %9, %10 : vector<16x384xf32>
    %c0_11 = arith.constant 0 : index
    %c0_12 = arith.constant 0 : index
    %c0_13 = arith.constant 0 : index
    %12 = vector.load %arg6[%c0_11, %c0_12, %c0_13] : memref<1x384x384xf32, #tpu.memory_space<vmem>>, vector<1x384x384xf32>
    %13 = vector.shape_cast %12 : vector<1x384x384xf32> to vector<384x384xf32>
    %cst_14 = arith.constant dense<0.000000e+00> : vector<16x384xf32>
    %14 = tpu.matmul %11, %13, %cst_14 {dimension_numbers = #tpu.dot_dimension_numbers<[1], [0], [0], [1], [0, 0, 1, 1], [], []>, precision = #tpu.contract_precision<fp32>} : vector<16x384xf32>, vector<384x384xf32>, vector<16x384xf32> -> vector<16x384xf32>
    %c0_15 = arith.constant 0 : index
    %c0_16 = arith.constant 0 : index
    %c0_17 = arith.constant 0 : index
    %15 = vector.load %arg7[%c0_15, %c0_16, %c0_17] : memref<1x1x384xf32, #tpu.memory_space<vmem>>, vector<1x1x384xf32>
    %16 = vector.shape_cast %15 : vector<1x1x384xf32> to vector<1x384xf32>
    %17 = vector.broadcast %16 : vector<1x384xf32> to vector<16x384xf32>
    %18 = arith.addf %14, %17 : vector<16x384xf32>
    %cst_18 = arith.constant 0.000000e+00 : f32
    %19 = vector.broadcast %cst_18 : f32 to vector<16x384xf32>
    %20 = arith.maximumf %18, %19 : vector<16x384xf32>
    %c0_19 = arith.constant 0 : index
    %c0_20 = arith.constant 0 : index
    %21 = vector.load %arg8[%c0_19, %c0_20] : memref<384x1xf32, #tpu.memory_space<vmem>>, vector<384x1xf32>
    %cst_21 = arith.constant dense<0.000000e+00> : vector<16x1xf32>
    %22 = tpu.matmul %20, %21, %cst_21 {dimension_numbers = #tpu.dot_dimension_numbers<[1], [0], [0], [1], [0, 0, 1, 1], [], []>, precision = #tpu.contract_precision<fp32>} : vector<16x384xf32>, vector<384x1xf32>, vector<16x1xf32> -> vector<16x1xf32>
    %c0_22 = arith.constant 0 : index
    %c0_23 = arith.constant 0 : index
    %23 = vector.load %arg9[%c0_22, %c0_23] : memref<1x1xf32, #tpu.memory_space<vmem>>, vector<1x1xf32>
    %24 = vector.broadcast %23 : vector<1x1xf32> to vector<16x1xf32>
    %25 = arith.addf %22, %24 : vector<16x1xf32>
    %c0_24 = arith.constant 0 : index
    %c0_25 = arith.constant 0 : index
    %26 = vector.load %arg10[%c0_24, %c0_25] : memref<16x1xf32, #tpu.memory_space<vmem>>, vector<16x1xf32>
    tpu.vector_store %arg10[%c0_24, %c0_25], %25 {strides = array<i32>} : memref<16x1xf32, #tpu.memory_space<vmem>>, vector<16x1xf32>,
    return
  }
  func.func @transform_0(%arg0: i32) -> (i32, i32) {
    %c0_i32 = arith.constant 0 : i32
    %c0_i32_0 = arith.constant 0 : i32
    return %arg0, %c0_i32 : i32, i32
  }
  func.func @transform_1(%arg0: i32) -> (i32, i32) {
    %c0_i32 = arith.constant 0 : i32
    %c0_i32_0 = arith.constant 0 : i32
    return %arg0, %c0_i32 : i32, i32
  }
  func.func @transform_2(%arg0: i32) -> (i32, i32) {
    %c0_i32 = arith.constant 0 : i32
    %c0_i32_0 = arith.constant 0 : i32
    %c0_i32_1 = arith.constant 0 : i32
    return %c0_i32, %c0_i32_0 : i32, i32
  }
  func.func @transform_3(%arg0: i32) -> (i32, i32) {
    %c0_i32 = arith.constant 0 : i32
    %c0_i32_0 = arith.constant 0 : i32
    %c0_i32_1 = arith.constant 0 : i32
    return %c0_i32, %c0_i32_0 : i32, i32
  }
  func.func @transform_4(%arg0: i32) -> (i32, i32) {
    %c0_i32 = arith.constant 0 : i32
    %c0_i32_0 = arith.constant 0 : i32
    %c0_i32_1 = arith.constant 0 : i32
    return %c0_i32, %c0_i32_0 : i32, i32
  }
  func.func @transform_5(%arg0: i32) -> (i32, i32, i32) {
    %c0_i32 = arith.constant 0 : i32
    %c0_i32_0 = arith.constant 0 : i32
    %c0_i32_1 = arith.constant 0 : i32
    %c0_i32_2 = arith.constant 0 : i32
    return %c0_i32, %c0_i32_0, %c0_i32_1 : i32, i32, i32
  }
  func.func @transform_6(%arg0: i32) -> (i32, i32, i32) {
    %c0_i32 = arith.constant 0 : i32
    %c0_i32_0 = arith.constant 0 : i32
    %c0_i32_1 = arith.constant 0 : i32
    %c0_i32_2 = arith.constant 0 : i32
    return %c0_i32, %c0_i32_0, %c0_i32_1 : i32, i32, i32
  }
  func.func @transform_7(%arg0: i32) -> (i32, i32) {
    %c0_i32 = arith.constant 0 : i32
    %c0_i32_0 = arith.constant 0 : i32
    %c0_i32_1 = arith.constant 0 : i32
    return %c0_i32, %c0_i32_0 : i32, i32
  }
  func.func @transform_8(%arg0: i32) -> (i32, i32) {
    %c0_i32 = arith.constant 0 : i32
    %c0_i32_0 = arith.constant 0 : i32
    %c0_i32_1 = arith.constant 0 : i32
    return %c0_i32, %c0_i32_0 : i32, i32
  }
  func.func @transform_9(%arg0: i32) -> (i32, i32) {
    %c0_i32 = arith.constant 0 : i32
    %c0_i32_0 = arith.constant 0 : i32
    return %arg0, %c0_i32 : i32, i32
  }
}

</mosaic_0001>

<bundles_post_ra>
// kernel: tpu_custom_call.1
= control target key start
LH: loop header
LB: loop body
LE: loop exit
PB: predicated region body
PF: predicated region fallthrough
CT: control target
= control target key end

     0   :  { %s15003_s0 = inlined_call_operand.vmem [shape: f32[64,4], index: 0, kind: input, shape index: {}]   ;;  %s15004_s1 = inlined_call_operand.vmem [shape: f32[64,12], index: 1, kind: input, shape index: {}]   ;;  %s15005_s2 = inlined_call_operand.vmem [shape: f32[4,384], index: 2, kind: input, shape index: {}]   ;;  %s15006_s3 = inlined_call_operand.vmem [shape: f32[12,384], index: 3, kind: input, shape index: {}]   ;;  %s15007_s4 = inlined_call_operand.vmem [shape: f32[1,384], index: 4, kind: input, shape index: {}]   ;;  %s15008_s5 = inlined_call_operand.hbm [shape: f32[1,384,384], index: 5, kind: input, shape index: {}]   ;;  %s15009_s6 = inlined_call_operand.vmem [shape: f32[1,1,384], index: 6, kind: input, shape index: {}]   ;;  %s15010_s7 = inlined_call_operand.vmem [shape: f32[384,1], index: 7, kind: input, shape index: {}]   ;;  %s15011_s8 = inlined_call_operand.<no memory space> [shape: f32[1,1], index: 8, kind: input, shape index: {}]   ;;  %s15012_s9 = inlined_call_operand.vmem [shape: f32[64,1], index: 9, kind: output, shape index: {}]  }
   0x1   :  { %v14_v0 = vstv %s15011_s8 }
   0x2   :  { %15 = vst [vmem:[#allocation2] sm:$0x1] %v14_v0 }
   0x3   :  { %16 = vsyncpa [#allocation4], 0  ;;  %s11125_s11 = smov 0  }
   0x4 LB: > { %s8253_s12 = sadd.s32 4294967295, %s11066_s11   ;;  %p8255_p0 = scmp.ge.s32.totalorder %s11066_s11, 1  ;;  %s11066_s11 = sphi %s11125_s11, %s22_s11  }
   0x5   : > { %p252_p1 = scmp.lt.s32.totalorder %s11066_s11, 5  ;;  %s11068_s13 = smov [#allocation3]  }
   0x6   : > { %s273_s14 = sshll.u32 %s11068_s13, 4  ;;  %p11139_p3 = scmp.eq.s32.totalorder %s8253_s12, 0  ;;  %s274_s14 = int_to_ptr.vmem [resolvable:$true] %s273_s14 }
   0x7   : > { %p11133_p2 = pnand %p8255_p0, %p252_p1  ;;  %s11028_s19 = scalar_lea.hbm %s15008_s5, 18432 }
   0x8   : > { %s15637_s15 = scalar_select %p11139_p3, 1, 0 }
   0x9   : > { %s15636_s8 = scalar_select %p11133_p2, 1, 0 }
   0xa   : > { %p11009_p4 = pneg %p11133_p2  ;;  %p11029_p6 = scmp.ne.s32.totalorder %s15008_s5, %s11028_s19 }
   0xb   : > { %p11035_p10 = scmp.lt.u32.totalorder %s11028_s19, %s15008_s5 }
   0xc   : > { %p11147_p5 = pnand %p11139_p3, %p11009_p4 }
   0xe   : > { %p11030_p7 = pneg %p11147_p5 }
  0x10   : > { %p11031_p8 = pnand %p11030_p7, %p11029_p6 }
  0x12   : > { %p11032_p9 = pneg %p11031_p8 }
  0x14   : > { %p11037_p11 = pnand %p11035_p10, %p11032_p9 }
  0x16   : > { %11040 = shalt.err (!%p11037_p11)
}
  0x17   : > { %s11041_s24 = scalar_lea.vmem %s274_s14, 18432  ;;  %p11049_p1 = scmp.lt.s32.totalorder %s274_s14, %s274_s14 }
  0x18   : > { %p11042_p12 = scmp.ne.s32.totalorder %s274_s14, %s11041_s24  ;;  %p11050_p4 = scmp.lt.s32.totalorder %s11041_s24, %s11041_s24 }
  0x1a   : > { %p11044_p13 = pnand %p11042_p12, %p11030_p7  ;;  %p11051_p3 = por %p11050_p4, %p11049_p1 }
  0x1c   : > { %p11045_p0 = pneg %p11044_p13 }
  0x1e   : > { %p11052_p2 = pnand %p11051_p3, %p11045_p0 }
  0x20   : > { %11055 = shalt.err (!%p11052_p2)
}
  0x21   : > { %s11069_s25 = smov 384   ;;  %s11070_s26 = smov 24  }
  0x22   : > { %11012 = dma.hbm_to_vmem [thread:$0]  (!%p11147_p5), %s15008_s5, 18432, %s274_s14, [#allocation4], %s11069_s25, %s11069_s25, %s11070_s26  }
  0x23   : > { %p15639_p6 = scmp.ne.s32.totalorder %s15636_s8, 0 }
  0x25   : > { %316 = sbr.rel (%p15639_p6) target bundleno = 1638 (0x666), region = 56 }
  0x2c   : > { %p15640_p8 = scmp.ne.s32.totalorder %s15637_s15, 0 }
  0x2e   : > { %11061 = dma.done.wait (%p15640_p8), [#allocation4], 18432  }
  0x2f   : > { %11063 = vsyncadd (%p15640_p8), [#allocation4], 4294948864  ;;  %s8260_s29 = sshll.u32 %s8253_s12, 1  ;;  %v15016_v1 = vmov 0.0   ;;  %vm394_vm0 = vcmask 1043456   ;;  %v382_v2 = vld [vmem:[%s15006_s3 + $0x8] sm:$0xff] }
  0x30   : > { %472 = vmatprep.mubr.f32.mxu0 %v15016_v1  ;;  %p358_p2 = scmp.lt.s32.totalorder %s8260_s29, 7  ;;  %v385_v3 = vld [vmem:[%s15006_s3 + $0x20] sm:$0xf]  ;;  %v383_v4 = vld [vmem:[%s15006_s3 + $0x10] sm:$0xff]  ;;  %v404_v6 = vand.u32 4294901760, %v382_v2  ;;  %vm387_vm1 = vcmask 97280  }
  0x31   : > { %v399_v5 = vsel %vm394_vm0, %v385_v3, 0  ;;  %v386_v7 = vld [vmem:[%s15006_s3 + $0x28] sm:$0xf]  ;;  %v945_v8 = vand.u32 4294901760, %v383_v4  ;;  %v381_v9 = vld [vmem:[%s15006_s3] sm:$0xff]  ;;  %vm1449_vm2 = vcmask 31744  }
  0x32   : > { %s16700_s29 = smov (!%p358_p2, %s8260_s29), 7  ;;  %v408_v10 = vand.u32 4294901760, %v399_v5  ;;  %v402_v11 = vsel %vm394_vm0, %v386_v7, 0  ;;  %v384_v12 = vld [vmem:[%s15006_s3 + $0x18] sm:$0xf]  ;;  %v406_v13 = vand.u32 4294901760, %v381_v9  ;;  %v11202_v14 = vsub.f32 %v382_v2, %v404_v6 }
  0x33   : > { %s11176_s30 = sshll.u32 %s16700_s29, 3  ;;  %v948_v15 = vand.u32 4294901760, %v402_v11  ;;  %v11204_v16 = vsub.f32 %v383_v4, %v945_v8  ;;  %v396_v17 = vsel %vm394_vm0, %v384_v12, 0  ;;  %v378_v56 = vld [vmem:[%s15005_s2 + $0x8] sm:$0xf]  ;;  %vm8170_vm3 = vcmask 7168  }
  0x34   : > { %s367_s18 = scalar_lea.vmem %s15004_s1, %s11176_s30  ;;  %v11207_v20 = vpack.c.bf16 %v408_v10, %v404_v6  ;;  %v11209_v21 = vsub.f32 %v399_v5, %v408_v10  ;;  %v410_v22 = vand.u32 4294901760, %v396_v17  ;;  %v11211_v23 = vsub.f32 %v381_v9, %v406_v13  ;;  %s11243_s27 = scalar_lea.vmem %s15003_s0, %s11176_s30  ;;  %v11287_v61 = vld [vmem:[#allocation3 + $0x8] sm:$0xff]  ;;  %v11294_v0 = vld [vmem:[#allocation3 + $0x20] sm:$0xff]  ;;  %v11315_v10 = vld [vmem:[#allocation3 + $0x18] sm:$0xff] }
  0x35   : > { %v379_v18 = vld [vmem:[%s367_s18] sm:$0xff]  ;;  %v380_v19 = vld [vmem:[%s367_s18 + $0x8] sm:$0xff]  ;;  %v11213_v24 = vpack.c.bf16 %v948_v15, %v945_v8  ;;  %v11215_v25 = vsub.f32 %v402_v11, %v948_v15  ;;  %v497_v33 = vand.u32 4294901760, %v11202_v14  ;;  %v1034_v45 = vand.u32 4294901760, %v11204_v16  ;;  %s373_s15 = scalar_lea.vmem %s15012_s9, %s11176_s30 }
  0x36   : > { %v389_v26 = vsel %vm387_vm1, %v379_v18, 0  ;;  %v392_v27 = vsel %vm387_vm1, %v380_v19, 0  ;;  %9476 = vmatprep.subr.bf16.mxu0 %v11207_v20  ;;  %v11218_v28 = vpack.c.bf16 %v410_v22, %v406_v13  ;;  %v11220_v29 = vsub.f32 %v396_v17, %v410_v22  ;;  %v375_v53 = vld [vmem:[%s11243_s27] sm:$0xff]  ;;  %v376_v5 = vld [vmem:[%s11243_s27 + $0x8] sm:$0xff] }
  0x37   : > { %v11222_v30 = vand.u32 4294901760, %v389_v26  ;;  %v11224_v31 = vand.u32 4294901760, %v392_v27  ;;  %v9507_v32 = vpack.c.bf16 %v11215_v25, %v11204_v16  ;;  %v509_v34 = vand.u32 4294901760, %v11209_v21  ;;  %v11299_v4 = vld [vmem:[#allocation3] sm:$0xff] }
  0x38   : > { %v503_v35 = vand.u32 4294901760, %v11211_v23  ;;  %9478 = vmatpush1.bf16.msra.mxu0 %v11218_v28  ;;  %v515_v38 = vand.u32 4294901760, %v11220_v29  ;;  %v498_v39 = vsub.f32 %v11202_v14, %v497_v33  ;;  %v1041_v49 = vand.u32 4294901760, %v11215_v25 }
  0x39   : > { %v11233_v36 = vsub.f32 %v389_v26, %v11222_v30  ;;  %v11236_v37 = vsub.f32 %v392_v27, %v11224_v31  ;;  %9508 = vmatprep.subr.bf16.mxu1 %v9507_v32  ;;  %v510_v40 = vsub.f32 %v11209_v21, %v509_v34  ;;  %v9483_v59 = vpack.c.bf16 %v11209_v21, %v11202_v14 }
  0x3a   : > { %v504_v41 = vsub.f32 %v11211_v23, %v503_v35  ;;  %9510 = vmatpush3.bf16.msra.mxu1 %v9507_v32  ;;  %v516_v43 = vsub.f32 %v11220_v29, %v515_v38  ;;  %v499_v46 = vand.u32 4294901760, %v498_v39  ;;  %v9515_v55 = vpack.c.bf16 %v1041_v49, %v1034_v45 }
  0x3b   : > { %9001 = vmatprep.mubr.f32.mxu1 %v11233_v36  ;;  %v11256_v42 = vand.u32 4294901760, %v11233_v36  ;;  %v11262_v44 = vand.u32 4294901760, %v11236_v37  ;;  %v511_v47 = vand.u32 4294901760, %v510_v40  ;;  %9512 = vmatprep.subr.bf16.mxu1 %v11213_v24  ;;  %v1451_v60 = vsel %vm1449_vm2, %v375_v53, 0  ;;  %v2501_v53 = vld [vmem:[#allocation3 + $0x38] sm:$0xff] }
  0x3c   : > { %v505_v48 = vand.u32 4294901760, %v504_v41  ;;  %v517_v51 = vand.u32 4294901760, %v516_v43  ;;  %v1460_v63 = vsel %vm394_vm0, %v378_v56, 0  ;;  %v11296_v2 = vand.u32 4294901760, %v1451_v60 }
  0x3d   : > { %v476_v50 = vsub.f32 %v11233_v36, %v11256_v42  ;;  %v487_v52 = vsub.f32 %v11236_v37, %v11262_v44  ;;  %9002 = vmatmul.mubr.f32.vlgmr.msra.gmra.mrb[0].mxu1 %v11236_v37  ;;  %v9479_v54 = vpack.c.bf16 %v511_v47, %v499_v46  ;;  %v2655_v3 = vand.u32 4294901760, %v11287_v61 }
  0x3e   : > { %v9481_v58 = vpack.c.bf16 %v517_v51, %v505_v48  ;;  %9514 = vmatpush3.bf16.msra.mxu1 %v11213_v24  ;;  %9008 = vmatprep.mubr.f32.mxu1 %v11256_v42  ;;  %v11302_v6 = vand.u32 4294901760, %v1460_v63  ;;  %v2659_v7 = vand.u32 4294901760, %v11294_v0  ;;  %v9485_v9 = vpack.c.bf16 %v11220_v29, %v11211_v23  ;;  %v377_v23 = vld [vmem:[%s15005_s2] sm:$0xff] }
  0x3f   : > { %v11280_v57 = vand.u32 4294901760, %v476_v50  ;;  %9480 = vmatprep.subr.bf16.mxu0 %v9479_v54  ;;  %9516 = vmatprep.subr.bf16.mxu1 %v9515_v55  ;;  %v11290_v62 = vand.u32 4294901760, %v487_v52  ;;  %v11309_v8 = vsub.f32 %v11287_v61, %v2655_v3  ;;  %v2657_v11 = vand.u32 4294901760, %v11299_v4  ;;  %v2504_v54 = vld [vmem:[#allocation3 + $0x50] sm:$0xff] }
  0x40   : > { %v1454_v12 = vsel %vm1449_vm2, %v376_v5, 0  ;;  %v11321_v13 = vsub.f32 %v1451_v60, %v11296_v2  ;;  %v11326_v15 = vsub.f32 %v11294_v0, %v2659_v7  ;;  %v2064_v17 = vsub.f32 %v1460_v63, %v11302_v6  ;;  %v2507_v63 = vld [vmem:[#allocation3 + $0x68] sm:$0xff]  ;;  %v2510_v0 = vld [vmem:[#allocation3 + $0x80] sm:$0xff] }
  0x41   : > { %478 = vmatmul.mubr.f32.vlgmr.msra.gmra.mrb[0].mxu0 %v11280_v57  ;;  %15641 = vst [vmem:[#allocation6_spill] sm:$0xff] %v11309_v8  ;;  %v11333_v18 = vsub.f32 %v11299_v4, %v2657_v11  ;;  %v2661_v19 = vand.u32 4294901760, %v11315_v10  ;;  %v11338_v22 = vand.u32 4294901760, %v1454_v12  ;;  %v9491_v40 = vpack.c.bf16 %v509_v34, %v497_v33 }
  0x42   : > { %483 = vmatprep.mubr.f32.mxu0 %v15016_v1  ;;  %9482 = vmatpush1.bf16.msra.mxu0 %v9481_v58  ;;  %15642 = vst [vmem:[#allocation7_spill] sm:$0xff] %v11326_v15  ;;  %v11342_v26 = vand.u32 4294901760, %v11321_v13  ;;  %v11349_v32 = vand.u32 4294901760, %v2064_v17  ;;  %v9493_v33 = vpack.c.bf16 %v515_v38, %v503_v35  ;;  %v1035_v29 = vsub.f32 %v11204_v16, %v1034_v45  ;;  %v2503_v58 = vld [vmem:[#allocation3 + $0x48] sm:$0xff] }
  0x43   : > { %9484 = vmatprep.subr.bf16.mxu0 %v9483_v59  ;;  %15643 = vst [vmem:[#allocation8_spill] sm:$0xff] %v11333_v18  ;;  %v11347_v27 = vsub.f32 %v11315_v10, %v2661_v19  ;;  %v11355_v39 = vsub.f32 %v1454_v12, %v11338_v22  ;;  %v1448_v35 = vcombine.high %v377_v23, %v377_v23  ;;  %v2667_v56 = vand.u32 4294901760, %v2504_v54 }
  0x44   : > { %v1532_v41 = vsub.f32 %v11321_v13, %v11342_v26  ;;  %v2066_v43 = vsub.f32 %v2064_v17, %v11349_v32  ;;  %v2669_v60 = vand.u32 4294901760, %v2503_v58  ;;  %v2671_v4 = vand.u32 4294901760, %v2507_v63 }
  0x45   : > { %489 = vmatmul.mubr.f32.gmra.mrb[2].mxu0 %v11290_v62  ;;  %9009 = vmatmul.mubr.f32.vlgmr.msra.gmra.mrb[0].mxu1 %v11262_v44  ;;  %15644 = vst [vmem:[#allocation9_spill] sm:$0xff] %v11347_v27  ;;  %v11371_v46 = vand.u32 4294901760, %v11355_v39  ;;  %v2675_v5 = vand.u32 4294901760, %v2510_v0 }
  0x46   : > { %579 = vmatprep.mubr.f32.mxu0 %v15016_v1  ;;  %9518 = vmatpush3.bf16.msra.mxu1 %v9515_v55  ;;  %v11373_v14 = vand.u32 4294901760, %v1532_v41  ;;  %v2067_v21 = vand.u32 4294901760, %v2066_v43  ;;  %v2663_v55 = vand.u32 4294901760, %v2501_v53  ;;  %v11485_v10 = vsub.f32 %v2503_v58, %v2669_v60  ;;  %v2519_v41 = vld [vmem:[#allocation3 + $0xc8] sm:$0xff]  ;;  %v2522_v43 = vld [vmem:[#allocation3 + $0xe0] sm:$0xff] }
  0x47   : > { %9015 = vmatprep.mubr.f32.mxu1 %v11222_v30  ;;  %9520 = vmatprep.subr.bf16.mxu1 %v11213_v24  ;;  %v1543_v34 = vsub.f32 %v11355_v39, %v11371_v46 }
  0x48   : > { %v11473_v61 = vpack.c.bf16 %v2667_v56, %v2663_v55  ;;  %15652 = vst [vmem:[#allocation17_spill] sm:$0xff] %v11485_v10 }
  0x49   : > { %581 = vmatmul.mubr.f32.vlgmr.msra.gmra.mrb[0].mxu0 %v11222_v30 }
  0x4a   : > { %586 = vmatprep.mubr.f32.mxu0 %v15016_v1  ;;  %9486 = vmatpush1.bf16.msra.mxu0 %v9485_v9  ;;  %15647 = vst [vmem:[#allocation12_spill] sm:$0xff] %v11473_v61 }
  0x4b   : > { %9488 = vmatprep.subr.bf16.mxu0 %v11207_v20 }
  0x4d   : > { %588 = vmatmul.mubr.f32.gmra.mrb[2].mxu0 %v11224_v31  ;;  %9016 = vmatmul.mubr.f32.vlgmr.msra.gmra.mrb[0].mxu1 %v11224_v31 }
  0x4e   : > { %666 = vmatprep.mubr.f32.mxu0 %v15016_v1  ;;  %9522 = vmatpush3.bf16.msra.mxu1 %v11213_v24 }
  0x4f   : > { %9022 = vmatprep.mubr.f32.mxu1 %v11222_v30  ;;  %9025 = vmatprep.subr.mxu1 %v11302_v6 }
  0x51   : > { %669 = vmatmul.mubr.f32.vlgmr.msra.gmra.mrb[0].mxu0 %v11233_v36  ;;  %v11388_v36 = vand.u32 4294901760, %v1543_v34  ;;  %v2518_v34 = vld [vmem:[#allocation3 + $0xc0] sm:$0xff] }
  0x52   : > { %674 = vmatprep.mubr.f32.mxu0 %v15016_v1  ;;  %9490 = vmatpush1.bf16.msra.mxu0 %v11218_v28 }
  0x53   : > { %9492 = vmatprep.subr.bf16.mxu0 %v9491_v40  ;;  %v2515_v40 = vld [vmem:[#allocation3 + $0xa8] sm:$0xff] }
  0x55   : > { %677 = vmatmul.mubr.f32.gmra.mrb[2].mxu0 %v11236_v37  ;;  %9023 = vmatmul.mubr.f32.vlgmr.msra.gmra.mrb[0].mxu1 %v11224_v31  ;;  %v1036_v37 = vand.u32 4294901760, %v1035_v29  ;;  %v2685_v29 = vand.u32 4294901760, %v2515_v40 }
  0x56   : > { %751 = vmatprep.mubr.f32.mxu0 %v15016_v1  ;;  %9026 = vmatpush3.msra.mxu1 %v11302_v6 }
  0x57   : > { %9027 = vmatprep.mubr.f32.mxu1 %v11373_v14  ;;  %9030 = vmatprep.subr.mxu1 %v2067_v21 }
  0x59   : > { %755 = vmatmul.mubr.f32.vlgmr.msra.gmra.mrb[0].mxu0 %v11256_v42  ;;  %v1458_v42 = vsel %vm394_vm0, %v1448_v35, 0  ;;  %v2521_v35 = vld [vmem:[#allocation3 + $0xd8] sm:$0xff] }
  0x5a   : > { %760 = vmatprep.mubr.f32.mxu0 %v15016_v1  ;;  %9494 = vmatpush1.bf16.msra.mxu0 %v9493_v33 }
  0x5b   : > { %9496 = vmatprep.subr.bf16.mxu0 %v11207_v20  ;;  %v1042_v20 = vsub.f32 %v11215_v25, %v1041_v49  ;;  %v1462_v25 = vand.u32 4294901760, %v1458_v42 }
  0x5d   : > { %764 = vmatmul.mubr.f32.gmra.mrb[2].mxu0 %v11262_v44  ;;  %9028 = vmatmul.mubr.f32.vlgmr.msra.gmra.mrb[0].mxu1 %v11388_v36  ;;  %v1043_v38 = vand.u32 4294901760, %v1042_v20  ;;  %v1456_v44 = vsel %vm394_vm0, %v377_v23, 0  ;;  %v1552_v45 = vsub.f32 %v1458_v42, %v1462_v25  ;;  %v2687_v20 = vand.u32 4294901760, %v2519_v41 }
  0x5e   : > { %846 = vmatprep.mubr.f32.mxu0 %v15016_v1  ;;  %9031 = vmatpush3.msra.mxu1 %v2067_v21  ;;  %v2691_v42 = vand.u32 4294901760, %v2522_v43 }
  0x5f   : > { %9032 = vmatprep.mubr.f32.mxu1 %v11296_v2  ;;  %9035 = vmatprep.subr.mxu1 %v2064_v17  ;;  %v9503_v16 = vpack.c.bf16 %v1043_v38, %v1036_v37  ;;  %v1553_v48 = vand.u32 4294901760, %v1552_v45 }
  0x61   : > { %848 = vmatmul.mubr.f32.vlgmr.msra.gmra.mrb[0].mxu0 %v11222_v30  ;;  %v1554_v49 = vsub.f32 %v1552_v45, %v1553_v48 }
  0x62   : > { %853 = vmatprep.mubr.f32.mxu0 %v15016_v1  ;;  %9498 = vmatpush1.bf16.msra.mxu0 %v11218_v28  ;;  %v1464_v28 = vand.u32 4294901760, %v1456_v44 }
  0x63   : > { %9500 = vmatprep.subr.bf16.mxu0 %v11213_v24  ;;  %v1555_v51 = vand.u32 4294901760, %v1554_v49 }
  0x64   : > { %v1558_v47 = vsub.f32 %v1456_v44, %v1464_v28 }
  0x65   : > { %855 = vmatmul.mubr.f32.gmra.mrb[2].mxu0 %v11224_v31  ;;  %9033 = vmatmul.mubr.f32.vlgmr.msra.gmra.mrb[0].mxu1 %v11338_v22 }
  0x66   : > { %929 = vmatprep.mubr.f32.mxu0 %v15016_v1  ;;  %9036 = vmatpush3.msra.mxu1 %v2064_v17  ;;  %v2516_v17 = vld [vmem:[#allocation3 + $0xb0] sm:$0xff] }
  0x67   : > { %9037 = vmatprep.mubr.f32.mxu1 %v11321_v13  ;;  %9040 = vmatprep.subr.mxu1 %v11302_v6  ;;  %v2683_v33 = vand.u32 4294901760, %v2516_v17 }
  0x69   : > { %931 = vmatmul.mubr.f32.vlgmr.msra.gmra.mrb[0].mxu0 %v11222_v30  ;;  %v11505_v38 = vsub.f32 %v2516_v17, %v2683_v33 }
  0x6a   : > { %936 = vmatprep.mubr.f32.mxu0 %v15016_v1  ;;  %9502 = vmatpush3.bf16.msra.mxu0 %v11213_v24  ;;  %v1559_v24 = vand.u32 4294901760, %v1558_v47 }
  0x6b   : > { %9504 = vmatprep.subr.bf16.mxu0 %v9503_v16  ;;  %15656 = vst [vmem:[#allocation21_spill] sm:$0xff] %v11505_v38 }
  0x6c   : > { %v1560_v50 = vsub.f32 %v1558_v47, %v1559_v24 }
  0x6d   : > { %938 = vmatmul.mubr.f32.gmra.mrb[2].mxu0 %v11224_v31  ;;  %9038 = vmatmul.mubr.f32.vlgmr.msra.gmra.mrb[0].mxu1 %v11355_v39 }
  0x6e   : > { %8987 = vmatprep.mubr.f32.mxu0 %v11280_v57  ;;  %9041 = vmatpush3.msra.mxu1 %v11302_v6  ;;  %v1561_v52 = vand.u32 4294901760, %v1560_v50  ;;  %v2500_v57 = vld [vmem:[#allocation3 + $0x30] sm:$0xff] }
  0x6f   : > { %9042 = vmatprep.mubr.f32.mxu1 %v11342_v26  ;;  %9045 = vmatprep.subr.mxu1 %v11349_v32  ;;  %v2665_v59 = vand.u32 4294901760, %v2500_v57 }
  0x71   : > { %8988 = vmatmul.mubr.f32.vlgmr.msra.gmra.mrb[4].mxu0 %v11290_v62  ;;  %v11475_v62 = vpack.c.bf16 %v2669_v60, %v2665_v59  ;;  %v11483_v9 = vsub.f32 %v2500_v57, %v2665_v59  ;;  %v11536_v57 = vld [vmem:[#allocation3 + $0x108] sm:$0xff] }
  0x72   : > { %9506 = vmatpush3.bf16.msra.mxu0 %v9503_v16  ;;  %8994 = vmatprep.mubr.f32.mxu0 %v11222_v30  ;;  %v11437_v30 = vpack.c.bf16 %v2659_v7, %v2655_v3  ;;  %v11480_v3 = vsub.f32 %v2504_v54, %v2667_v56  ;;  %v2509_v7 = vld [vmem:[#allocation3 + $0x78] sm:$0xff]  ;;  %v2689_v16 = vand.u32 4294901760, %v2518_v34  ;;  %v11534_v56 = vld [vmem:[#allocation3 + $0xf0] sm:$0xff]  ;;  %v2701_v59 = vand.u32 4294901760, %v11536_v57 }
  0x73   : > { %1463 = vmatprep.subr.mxu0 %v1462_v25  ;;  %15648 = vst [vmem:[#allocation13_spill] sm:$0xff] %v11475_v62  ;;  %15651 = vst [vmem:[#allocation16_spill] sm:$0xff] %v11483_v9  ;;  %v2677_v12 = vand.u32 4294901760, %v2509_v7  ;;  %v2697_v58 = vand.u32 4294901760, %v11534_v56 }
  0x74   : > { %15645 = vst [vmem:[#allocation10_spill] sm:$0xff] %v11437_v30  ;;  %15650 = vst [vmem:[#allocation15_spill] sm:$0xff] %v11480_v3  ;;  %v11520_v49 = vsub.f32 %v2518_v34, %v2689_v16  ;;  %v11638_v3 = vsub.f32 %v11536_v57, %v2701_v59 }
  0x75   : > { %9043 = vmatmul.mubr.f32.vlgmr.msra.gmra.mrb[0].mxu1 %v11371_v46  ;;  %v11497_v21 = vsub.f32 %v2509_v7, %v2677_v12  ;;  %v2530_v7 = vld [vmem:[#allocation3 + $0x120] sm:$0xff] }
  0x76   : > { %9046 = vmatpush3.msra.mxu1 %v11349_v32  ;;  %9047 = vmatprep.mubr.f32.mxu1 %v11296_v2  ;;  %v11491_v32 = vsub.f32 %v2510_v0, %v2675_v5  ;;  %15663 = vst [vmem:[#allocation28_spill] sm:$0xff] %v11520_v49  ;;  %v2531_v0 = vld [vmem:[#allocation3 + $0x128] sm:$0xff]  ;;  %15684 = vst [vmem:[#allocation47_spill] sm:$0xff] %v11638_v3  ;;  %v2566_v3 = vld [vmem:[#allocation3 + $0x240] sm:$0xff] }
  0x77   : > { %9050 = vmatprep.subr.mxu1 %v11302_v6 }
  0x79   : > { %8995 = vmatmul.mubr.f32.vlgmr.msra.gmra.mrb[4].mxu0 %v11224_v31  ;;  %v11450_v31 = vpack.c.bf16 %v2661_v19, %v2657_v11  ;;  %v2512_v19 = vld [vmem:[#allocation3 + $0x90] sm:$0xff] }
  0x7a   : > { %1465 = vmatpush1.msra.mxu0 %v1464_v28  ;;  %1528 = vmatprep.mubr.f32.mxu0 %v15016_v1  ;;  %v2681_v23 = vand.u32 4294901760, %v2512_v19 }
  0x7b   : > { %1556 = vmatprep.subr.mxu0 %v1555_v51  ;;  %15646 = vst [vmem:[#allocation11_spill] sm:$0xff] %v11450_v31 }
  0x7c   : > { %v11509_v44 = vsub.f32 %v2512_v19, %v2681_v23  ;;  %v11553_v19 = vld [vmem:[#allocation3 + $0x1a8] sm:$0xff] }
  0x7d   : > { %1534 = vmatmul.mubr.f32.vlgmr.msra.gmra.mrb[0].mxu0 %v11373_v14  ;;  %9048 = vmatmul.mubr.f32.vlgmr.msra.gmra.mrb[0].mxu1 %v11338_v22 }
  0x7e   : > { %1539 = vmatprep.mubr.f32.mxu0 %v15016_v1  ;;  %1562 = vmatpush1.msra.mxu0 %v1561_v52  ;;  %15658 = vst [vmem:[#allocation23_spill] sm:$0xff] %v11509_v44  ;;  %v11528_v52 = vld [vmem:[#allocation3 + $0xf8] sm:$0xff] }
  0x7f   : > { %1642 = vmatprep.subr.mxu0 %v1552_v45  ;;  %9051 = vmatpush3.msra.mxu1 %v11302_v6  ;;  %v2506_v6 = vld [vmem:[#allocation3 + $0x60] sm:$0xff]  ;;  %v11513_v45 = vsub.f32 %v2519_v41, %v2687_v20  ;;  %v15020_v54 = vand.u32 4294901760, %v11528_v52  ;;  %v11558_v41 = vld [vmem:[#allocation3 + $0x28] sm:$0xff] }
  0x80   : > { %9052 = vmatprep.mubr.f32.mxu1 %v11296_v2  ;;  %9524 = vmatprep.subr.bf16.mxu1 %v11437_v30  ;;  %v2673_v11 = vand.u32 4294901760, %v2506_v6  ;;  %v2543_v30 = vld [vmem:[#allocation3 + $0x188] sm:$0xff] }
  0x81   : > { %1545 = vmatmul.mubr.f32.gmra.mrb[2].mxu0 %v11388_v36  ;;  %15660 = vst [vmem:[#allocation25_spill] sm:$0xff] %v11513_v45  ;;  %v11901_v45 = vld [vmem:[#allocation3 + $0x2e0] sm:$0xff] }
  0x82   : > { %1625 = vmatprep.mubr.f32.mxu0 %v15016_v1  ;;  %v11495_v14 = vsub.f32 %v2506_v6, %v2673_v11 }
  0x85   : > { %1627 = vmatmul.mubr.f32.vlgmr.msra.gmra.mrb[0].mxu0 %v11296_v2  ;;  %9053 = vmatmul.mubr.f32.vlgmr.msra.gmra.mrb[0].mxu1 %v11338_v22 }
  0x86   : > { %1632 = vmatprep.mubr.f32.mxu0 %v15016_v1  ;;  %1645 = vmatpush1.msra.mxu0 %v1558_v47  ;;  %v11516_v47 = vpack.c.bf16 %v2691_v42, %v2687_v20 }
  0x87   : > { %1726 = vmatprep.subr.mxu0 %v1462_v25  ;;  %9526 = vmatpush1.bf16.msra.mxu1 %v11450_v31 }
  0x88   : > { %9528 = vmatprep.subr.bf16.mxu1 %v11473_v61  ;;  %15661 = vst [vmem:[#allocation26_spill] sm:$0xff] %v11516_v47 }
  0x89   : > { %1634 = vmatmul.mubr.f32.gmra.mrb[2].mxu0 %v11338_v22 }
  0x8a   : > { %1708 = vmatprep.mubr.f32.mxu0 %v15016_v1 }
  0x8b   : > { %9530 = vmatpush1.bf16.msra.mxu1 %v11475_v62 }
  0x8d   : > { %1711 = vmatmul.mubr.f32.vlgmr.msra.gmra.mrb[0].mxu0 %v11321_v13  ;;  %v2513_v13 = vld [vmem:[#allocation3 + $0x98] sm:$0xff] }
  0x8e   : > { %1716 = vmatprep.mubr.f32.mxu0 %v15016_v1  ;;  %1728 = vmatpush1.msra.mxu0 %v1464_v28 }
  0x8f   : > { %1813 = vmatprep.subr.mxu0 %v1553_v48  ;;  %v11518_v48 = vsub.f32 %v2522_v43, %v2691_v42  ;;  %v2540_v42 = vld [vmem:[#allocation3 + $0x170] sm:$0xff] }
  0x91   : > { %1719 = vmatmul.mubr.f32.gmra.mrb[2].mxu0 %v11355_v39  ;;  %v2679_v39 = vand.u32 4294901760, %v2513_v13  ;;  %15662 = vst [vmem:[#allocation27_spill] sm:$0xff] %v11518_v48 }
  0x92   : > { %1791 = vmatprep.mubr.f32.mxu0 %v15016_v1 }
  0x93   : > { %v11500_v36 = vsub.f32 %v2513_v13, %v2679_v39  ;;  %v11503_v37 = vpack.c.bf16 %v2683_v33, %v2679_v39  ;;  %v2705_v13 = vand.u32 4294901760, %v2530_v7  ;;  %v15027_v33 = vand.u32 4294901760, %v11553_v19 }
  0x95   : > { %1795 = vmatmul.mubr.f32.vlgmr.msra.gmra.mrb[0].mxu0 %v11342_v26  ;;  %v11489_v26 = vsub.f32 %v2507_v63, %v2671_v4  ;;  %15655 = vst [vmem:[#allocation20_spill] sm:$0xff] %v11503_v37  ;;  %v11547_v63 = vpack.c.bf16 %v2701_v59, %v2697_v58  ;;  %v11644_v27 = vsub.f32 %v2530_v7, %v2705_v13  ;;  %v11660_v59 = vld [vmem:[#allocation3 + $0x208] sm:$0xff] }
  0x96   : > { %1800 = vmatprep.mubr.f32.mxu0 %v15016_v1  ;;  %1817 = vmatpush1.msra.mxu0 %v1559_v24  ;;  %v2693_v24 = vand.u32 4294901760, %v2521_v35 }
  0x97   : > { %1896 = vmatprep.subr.mxu0 %v1462_v25  ;;  %v11507_v25 = vpack.c.bf16 %v2685_v29, %v2681_v23  ;;  %15667 = vst [vmem:[#allocation32_spill] sm:$0xff] %v11547_v63  ;;  %v15035_v23 = vand.u32 4294901760, %v11558_v41  ;;  %15687 = vst [vmem:[#allocation50_spill] sm:$0xff] %v11644_v27 }
  0x98   : > { %v11523_v50 = vpack.c.bf16 %v2693_v24, %v2689_v16  ;;  %v11525_v51 = vsub.f32 %v2521_v35, %v2693_v24  ;;  %v2537_v35 = vld [vmem:[#allocation3 + $0x158] sm:$0xff]  ;;  %v11572_v16 = vld [vmem:[#allocation3 + $0x1c0] sm:$0xff]  ;;  %v11578_v24 = vsub.f32 %v11553_v19, %v15027_v33 }
  0x99   : > { %1804 = vmatmul.mubr.f32.gmra.mrb[2].mxu0 %v11371_v46  ;;  %v11493_v46 = vpack.c.bf16 %v2677_v12, %v2673_v11  ;;  %15657 = vst [vmem:[#allocation22_spill] sm:$0xff] %v11507_v25  ;;  %v2533_v11 = vld [vmem:[#allocation3 + $0x138] sm:$0xff]  ;;  %v11550_v12 = vld [vmem:[#allocation3 + $0x190] sm:$0xff] }
  0x9a   : > { %1880 = vmatprep.mubr.f32.mxu0 %v15016_v1  ;;  %15664 = vst [vmem:[#allocation29_spill] sm:$0xff] %v11523_v50  ;;  %15665 = vst [vmem:[#allocation30_spill] sm:$0xff] %v11525_v51  ;;  %v2709_v17 = vand.u32 4294901760, %v2533_v11  ;;  %v15018_v39 = vand.u32 4294901760, %v11550_v12 }
  0x9b   : > { %15654 = vst [vmem:[#allocation19_spill] sm:$0xff] %v11493_v46  ;;  %15671 = vst [vmem:[#allocation36_spill] sm:$0xff] %v11578_v24 }
  0x9c   : > { %v11570_v20 = vsub.f32 %v11550_v12, %v15018_v39  ;;  %v11588_v39 = vsub.f32 %v11558_v41, %v15035_v23 }
  0x9d   : > { %1882 = vmatmul.mubr.f32.vlgmr.msra.gmra.mrb[0].mxu0 %v11296_v2 }
  0x9e   : > { %1887 = vmatprep.mubr.f32.mxu0 %v15016_v1  ;;  %1898 = vmatpush1.msra.mxu0 %v1464_v28  ;;  %v11511_v28 = vsub.f32 %v2515_v40, %v2685_v29  ;;  %v11556_v40 = vld [vmem:[#allocation3 + $0x10] sm:$0xff]  ;;  %v11565_v29 = vpack.c.bf16 %v2709_v17, %v2705_v13  ;;  %15670 = vst [vmem:[#allocation35_spill] sm:$0xff] %v11570_v20  ;;  %15673 = vst [vmem:[#allocation38_spill] sm:$0xff] %v11588_v39 }
  0x9f   : > { %v15034_v34 = vand.u32 4294901760, %v11556_v40  ;;  %v10163_v23 = vpack.c.bf16 %v11578_v24, %v11570_v20  ;;  %v2546_v24 = vld [vmem:[#allocation3 + $0x1a0] sm:$0xff]  ;;  %v2719_v20 = vand.u32 4294901760, %v2543_v30 }
  0xa0   : > { %15659 = vst [vmem:[#allocation24_spill] sm:$0xff] %v11511_v28  ;;  %15669 = vst [vmem:[#allocation34_spill] sm:$0xff] %v11565_v29  ;;  %v2723_v10 = vand.u32 4294901760, %v2546_v24 }
  0xa1   : > { %1889 = vmatmul.mubr.f32.gmra.mrb[2].mxu0 %v11338_v22  ;;  %10164 = vmatprep.subr.bf16.mxu0 %v10163_v23 }
  0xa2   : > { %1961 = vmatprep.mubr.f32.mxu0 %v15016_v1  ;;  %v11673_v7 = vpack.c.bf16 %v2723_v10, %v2719_v20 }
  0xa4   : > { %15695 = vst [vmem:[#allocation57_spill] sm:$0xff] %v11673_v7 }
  0xa5   : > { %1963 = vmatmul.mubr.f32.vlgmr.msra.gmra.mrb[0].mxu0 %v11296_v2  ;;  %v11478_v2 = vsub.f32 %v2501_v53, %v2663_v55  ;;  %v11530_v53 = vld [vmem:[#allocation3 + $0x110] sm:$0xff] }
  0xa6   : > { %1968 = vmatprep.mubr.f32.mxu0 %v15016_v1  ;;  %v15019_v55 = vand.u32 4294901760, %v11530_v53  ;;  %v11583_v1 = vsub.f32 %v11556_v40, %v15034_v34  ;;  %v11596_v34 = vld [vmem:[#allocation3 + $0x58] sm:$0xff]  ;;  %v15681_v31 = vand.u32 4294901760, %v11530_v53 }
  0xa7   : > { %15649 = vst [vmem:[#allocation14_spill] sm:$0xff] %v11478_v2 }
  0xa8   : > { %v11545_v60 = vpack.c.bf16 %v15019_v55, %v15020_v54  ;;  %15672 = vst [vmem:[#allocation37_spill] sm:$0xff] %v11583_v1  ;;  %v2711_v55 = vand.u32 4294901760, %v2537_v35  ;;  %v2536_v54 = vld [vmem:[#allocation3 + $0x150] sm:$0xff]  ;;  %v11632_v23 = vsub.f32 %v11530_v53, %v15681_v31  ;;  %v2545_v31 = vld [vmem:[#allocation3 + $0x198] sm:$0xff] }
  0xa9   : > { %1970 = vmatmul.mubr.f32.gmra.mrb[2].mxu0 %v11338_v22  ;;  %v11487_v22 = vpack.c.bf16 %v2675_v5, %v2671_v4  ;;  %v2534_v4 = vld [vmem:[#allocation3 + $0x140] sm:$0xff]  ;;  %v2703_v5 = vand.u32 4294901760, %v2531_v0  ;;  %v2713_v33 = vand.u32 4294901760, %v2536_v54  ;;  %v11649_v53 = vld [vmem:[#allocation3 + $0x1f0] sm:$0xff] }
  0xaa   : > { %15666 = vst [vmem:[#allocation31_spill] sm:$0xff] %v11545_v60  ;;  %v2707_v6 = vand.u32 4294901760, %v2534_v4  ;;  %15682 = vst [vmem:[#allocation45_spill] sm:$0xff] %v11632_v23  ;;  %v2575_v23 = vld [vmem:[#allocation3 + $0x288] sm:$0xff] }
  0xab   : > { %15653 = vst [vmem:[#allocation18_spill] sm:$0xff] %v11487_v22  ;;  %9532 = vmatprep.subr.bf16.mxu1 %v11487_v22  ;;  %v2765_v49 = vand.u32 4294901760, %v2575_v23 }
  0xac   : > { %9534 = vmatpush1.bf16.msra.mxu1 %v11493_v46  ;;  %v11560_v43 = vpack.c.bf16 %v2707_v6, %v2703_v5  ;;  %v11642_v2 = vsub.f32 %v2534_v4, %v2707_v6  ;;  %v11664_v4 = vld [vmem:[#allocation3 + $0x88] sm:$0xff] }
  0xad   : > { %9536 = vmatprep.subr.bf16.mxu1 %v11503_v37  ;;  %v10165_v37 = vpack.c.bf16 %v11588_v39, %v11583_v1 }
  0xae   : > { %15668 = vst [vmem:[#allocation33_spill] sm:$0xff] %v11560_v43  ;;  %15686 = vst [vmem:[#allocation49_spill] sm:$0xff] %v11642_v2 }
  0xaf   : > { %10166 = vmatpush3.bf16.msra.mxu0 %v10165_v37  ;;  %v11656_v37 = vsub.f32 %v2536_v54, %v2713_v33  ;;  %v11675_v54 = vsub.f32 %v2543_v30, %v2719_v20  ;;  %v2551_v20 = vld [vmem:[#allocation3 + $0x1c8] sm:$0xff]  ;;  %v15703_v30 = vand.u32 4294901760, %v11660_v59 }
  0xb0   : > { %9538 = vmatpush1.bf16.msra.mxu1 %v11507_v25  ;;  %v11594_v25 = vld [vmem:[#allocation3 + $0x40] sm:$0xff] }
  0xb1   : > { %9540 = vmatprep.subr.bf16.mxu1 %v11516_v47  ;;  %v15061_v47 = vand.u32 4294901760, %v11572_v16  ;;  %v15065_v22 = vand.u32 4294901760, %v11594_v25  ;;  %15691 = vst [vmem:[#allocation54_spill] sm:$0xff] %v11656_v37  ;;  %15696 = vst [vmem:[#allocation58_spill] sm:$0xff] %v11675_v54  ;;  %v2557_v37 = vld [vmem:[#allocation3 + $0x1f8] sm:$0xff] }
  0xb3   : > { %v11611_v61 = vsub.f32 %v11572_v16, %v15061_v47  ;;  %v11622_v1 = vsub.f32 %v11594_v25, %v15065_v22  ;;  %v15679_v47 = vand.u32 4294901760, %v11528_v52  ;;  %v11640_v22 = vsub.f32 %v2531_v0, %v2703_v5  ;;  %v11662_v0 = vld [vmem:[#allocation3 + $0x70] sm:$0xff] }
  0xb4   : > { %9542 = vmatpush1.bf16.msra.mxu1 %v11523_v50 }
  0xb5   : > { %9544 = vmatprep.subr.bf16.mxu1 %v11545_v60  ;;  %v11590_v60 = vld [vmem:[#allocation3 + $0x1d8] sm:$0xff]  ;;  %15676 = vst [vmem:[#allocation41_spill] sm:$0xff] %v11611_v61  ;;  %15678 = vst [vmem:[#allocation43_spill] sm:$0xff] %v11622_v1  ;;  %v11627_v9 = vsub.f32 %v11528_v52, %v15679_v47  ;;  %v11646_v47 = vsub.f32 %v2533_v11, %v2709_v17  ;;  %v2542_v52 = vld [vmem:[#allocation3 + $0x180] sm:$0xff]  ;;  %v2725_v11 = vand.u32 4294901760, %v2545_v31 }
  0xb6   : > { %v15063_v46 = vand.u32 4294901760, %v11590_v60  ;;  %15685 = vst [vmem:[#allocation48_spill] sm:$0xff] %v11640_v22  ;;  %v2549_v17 = vld [vmem:[#allocation3 + $0x1b8] sm:$0xff] }
  0xb7   : > { %15680 = vst [vmem:[#allocation44_spill] sm:$0xff] %v11627_v9  ;;  %15688 = vst [vmem:[#allocation51_spill] sm:$0xff] %v11646_v47  ;;  %v11787_v47 = vld [vmem:[#allocation3 + $0x280] sm:$0xff] }
  0xb8   : > { %9546 = vmatpush1.bf16.msra.mxu1 %v11547_v63  ;;  %v2539_v63 = vld [vmem:[#allocation3 + $0x168] sm:$0xff]  ;;  %v11617_v39 = vsub.f32 %v11590_v60, %v15063_v46  ;;  %v11635_v46 = vsub.f32 %v11534_v56, %v2697_v58  ;;  %v11651_v56 = vsub.f32 %v2537_v35, %v2711_v55  ;;  %v11699_v35 = vld [vmem:[#allocation3 + $0x238] sm:$0xff] }
  0xb9   : > { %9548 = vmatprep.subr.bf16.mxu1 %v11560_v43  ;;  %v2715_v43 = vand.u32 4294901760, %v2540_v42  ;;  %v2717_v50 = vand.u32 4294901760, %v2539_v63 }
  0xba   : > { %15677 = vst [vmem:[#allocation42_spill] sm:$0xff] %v11617_v39  ;;  %15683 = vst [vmem:[#allocation46_spill] sm:$0xff] %v11635_v46  ;;  %v10167_v5 = vpack.c.bf16 %v11617_v39, %v11611_v61  ;;  %v11720_v39 = vld [vmem:[#allocation3 + $0xb8] sm:$0xff] }
  0xbb   : > { %v11606_v62 = vpack.c.bf16 %v2717_v50, %v2713_v33  ;;  %15689 = vst [vmem:[#allocation52_spill] sm:$0xff] %v11651_v56  ;;  %v11653_v58 = vsub.f32 %v2540_v42, %v2715_v43  ;;  %v11658_v57 = vsub.f32 %v2539_v63, %v2717_v50  ;;  %v11677_v50 = vsub.f32 %v2546_v24, %v2723_v10  ;;  %v2548_v10 = vld [vmem:[#allocation3 + $0x1b0] sm:$0xff]  ;;  %v11686_v24 = vld [vmem:[#allocation3 + $0x220] sm:$0xff] }
  0xbc   : > { %9550 = vmatpush1.bf16.msra.mxu1 %v11565_v29  ;;  %v11604_v29 = vpack.c.bf16 %v2715_v43, %v2711_v55  ;;  %v15693_v55 = vand.u32 4294901760, %v11596_v34  ;;  %v2721_v63 = vand.u32 4294901760, %v2542_v52  ;;  %v2552_v43 = vld [vmem:[#allocation3 + $0x1d0] sm:$0xff]  ;;  %10168 = vmatprep.subr.bf16.mxu0 %v10167_v5  ;;  %v11692_v5 = vsub.f32 %v2545_v31, %v2725_v11 }
  0xbd   : > { %15675 = vst [vmem:[#allocation40_spill] sm:$0xff] %v11606_v62  ;;  %15690 = vst [vmem:[#allocation53_spill] sm:$0xff] %v11653_v58  ;;  %v11704_v42 = vsub.f32 %v11660_v59, %v15703_v30  ;;  %v15707_v31 = vand.u32 4294901760, %v11664_v4  ;;  %v11718_v30 = vld [vmem:[#allocation3 + $0xa0] sm:$0xff] }
  0xbe   : > { %15674 = vst [vmem:[#allocation39_spill] sm:$0xff] %v11604_v29  ;;  %9552 = vmatprep.subr.bf16.mxu1 %v11604_v29  ;;  %15692 = vst [vmem:[#allocation55_spill] sm:$0xff] %v11658_v57  ;;  %v11671_v6 = vsub.f32 %v11596_v34, %v15693_v55  ;;  %v11688_v55 = vpack.c.bf16 %v2725_v11, %v2721_v63  ;;  %v11690_v13 = vsub.f32 %v2542_v52, %v2721_v63 }
  0xbf   : > { %15697 = vst [vmem:[#allocation59_spill] sm:$0xff] %v11677_v50  ;;  %15700 = vst [vmem:[#allocation62_spill] sm:$0xff] %v11692_v5  ;;  %v15705_v29 = vand.u32 4294901760, %v11662_v0  ;;  %v11714_v63 = vsub.f32 %v11664_v4, %v15707_v31  ;;  %v2731_v11 = vand.u32 4294901760, %v2552_v43  ;;  %v2558_v5 = vld [vmem:[#allocation3 + $0x200] sm:$0xff] }
  0xc0   : > { %9554 = vmatpush1.bf16.msra.mxu1 %v11606_v62  ;;  %15694 = vst [vmem:[#allocation56_spill] sm:$0xff] %v11671_v6  ;;  %v10169_v33 = vpack.c.bf16 %v11671_v6, %v11622_v1  ;;  %15698 = vst [vmem:[#allocation60_spill] sm:$0xff] %v11688_v55  ;;  %v15701_v62 = vand.u32 4294901760, %v11649_v53  ;;  %v2733_v6 = vand.u32 4294901760, %v2551_v20 }
  0xc1   : > { %9556 = vmatprep.subr.bf16.mxu1 %v11673_v7  ;;  %15699 = vst [vmem:[#allocation61_spill] sm:$0xff] %v11690_v13  ;;  %15704 = vst [vmem:[#allocation64_spill] sm:$0xff] %v11704_v42  ;;  %v11709_v52 = vsub.f32 %v11662_v0, %v15705_v29  ;;  %v2554_v13 = vld [vmem:[#allocation3 + $0x1e0] sm:$0xff]  ;;  %v11731_v1 = vsub.f32 %v2552_v43, %v2731_v11 }
  0xc2   : > { %v11697_v7 = vsub.f32 %v11649_v53, %v15701_v62  ;;  %10170 = vmatpush3.bf16.msra.mxu0 %v10169_v33  ;;  %15708 = vst [vmem:[#allocation66_spill] sm:$0xff] %v11714_v63  ;;  %v2727_v62 = vand.u32 4294901760, %v2549_v17  ;;  %v2729_v33 = vand.u32 4294901760, %v2548_v10 }
  0xc3   : > { %15706 = vst [vmem:[#allocation65_spill] sm:$0xff] %v11709_v52  ;;  %v10173_v61 = vpack.c.bf16 %v11714_v63, %v11709_v52  ;;  %15711 = vst [vmem:[#allocation69_spill] sm:$0xff] %v11731_v1  ;;  %v11739_v63 = vsub.f32 %v2551_v20, %v2733_v6  ;;  %v2737_v20 = vand.u32 4294901760, %v2554_v13  ;;  %v11765_v52 = vld [vmem:[#allocation3 + $0xd0] sm:$0xff] }
  0xc4   : > { %15702 = vst [vmem:[#allocation63_spill] sm:$0xff] %v11697_v7  ;;  %9558 = vmatpush1.bf16.msra.mxu1 %v11688_v55  ;;  %v10171_v29 = vpack.c.bf16 %v11704_v42, %v11697_v7  ;;  %v11726_v31 = vsub.f32 %v2549_v17, %v2727_v62  ;;  %v2555_v55 = vld [vmem:[#allocation3 + $0x1e8] sm:$0xff]  ;;  %v11729_v50 = vpack.c.bf16 %v2731_v11, %v2727_v62  ;;  %v11737_v42 = vld [vmem:[#allocation3 + $0x250] sm:$0xff]  ;;  %v15715_v17 = vand.u32 4294901760, %v11686_v24 }
  0xc5   : > { %v11733_v54 = vpack.c.bf16 %v2733_v6, %v2729_v33  ;;  %v11735_v57 = vsub.f32 %v2548_v10, %v2729_v33  ;;  %15714 = vst [vmem:[#allocation72_spill] sm:$0xff] %v11739_v63  ;;  %v15717_v62 = vand.u32 4294901760, %v11699_v35  ;;  %v15108_v11 = vand.u32 4294901760, %v11718_v30  ;;  %v11767_v10 = vld [vmem:[#allocation3 + $0xe8] sm:$0xff]  ;;  %v2560_v1 = vld [vmem:[#allocation3 + $0x210] sm:$0xff] }
  0xc6   : > { %15709 = vst [vmem:[#allocation67_spill] sm:$0xff] %v11726_v31  ;;  %15710 = vst [vmem:[#allocation68_spill] sm:$0xff] %v11729_v50  ;;  %10172 = vmatprep.subr.bf16.mxu0 %v10171_v29  ;;  %v11744_v18 = vsub.f32 %v11686_v24, %v15715_v17  ;;  %9560 = vmatprep.subr.bf16.mxu1 %v11729_v50  ;;  %v2735_v33 = vand.u32 4294901760, %v2555_v55  ;;  %v2739_v6 = vand.u32 4294901760, %v2558_v5  ;;  %v11754_v29 = vld [vmem:[#allocation3 + $0x268] sm:$0xff]  ;;  %v15720_v7 = vand.u32 4294901760, %v11720_v39 }
  0xc7   : > { %15712 = vst [vmem:[#allocation70_spill] sm:$0xff] %v11733_v54  ;;  %15713 = vst [vmem:[#allocation71_spill] sm:$0xff] %v11735_v57  ;;  %v11749_v43 = vsub.f32 %v11699_v35, %v15717_v62  ;;  %10174 = vmatpush3.bf16.msra.mxu0 %v10173_v61  ;;  %v11762_v62 = vsub.f32 %v11718_v30, %v15108_v11  ;;  %v2741_v61 = vand.u32 4294901760, %v2557_v37  ;;  %v2561_v11 = vld [vmem:[#allocation3 + $0x218] sm:$0xff]  ;;  %v2564_v57 = vld [vmem:[#allocation3 + $0x230] sm:$0xff]  ;;  %v15121_v56 = vand.u32 4294901760, %v11754_v29 }
  0xc8   : > { %15716 = vst [vmem:[#allocation73_spill] sm:$0xff] %v11744_v18  ;;  %9562 = vmatpush1.bf16.msra.mxu1 %v11733_v54  ;;  %v11772_v63 = vsub.f32 %v11720_v39, %v15720_v7  ;;  %v11774_v54 = vpack.c.bf16 %v2739_v6, %v2735_v33  ;;  %v11782_v31 = vsub.f32 %v2554_v13, %v2737_v20  ;;  %v2563_v7 = vld [vmem:[#allocation3 + $0x228] sm:$0xff]  ;;  %v15126_v13 = vand.u32 4294901760, %v11765_v52 }
  0xc9   : > { %15718 = vst [vmem:[#allocation74_spill] sm:$0xff] %v11749_v43  ;;  %v10175_v17 = vpack.c.bf16 %v11749_v43, %v11744_v18  ;;  %15719 = vst [vmem:[#allocation75_spill] sm:$0xff] %v11762_v62  ;;  %v11776_v43 = vsub.f32 %v2555_v55, %v2735_v33  ;;  %v11778_v18 = vsub.f32 %v2558_v5, %v2739_v6  ;;  %v15728_v5 = vand.u32 4294901760, %v11737_v42 }
  0xca   : > { %15721 = vst [vmem:[#allocation76_spill] sm:$0xff] %v11772_v63  ;;  %15722 = vst [vmem:[#allocation77_spill] sm:$0xff] %v11774_v54  ;;  %v11780_v50 = vpack.c.bf16 %v2741_v61, %v2737_v20  ;;  %v11784_v58 = vsub.f32 %v2557_v37, %v2741_v61  ;;  %v10177_v55 = vpack.c.bf16 %v11772_v63, %v11762_v62  ;;  %9564 = vmatprep.subr.bf16.mxu1 %v11774_v54  ;;  %v11815_v63 = vld [vmem:[#allocation3 + $0x298] sm:$0xff]  ;;  %v11818_v62 = vld [vmem:[#allocation3 + $0x100] sm:$0xff] }
  0xcb   : > { %15723 = vst [vmem:[#allocation78_spill] sm:$0xff] %v11776_v43  ;;  %15724 = vst [vmem:[#allocation79_spill] sm:$0xff] %v11778_v18  ;;  %10176 = vmatprep.subr.bf16.mxu0 %v10175_v17  ;;  %v11795_v33 = vsub.f32 %v11737_v42, %v15728_v5  ;;  %v15128_v37 = vand.u32 4294901760, %v11767_v10  ;;  %v11803_v6 = vsub.f32 %v11754_v29, %v15121_v56  ;;  %v2743_v20 = vand.u32 4294901760, %v2561_v11  ;;  %v2570_v43 = vld [vmem:[#allocation3 + $0x260] sm:$0xff] }
  0xcc   : > { %15725 = vst [vmem:[#allocation80_spill] sm:$0xff] %v11780_v50  ;;  %15726 = vst [vmem:[#allocation81_spill] sm:$0xff] %v11782_v31  ;;  %9566 = vmatpush1.bf16.msra.mxu1 %v11780_v50  ;;  %v2747_v17 = vand.u32 4294901760, %v2564_v57  ;;  %v2745_v61 = vand.u32 4294901760, %v2560_v1  ;;  %10178 = vmatpush3.bf16.msra.mxu0 %v10177_v55  ;;  %v11808_v5 = vsub.f32 %v11765_v52, %v15126_v13  ;;  %v2749_v50 = vand.u32 4294901760, %v2563_v7 }
  0xcd   : > { %15727 = vst [vmem:[#allocation82_spill] sm:$0xff] %v11784_v58  ;;  %15729 = vst [vmem:[#allocation83_spill] sm:$0xff] %v11795_v33  ;;  %v11813_v54 = vsub.f32 %v11767_v10, %v15128_v37  ;;  %v11820_v58 = vld [vmem:[#allocation3 + $0x118] sm:$0xff]  ;;  %v10179_v55 = vpack.c.bf16 %v11803_v6, %v11795_v33  ;;  %v11826_v13 = vsub.f32 %v2561_v11, %v2743_v20  ;;  %v2567_v37 = vld [vmem:[#allocation3 + $0x248] sm:$0xff]  ;;  %v15147_v11 = vand.u32 4294901760, %v11815_v63 }
  0xce   : > { %15730 = vst [vmem:[#allocation84_spill] sm:$0xff] %v11803_v6  ;;  %15731 = vst [vmem:[#allocation85_spill] sm:$0xff] %v11808_v5  ;;  %v11824_v31 = vpack.c.bf16 %v2747_v17, %v2743_v20  ;;  %v11828_v18 = vsub.f32 %v2564_v57, %v2747_v17  ;;  %v11832_v2 = vpack.c.bf16 %v2749_v50, %v2745_v61  ;;  %v15739_v57 = vand.u32 4294901760, %v11787_v47  ;;  %v11869_v6 = vld [vmem:[#allocation3 + $0x148] sm:$0xff]  ;;  %v2573_v33 = vld [vmem:[#allocation3 + $0x278] sm:$0xff] }
  0xcf   : > { %15732 = vst [vmem:[#allocation86_spill] sm:$0xff] %v11813_v54  ;;  %15734 = vst [vmem:[#allocation88_spill] sm:$0xff] %v11826_v13  ;;  %v10181_v27 = vpack.c.bf16 %v11813_v54, %v11808_v5  ;;  %v11834_v56 = vsub.f32 %v2560_v1, %v2745_v61  ;;  %v11836_v22 = vsub.f32 %v2563_v7, %v2749_v50  ;;  %10180 = vmatprep.subr.bf16.mxu0 %v10179_v55  ;;  %v2569_v5 = vld [vmem:[#allocation3 + $0x258] sm:$0xff]  ;;  %v11848_v7 = vld [vmem:[#allocation3 + $0x2b0] sm:$0xff] }
  0xd0   : > { %15733 = vst [vmem:[#allocation87_spill] sm:$0xff] %v11824_v31  ;;  %15735 = vst [vmem:[#allocation89_spill] sm:$0xff] %v11828_v18  ;;  %9568 = vmatprep.subr.bf16.mxu1 %v11824_v31  ;;  %v11843_v20 = vsub.f32 %v11787_v47, %v15739_v57  ;;  %v15150_v17 = vand.u32 4294901760, %v11818_v62  ;;  %v15152_v54 = vand.u32 4294901760, %v11820_v58  ;;  %v2751_v1 = vand.u32 4294901760, %v2567_v37  ;;  %v11850_v61 = vld [vmem:[#allocation3 + $0x2c8] sm:$0xff] }
  0xd1   : > { %15736 = vst [vmem:[#allocation90_spill] sm:$0xff] %v11832_v2  ;;  %15737 = vst [vmem:[#allocation91_spill] sm:$0xff] %v11834_v56  ;;  %10182 = vmatpush3.bf16.msra.mxu0 %v10181_v27  ;;  %9570 = vmatpush1.bf16.msra.mxu1 %v11832_v2  ;;  %v2755_v50 = vand.u32 4294901760, %v2570_v43  ;;  %v11855_v55 = vsub.f32 %v11815_v63, %v15147_v11  ;;  %v2753_v2 = vand.u32 4294901760, %v2566_v3  ;;  %v11867_v31 = vld [vmem:[#allocation3 + $0x130] sm:$0xff]  ;;  %v2757_v11 = vand.u32 4294901760, %v2569_v5 }
  0xd2   : > { %15738 = vst [vmem:[#allocation92_spill] sm:$0xff] %v11836_v22  ;;  %15740 = vst [vmem:[#allocation93_spill] sm:$0xff] %v11843_v20  ;;  %v11860_v57 = vsub.f32 %v11818_v62, %v15150_v17  ;;  %v11865_v27 = vsub.f32 %v11820_v58, %v15152_v54  ;;  %v2576_v56 = vld [vmem:[#allocation3 + $0x290] sm:$0xff]  ;;  %v15170_v54 = vand.u32 4294901760, %v11848_v7  ;;  %v15172_v46 = vand.u32 4294901760, %v11850_v61 }
  0xd3   : > { %15741 = vst [vmem:[#allocation94_spill] sm:$0xff] %v11848_v7  ;;  %15742 = vst [vmem:[#allocation95_spill] sm:$0xff] %v11855_v55  ;;  %v11871_v22 = vpack.c.bf16 %v2755_v50, %v2751_v1  ;;  %v2572_v18 = vld [vmem:[#allocation3 + $0x270] sm:$0xff]  ;;  %v10183_v17 = vpack.c.bf16 %v11855_v55, %v11843_v20  ;;  %v11880_v9 = vpack.c.bf16 %v2757_v11, %v2753_v2  ;;  %v2759_v48 = vand.u32 4294901760, %v2573_v33 }
  0xd4   : > { %15743 = vst [vmem:[#allocation96_spill] sm:$0xff] %v11860_v57  ;;  %15744 = vst [vmem:[#allocation97_spill] sm:$0xff] %v11865_v27  ;;  %v10185_v13 = vpack.c.bf16 %v11865_v27, %v11860_v57  ;;  %v11887_v55 = vsub.f32 %v11848_v7, %v15170_v54  ;;  %v11892_v27 = vsub.f32 %v11850_v61, %v15172_v46  ;;  %v2763_v57 = vand.u32 4294901760, %v2576_v56  ;;  %v11903_v54 = vld [vmem:[#allocation3 + $0x2f8] sm:$0xff] }
  0xd5   : > { %15745 = vst [vmem:[#allocation98_spill] sm:$0xff] %v11871_v22  ;;  %9572 = vmatprep.subr.bf16.mxu1 %v11871_v22  ;;  %15746 = vst [vmem:[#allocation99_spill] sm:$0xff] %v11880_v9  ;;  %10184 = vmatprep.subr.bf16.mxu0 %v10183_v17  ;;  %v2761_v22 = vand.u32 4294901760, %v2572_v18  ;;  %v11894_v20 = vsub.f32 %v2567_v37, %v2751_v1  ;;  %v11896_v51 = vsub.f32 %v2570_v43, %v2755_v50  ;;  %v11921_v1 = vld [vmem:[#allocation3 + $0x178] sm:$0xff]  ;;  %v2579_v50 = vld [vmem:[#allocation3 + $0x2a8] sm:$0xff] }
  0xd6   : > { %15747 = vst [vmem:[#allocation100_spill] sm:$0xff] %v11887_v55  ;;  %15748 = vst [vmem:[#allocation101_spill] sm:$0xff] %v11892_v27  ;;  %10186 = vmatpush3.bf16.msra.mxu0 %v10185_v13  ;;  %9574 = vmatpush1.bf16.msra.mxu1 %v11880_v9  ;;  %v11899_v17 = vsub.f32 %v2566_v3, %v2753_v2  ;;  %v11905_v7 = vsub.f32 %v2569_v5, %v2757_v11  ;;  %v15753_v13 = vand.u32 4294901760, %v11867_v31  ;;  %v11919_v3 = vld [vmem:[#allocation3 + $0x160] sm:$0xff] }
  0xd7   : > { %15749 = vst [vmem:[#allocation102_spill] sm:$0xff] %v11894_v20  ;;  %15750 = vst [vmem:[#allocation103_spill] sm:$0xff] %v11896_v51  ;;  %v10187_v46 = vpack.c.bf16 %v11892_v27, %v11887_v55  ;;  %v15755_v43 = vand.u32 4294901760, %v11869_v6  ;;  %v11923_v5 = vpack.c.bf16 %v2763_v57, %v2759_v48  ;;  %v11925_v11 = vsub.f32 %v2573_v33, %v2759_v48  ;;  %v2578_v55 = vld [vmem:[#allocation3 + $0x2a0] sm:$0xff] }
  0xd8   : > { %15751 = vst [vmem:[#allocation104_spill] sm:$0xff] %v11899_v17  ;;  %15752 = vst [vmem:[#allocation105_spill] sm:$0xff] %v11905_v7  ;;  %v11912_v37 = vsub.f32 %v11867_v31, %v15753_v13  ;;  %v11927_v9 = vsub.f32 %v2576_v56, %v2763_v57  ;;  %v11929_v27 = vpack.c.bf16 %v2765_v49, %v2761_v22  ;;  %v2582_v13 = vld [vmem:[#allocation3 + $0x2c0] sm:$0xff]  ;;  %v2581_v7 = vld [vmem:[#allocation3 + $0x2b8] sm:$0xff]  ;;  %v15185_v20 = vand.u32 4294901760, %v11901_v45 }
  0xd9   : > { %v11917_v2 = vsub.f32 %v11869_v6, %v15755_v43  ;;  %15757 = vst [vmem:[#allocation108_spill] sm:$0xff] %v11921_v1  ;;  %15758 = vst [vmem:[#allocation109_spill] sm:$0xff] %v11923_v5  ;;  %10188 = vmatprep.subr.bf16.mxu0 %v10187_v46  ;;  %v11933_v17 = vsub.f32 %v2572_v18, %v2761_v22  ;;  %v11935_v51 = vsub.f32 %v2575_v23, %v2765_v49 }
  0xda   : > { %15754 = vst [vmem:[#allocation106_spill] sm:$0xff] %v11912_v37  ;;  %15759 = vst [vmem:[#allocation110_spill] sm:$0xff] %v11925_v11  ;;  %9576 = vmatprep.subr.bf16.mxu1 %v11923_v5  ;;  %v15194_v48 = vand.u32 4294901760, %v11903_v54  ;;  %v15196_v56 = vand.u32 4294901760, %v11919_v3  ;;  %v2767_v57 = vand.u32 4294901760, %v2579_v50  ;;  %v11946_v18 = vsub.f32 %v11901_v45, %v15185_v20  ;;  %v2585_v5 = vld [vmem:[#allocation3 + $0x2d8] sm:$0xff] }
  0xdb   : > { %15756 = vst [vmem:[#allocation107_spill] sm:$0xff] %v11917_v2  ;;  %15760 = vst [vmem:[#allocation111_spill] sm:$0xff] %v11927_v9  ;;  %v10189_v43 = vpack.c.bf16 %v11917_v2, %v11912_v37  ;;  %9578 = vmatpush1.bf16.msra.mxu1 %v11929_v27  ;;  %v2771_v22 = vand.u32 4294901760, %v2582_v13  ;;  %v2769_v46 = vand.u32 4294901760, %v2578_v55  ;;  %v2773_v49 = vand.u32 4294901760, %v2581_v7  ;;  %v2588_v2 = vld [vmem:[#allocation3 + $0x2f0] sm:$0xff] }
  0xdc   : > { %15761 = vst [vmem:[#allocation112_spill] sm:$0xff] %v11929_v27  ;;  %15762 = vst [vmem:[#allocation113_spill] sm:$0xff] %v11933_v17  ;;  %v11951_v23 = vsub.f32 %v11903_v54, %v15194_v48  ;;  %v11956_v33 = vsub.f32 %v11919_v3, %v15196_v56  ;;  %v11963_v20 = vsub.f32 %v2579_v50, %v2767_v57  ;;  %v2584_v37 = vld [vmem:[#allocation3 + $0x2d0] sm:$0xff]  ;;  %v2587_v56 = vld [vmem:[#allocation3 + $0x2e8] sm:$0xff] }
  0xdd   : > { %15763 = vst [vmem:[#allocation114_spill] sm:$0xff] %v11935_v51  ;;  %10190 = vmatpush3.bf16.msra.mxu0 %v10189_v43  ;;  %15764 = vst [vmem:[#allocation115_spill] sm:$0xff] %v11946_v18  ;;  %v15767_v43 = vand.u32 4294901760, %v11921_v1  ;;  %v11965_v51 = vpack.c.bf16 %v2771_v22, %v2767_v57  ;;  %v11967_v17 = vsub.f32 %v2582_v13, %v2771_v22  ;;  %v15776_v57 = vand.u32 4294901760, %v11553_v19 }
  0xde   : > { %15765 = vst [vmem:[#allocation116_spill] sm:$0xff] %v11951_v23  ;;  %15766 = vst [vmem:[#allocation117_spill] sm:$0xff] %v11956_v33  ;;  %v11969_v48 = vpack.c.bf16 %v2773_v49, %v2769_v46  ;;  %v11971_v9 = vsub.f32 %v2578_v55, %v2769_v46  ;;  %v10191_v11 = vpack.c.bf16 %v11951_v23, %v11946_v18  ;;  %v15778_v55 = vand.u32 4294901760, %v11556_v40 }
  0xdf   : > { %v11961_v27 = vsub.f32 %v11921_v1, %v15767_v43  ;;  %15769 = vst [vmem:[#allocation119_spill] sm:$0xff] %v11963_v20  ;;  %15770 = vst [vmem:[#allocation120_spill] sm:$0xff] %v11965_v51  ;;  %v11977_v50 = vsub.f32 %v2581_v7, %v2773_v49  ;;  %v15775_v20 = vand.u32 4294901760, %v11550_v12  ;;  %9580 = vmatprep.subr.bf16.mxu1 %v11965_v51  ;;  %v15779_v13 = vand.u32 4294901760, %v11558_v41 }
  0xe0   : > { %15771 = vst [vmem:[#allocation121_spill] sm:$0xff] %v11967_v17  ;;  %15772 = vst [vmem:[#allocation122_spill] sm:$0xff] %v11969_v48  ;;  %v2775_v46 = vand.u32 4294901760, %v2585_v5  ;;  %v2779_v23 = vand.u32 4294901760, %v2588_v2  ;;  %v2777_v18 = vand.u32 4294901760, %v2584_v37  ;;  %10192 = vmatprep.subr.bf16.mxu0 %v10191_v11  ;;  %9582 = vmatpush1.bf16.msra.mxu1 %v11969_v48  ;;  %v2781_v7 = vand.u32 4294901760, %v2587_v56 }
  0xe1   : > { %15768 = vst [vmem:[#allocation118_spill] sm:$0xff] %v11961_v27  ;;  %15773 = vst [vmem:[#allocation123_spill] sm:$0xff] %v11971_v9  ;;  %v10193_v43 = vpack.c.bf16 %v11961_v27, %v11956_v33  ;;  %v11983_v1 = vpack.c.bf16 %v15776_v57, %v15775_v20  ;;  %v11990_v22 = vpack.c.bf16 %v15779_v13, %v15778_v55  ;;  %v15781_v12 = vand.u32 4294901760, %v11572_v16 }
  0xe2   : > { %15774 = vst [vmem:[#allocation124_spill] sm:$0xff] %v11977_v50  ;;  %v15782_v19 = vand.u32 4294901760, %v11590_v60  ;;  %v15784_v49 = vand.u32 4294901760, %v11594_v25  ;;  %v15785_v40 = vand.u32 4294901760, %v11596_v34  ;;  %v15213_v57 = vand.u32 4294901760, %v11309_v8 }
  0xe3   : > { %15777 = vst [vmem:[#allocation125_spill] sm:$0xff] %v11983_v1  ;;  %15780 = vst [vmem:[#allocation126_spill] sm:$0xff] %v11990_v22  ;;  %10194 = vmatpush3.bf16.msra.mxu0 %v10193_v43  ;;  %v12006_v55 = vpack.c.bf16 %v2779_v23, %v2775_v46  ;;  %v12008_v11 = vsub.f32 %v2585_v5, %v2775_v46  ;;  %v12010_v13 = vsub.f32 %v2588_v2, %v2779_v23  ;;  %v15879_v22 = vld [vmem:[#allocation92_spill] sm:$0xff] }
  0xe4   : > { %v11997_v20 = vpack.c.bf16 %v15782_v19, %v15781_v12  ;;  %v12003_v41 = vpack.c.bf16 %v15785_v40, %v15784_v49  ;;  %v12012_v16 = vsub.f32 %v2584_v37, %v2777_v18  ;;  %10196 = vmatprep.subr.bf16.mxu0 %v11983_v1  ;;  %v12015_v60 = vpack.c.bf16 %v2781_v7, %v2777_v18 }
  0xe5   : > { %15787 = vst [vmem:[#allocation129_spill] sm:$0xff] %v12006_v55  ;;  %15788 = vst [vmem:[#allocation130_spill] sm:$0xff] %v12008_v11  ;;  %v12017_v25 = vsub.f32 %v2587_v56, %v2781_v7  ;;  %v2819_v34 = vsub.f32 %v11309_v8, %v15213_v57  ;;  %v15211_v43 = vand.u32 4294901760, %v11326_v15  ;;  %9584 = vmatprep.subr.bf16.mxu1 %v12006_v55  ;;  %v15793_v5 = vand.u32 4294901760, %v11649_v53  ;;  %v15819_v57 = vld [vmem:[#allocation25_spill] sm:$0xff]  ;;  %v15842_v8 = vld [vmem:[#allocation108_spill] sm:$0xff] }
  0xe6   : > { %15783 = vst [vmem:[#allocation127_spill] sm:$0xff] %v11997_v20  ;;  %15786 = vst [vmem:[#allocation128_spill] sm:$0xff] %v12003_v41  ;;  %v15794_v2 = vand.u32 4294901760, %v11660_v59  ;;  %v15796_v23 = vand.u32 4294901760, %v11662_v0  ;;  %v15797_v18 = vand.u32 4294901760, %v11664_v4  ;;  %9586 = vmatpush1.bf16.msra.mxu1 %v12015_v60  ;;  %v15799_v53 = vand.u32 4294901760, %v11686_v24 }
  0xe7   : > { %15789 = vst [vmem:[#allocation131_spill] sm:$0xff] %v12010_v13  ;;  %15790 = vst [vmem:[#allocation132_spill] sm:$0xff] %v12012_v16  ;;  %v2820_v46 = vand.u32 4294901760, %v2819_v34  ;;  %v2831_v7 = vsub.f32 %v11326_v15, %v15211_v43  ;;  %v15800_v59 = vand.u32 4294901760, %v11699_v35  ;;  %v15802_v0 = vand.u32 4294901760, %v11718_v30 }
  0xe8   : > { %15791 = vst [vmem:[#allocation133_spill] sm:$0xff] %v12015_v60  ;;  %15792 = vst [vmem:[#allocation134_spill] sm:$0xff] %v12017_v25  ;;  %v12028_v37 = vpack.c.bf16 %v15794_v2, %v15793_v5  ;;  %v12034_v56 = vpack.c.bf16 %v15797_v18, %v15796_v23  ;;  %v15803_v4 = vand.u32 4294901760, %v11720_v39  ;;  %v15210_v34 = vand.u32 4294901760, %v11489_v26  ;;  %v15820_v60 = vld [vmem:[#allocation27_spill] sm:$0xff] }
  0xe9   : > { %v2832_v12 = vand.u32 4294901760, %v2831_v7  ;;  %v12044_v19 = vpack.c.bf16 %v15800_v59, %v15799_v53  ;;  %v15208_v5 = vand.u32 4294901760, %v11491_v32  ;;  %v15206_v2 = vand.u32 4294901760, %v11495_v14 }
  0xea   : > { %15795 = vst [vmem:[#allocation135_spill] sm:$0xff] %v12028_v37  ;;  %15798 = vst [vmem:[#allocation136_spill] sm:$0xff] %v12034_v56  ;;  %v12050_v40 = vpack.c.bf16 %v15803_v4, %v15802_v0  ;;  %v15204_v24 = vand.u32 4294901760, %v11497_v21  ;;  %v2867_v35 = vsub.f32 %v11489_v26, %v15210_v34  ;;  %v15805_v23 = vand.u32 4294901760, %v11737_v42 }
  0xeb   : > { %15801 = vst [vmem:[#allocation137_spill] sm:$0xff] %v12044_v19  ;;  %v9587_v49 = vpack.c.bf16 %v2832_v12, %v2820_v46  ;;  %v15806_v30 = vand.u32 4294901760, %v11754_v29  ;;  %v15808_v18 = vand.u32 4294901760, %v11765_v52  ;;  %v15809_v46 = vand.u32 4294901760, %v11767_v10  ;;  %v15873_v19 = vld [vmem:[#allocation82_spill] sm:$0xff] }
  0xec   : > { %15804 = vst [vmem:[#allocation138_spill] sm:$0xff] %v12050_v40  ;;  %v2879_v12 = vsub.f32 %v11491_v32, %v15208_v5  ;;  %v2873_v53 = vsub.f32 %v11495_v14, %v15206_v2  ;;  %v2885_v42 = vsub.f32 %v11497_v21, %v15204_v24  ;;  %v15205_v29 = vand.u32 4294901760, %v11500_v36 }
  0xed   : > { %9588 = vmatprep.subr.bf16.mxu1 %v9587_v49  ;;  %v12063_v39 = vpack.c.bf16 %v15806_v30, %v15805_v23  ;;  %v12069_v7 = vpack.c.bf16 %v15809_v46, %v15808_v18  ;;  %v2868_v59 = vand.u32 4294901760, %v2867_v35  ;;  %v15207_v52 = vand.u32 4294901760, %v11505_v38 }
  0xee   : > { %v15209_v10 = vand.u32 4294901760, %v11509_v44  ;;  %v15212_v49 = vand.u32 4294901760, %v11511_v28  ;;  %v2880_v0 = vand.u32 4294901760, %v2879_v12  ;;  %v2874_v4 = vand.u32 4294901760, %v2873_v53 }
  0xef   : > { %15807 = vst [vmem:[#allocation139_spill] sm:$0xff] %v12063_v39  ;;  %15810 = vst [vmem:[#allocation140_spill] sm:$0xff] %v12069_v7  ;;  %v2886_v23 = vand.u32 4294901760, %v2885_v42  ;;  %v2891_v30 = vsub.f32 %v11500_v36, %v15205_v29  ;;  %v2903_v18 = vsub.f32 %v11505_v38, %v15207_v52  ;;  %v15811_v12 = vand.u32 4294901760, %v11787_v47 }
  0xf0   : > { %v2897_v35 = vsub.f32 %v11509_v44, %v15209_v10  ;;  %v2909_v46 = vsub.f32 %v11511_v28, %v15212_v49  ;;  %v15812_v53 = vand.u32 4294901760, %v11815_v63  ;;  %v12102_v24 = vpack.c.bf16 %v2880_v0, %v2868_v59  ;;  %v15822_v59 = vld [vmem:[#allocation30_spill] sm:$0xff] }
  0xf1   : > { %v12104_v29 = vpack.c.bf16 %v2886_v23, %v2874_v4  ;;  %v2892_v2 = vand.u32 4294901760, %v2891_v30  ;;  %v15816_v52 = vand.u32 4294901760, %v11818_v62  ;;  %v15817_v5 = vand.u32 4294901760, %v11820_v58  ;;  %v15823_v4 = vld [vmem:[#allocation94_spill] sm:$0xff] }
  0xf2   : > { %v12100_v42 = vpack.c.bf16 %v15812_v53, %v15811_v12  ;;  %15814 = vst [vmem:[#allocation142_spill] sm:$0xff] %v12102_v24  ;;  %v2904_v34 = vand.u32 4294901760, %v2903_v18  ;;  %v2898_v43 = vand.u32 4294901760, %v2897_v35  ;;  %v2910_v49 = vand.u32 4294901760, %v2909_v46  ;;  %v15821_v12 = vld [vmem:[#allocation28_spill] sm:$0xff] }
  0xf3   : > { %15815 = vst [vmem:[#allocation143_spill] sm:$0xff] %v12104_v29  ;;  %v12110_v10 = vpack.c.bf16 %v15817_v5, %v15816_v52  ;;  %v15216_v47 = vand.u32 4294901760, %v15819_v57  ;;  %v15219_v63 = vand.u32 4294901760, %v15820_v60  ;;  %v15220_v53 = vand.u32 4294901760, %v15821_v12  ;;  %v15870_v29 = vld [vmem:[#allocation79_spill] sm:$0xff] }
  0xf4   : > { %15813 = vst [vmem:[#allocation141_spill] sm:$0xff] %v12100_v42  ;;  %v15221_v0 = vand.u32 4294901760, %v15822_v59  ;;  %v15824_v23 = vand.u32 4294901760, %v15823_v4  ;;  %v15825_v30 = vand.u32 4294901760, %v11850_v61  ;;  %v12122_v58 = vpack.c.bf16 %v2904_v34, %v2892_v2  ;;  %v15832_v2 = vld [vmem:[#allocation44_spill] sm:$0xff] }
  0xf5   : > { %15818 = vst [vmem:[#allocation144_spill] sm:$0xff] %v12110_v10  ;;  %v12124_v5 = vpack.c.bf16 %v2910_v49, %v2898_v43  ;;  %v2915_v52 = vsub.f32 %v15819_v57, %v15216_v47  ;;  %v15829_v18 = vand.u32 4294901760, %v11867_v31  ;;  %v15830_v35 = vand.u32 4294901760, %v11869_v6  ;;  %v15833_v31 = vld [vmem:[#allocation45_spill] sm:$0xff]  ;;  %v15834_v6 = vld [vmem:[#allocation46_spill] sm:$0xff] }
  0xf6   : > { %v12120_v62 = vpack.c.bf16 %v15825_v30, %v15824_v23  ;;  %15827 = vst [vmem:[#allocation145_spill] sm:$0xff] %v12122_v58  ;;  %v2927_v61 = vsub.f32 %v15820_v60, %v15219_v63  ;;  %v2921_v34 = vsub.f32 %v15821_v12, %v15220_v53  ;;  %v2933_v43 = vsub.f32 %v15822_v59, %v15221_v0 }
  0xf7   : > { %15828 = vst [vmem:[#allocation146_spill] sm:$0xff] %v12124_v5  ;;  %v12133_v46 = vpack.c.bf16 %v15830_v35, %v15829_v18  ;;  %v15226_v49 = vand.u32 4294901760, %v15832_v2  ;;  %v2916_v4 = vand.u32 4294901760, %v2915_v52  ;;  %v15229_v23 = vand.u32 4294901760, %v15833_v31  ;;  %v15835_v18 = vld [vmem:[#allocation47_spill] sm:$0xff] }
  0xf8   : > { %15826 = vst [vmem:[#allocation94_spill] sm:$0xff] %v12120_v62  ;;  %v15234_v30 = vand.u32 4294901760, %v15834_v6  ;;  %v15239_v35 = vand.u32 4294901760, %v15835_v18  ;;  %v2928_v47 = vand.u32 4294901760, %v2927_v61  ;;  %v2922_v55 = vand.u32 4294901760, %v2921_v34  ;;  %v15846_v62 = vld [vmem:[#allocation49_spill] sm:$0xff] }
  0xf9   : > { %15831 = vst [vmem:[#allocation147_spill] sm:$0xff] %v12133_v46  ;;  %v2934_v63 = vand.u32 4294901760, %v2933_v43  ;;  %v2939_v53 = vsub.f32 %v15832_v2, %v15226_v49  ;;  %v2951_v0 = vsub.f32 %v15833_v31, %v15229_v23  ;;  %v15836_v61 = vand.u32 4294901760, %v11901_v45  ;;  %v15845_v46 = vld [vmem:[#allocation48_spill] sm:$0xff] }
  0xfa   : > { %v2945_v52 = vsub.f32 %v15834_v6, %v15234_v30  ;;  %v2957_v48 = vsub.f32 %v15835_v18, %v15239_v35  ;;  %v15837_v34 = vand.u32 4294901760, %v11903_v54  ;;  %v12166_v51 = vpack.c.bf16 %v2928_v47, %v2916_v4  ;;  %v15848_v47 = vld [vmem:[#allocation51_spill] sm:$0xff] }
  0xfb   : > { %v12168_v49 = vpack.c.bf16 %v2934_v63, %v2922_v55  ;;  %v2940_v15 = vand.u32 4294901760, %v2939_v53  ;;  %v15841_v23 = vand.u32 4294901760, %v11919_v3  ;;  %v15843_v1 = vand.u32 4294901760, %v15842_v8 }
  0xfc   : > { %v12164_v43 = vpack.c.bf16 %v15837_v34, %v15836_v61  ;;  %15839 = vst [vmem:[#allocation149_spill] sm:$0xff] %v12166_v51  ;;  %v2952_v27 = vand.u32 4294901760, %v2951_v0  ;;  %v2946_v33 = vand.u32 4294901760, %v2945_v52  ;;  %v2958_v35 = vand.u32 4294901760, %v2957_v48  ;;  %v15847_v61 = vld [vmem:[#allocation50_spill] sm:$0xff]  ;;  %v15865_v51 = vld [vmem:[#allocation71_spill] sm:$0xff] }
  0xfd   : > { %15840 = vst [vmem:[#allocation150_spill] sm:$0xff] %v12168_v49  ;;  %v12174_v30 = vpack.c.bf16 %v15843_v1, %v15841_v23  ;;  %v15243_v45 = vand.u32 4294901760, %v15845_v46  ;;  %v15242_v54 = vand.u32 4294901760, %v15846_v62  ;;  %v15245_v34 = vand.u32 4294901760, %v15847_v61 }
  0xfe   : > { %15838 = vst [vmem:[#allocation148_spill] sm:$0xff] %v12164_v43  ;;  %v15248_v4 = vand.u32 4294901760, %v15848_v47  ;;  %v12180_v55 = vpack.c.bf16 %v2952_v27, %v2940_v15  ;;  %v12182_v63 = vpack.c.bf16 %v2958_v35, %v2946_v33  ;;  %v15851_v27 = vld [vmem:[#allocation52_spill] sm:$0xff]  ;;  %v15852_v35 = vld [vmem:[#allocation53_spill] sm:$0xff]  ;;  %v15263_v5 = vand.u32 4294901760, %v15865_v51 }
  0xff   : > { %15844 = vst [vmem:[#allocation108_spill] sm:$0xff] %v12174_v30  ;;  %v2963_v8 = vsub.f32 %v15845_v46, %v15243_v45  ;;  %v2975_v3 = vsub.f32 %v15846_v62, %v15242_v54  ;;  %v2969_v1 = vsub.f32 %v15847_v61, %v15245_v34  ;;  %v15247_v33 = vand.u32 4294901760, %v15851_v27  ;;  %v15853_v45 = vld [vmem:[#allocation54_spill] sm:$0xff]  ;;  %v15959_v61 = vld [vmem:[#allocation41_spill] sm:$0xff] }
 0x100   : > { %15849 = vst [vmem:[#allocation151_spill] sm:$0xff] %v12180_v55  ;;  %15850 = vst [vmem:[#allocation152_spill] sm:$0xff] %v12182_v63  ;;  %v2981_v48 = vsub.f32 %v15848_v47, %v15248_v4  ;;  %v15249_v52 = vand.u32 4294901760, %v15852_v35  ;;  %v15250_v30 = vand.u32 4294901760, %v15853_v45  ;;  %v15854_v63 = vld [vmem:[#allocation55_spill] sm:$0xff]  ;;  %v15857_v4 = vld [vmem:[#allocation58_spill] sm:$0xff] }
 0x101   : > { %v2964_v15 = vand.u32 4294901760, %v2963_v8  ;;  %v2976_v53 = vand.u32 4294901760, %v2975_v3  ;;  %v2970_v0 = vand.u32 4294901760, %v2969_v1  ;;  %v2987_v54 = vsub.f32 %v15851_v27, %v15247_v33  ;;  %v15957_v27 = vld [vmem:[#allocation38_spill] sm:$0xff] }
 0x102   : > { %v2982_v23 = vand.u32 4294901760, %v2981_v48  ;;  %v15251_v34 = vand.u32 4294901760, %v15854_v63  ;;  %v2999_v8 = vsub.f32 %v15852_v35, %v15249_v52  ;;  %v2993_v1 = vsub.f32 %v15853_v45, %v15250_v30  ;;  %v15860_v52 = vld [vmem:[#allocation61_spill] sm:$0xff]  ;;  %v15960_v46 = vld [vmem:[#allocation42_spill] sm:$0xff] }
 0x103   : > { %v12203_v43 = vpack.c.bf16 %v2976_v53, %v2964_v15  ;;  %v2988_v3 = vand.u32 4294901760, %v2987_v54  ;;  %v15253_v49 = vand.u32 4294901760, %v15857_v4  ;;  %v15270_v39 = vand.u32 4294901760, %v15870_v29  ;;  %v15956_v45 = vld [vmem:[#allocation37_spill] sm:$0xff] }
 0x104   : > { %v12205_v55 = vpack.c.bf16 %v2982_v23, %v2970_v0  ;;  %v3005_v48 = vsub.f32 %v15854_v63, %v15251_v34  ;;  %v3000_v33 = vand.u32 4294901760, %v2999_v8  ;;  %v2994_v15 = vand.u32 4294901760, %v2993_v1  ;;  %v15858_v0 = vld [vmem:[#allocation59_spill] sm:$0xff]  ;;  %v15862_v34 = vld [vmem:[#allocation62_spill] sm:$0xff] }
 0x105   : > { %15855 = vst [vmem:[#allocation153_spill] sm:$0xff] %v12203_v43  ;;  %v15254_v23 = vand.u32 4294901760, %v15858_v0  ;;  %v3011_v54 = vsub.f32 %v15857_v4, %v15253_v49  ;;  %v15257_v43 = vand.u32 4294901760, %v15860_v52  ;;  %v15256_v10 = vand.u32 4294901760, %v15862_v34  ;;  %v15863_v49 = vld [vmem:[#allocation67_spill] sm:$0xff]  ;;  %v15958_v35 = vld [vmem:[#allocation148_spill] sm:$0xff] }
 0x106   : > { %15856 = vst [vmem:[#allocation154_spill] sm:$0xff] %v12205_v55  ;;  %v3006_v53 = vand.u32 4294901760, %v3005_v48  ;;  %v12218_v55 = vpack.c.bf16 %v3000_v33, %v2988_v3  ;;  %v15274_v56 = vand.u32 4294901760, %v15873_v19  ;;  %v15367_v63 = vand.u32 4294901760, %v15956_v45  ;;  %v15963_v6 = vld [vmem:[#allocation108_spill] sm:$0xff] }
 0x107   : > { %v3023_v8 = vsub.f32 %v15858_v0, %v15254_v23  ;;  %v3012_v1 = vand.u32 4294901760, %v3011_v54  ;;  %v3017_v33 = vsub.f32 %v15860_v52, %v15257_v43  ;;  %v3029_v48 = vsub.f32 %v15862_v34, %v15256_v10 }
 0x108   : > { %15859 = vst [vmem:[#allocation155_spill] sm:$0xff] %v12218_v55  ;;  %v12224_v30 = vpack.c.bf16 %v3006_v53, %v2994_v15  ;;  %v15259_v55 = vand.u32 4294901760, %v15863_v49  ;;  %v15864_v53 = vld [vmem:[#allocation69_spill] sm:$0xff]  ;;  %v3041_v10 = vsub.f32 %v15865_v51, %v15263_v5  ;;  %v15366_v47 = vand.u32 4294901760, %v15959_v61  ;;  %v15973_v61 = vld [vmem:[#allocation74_spill] sm:$0xff] }
 0x109   : > { %v3024_v3 = vand.u32 4294901760, %v3023_v8  ;;  %v3018_v15 = vand.u32 4294901760, %v3017_v33  ;;  %v3030_v42 = vand.u32 4294901760, %v3029_v48  ;;  %v15867_v33 = vld [vmem:[#allocation72_spill] sm:$0xff]  ;;  %v15365_v62 = vand.u32 4294901760, %v15960_v46  ;;  %v15972_v46 = vld [vmem:[#allocation73_spill] sm:$0xff] }
 0x10a   : > { %15861 = vst [vmem:[#allocation156_spill] sm:$0xff] %v12224_v30  ;;  %v15261_v30 = vand.u32 4294901760, %v15864_v53  ;;  %v3035_v54 = vsub.f32 %v15863_v49, %v15259_v55  ;;  %v15266_v43 = vand.u32 4294901760, %v15867_v33  ;;  %v15869_v55 = vld [vmem:[#allocation78_spill] sm:$0xff]  ;;  %v15384_v45 = vand.u32 4294901760, %v15973_v61  ;;  %v15985_v61 = vld [vmem:[#allocation95_spill] sm:$0xff] }
 0x10b   : > { %v12239_v23 = vpack.c.bf16 %v3024_v3, %v3012_v1  ;;  %v12251_v7 = vpack.c.bf16 %v3030_v42, %v3018_v15  ;;  %v3042_v3 = vand.u32 4294901760, %v3041_v10  ;;  %v3071_v10 = vsub.f32 %v15870_v29, %v15270_v39  ;;  %v15878_v39 = vld [vmem:[#allocation91_spill] sm:$0xff] }
 0x10c   : > { %v3047_v8 = vsub.f32 %v15864_v53, %v15261_v30  ;;  %v3036_v58 = vand.u32 4294901760, %v3035_v54  ;;  %v3053_v48 = vsub.f32 %v15867_v33, %v15266_v43  ;;  %v15871_v30 = vld [vmem:[#allocation81_spill] sm:$0xff]  ;;  %v15277_v20 = vand.u32 4294901760, %v15878_v39  ;;  %v15909_v53 = vld [vmem:[#allocation15_spill] sm:$0xff] }
 0x10d   : > { %15866 = vst [vmem:[#allocation157_spill] sm:$0xff] %v12239_v23  ;;  %15868 = vst [vmem:[#allocation158_spill] sm:$0xff] %v12251_v7  ;;  %v15267_v23 = vand.u32 4294901760, %v15869_v55  ;;  %v15273_v40 = vand.u32 4294901760, %v15871_v30  ;;  %v15876_v7 = vld [vmem:[#allocation89_spill] sm:$0xff] }
 0x10e   : > { %v3048_v1 = vand.u32 4294901760, %v3047_v8  ;;  %v3054_v5 = vand.u32 4294901760, %v3053_v48  ;;  %v15276_v37 = vand.u32 4294901760, %v15876_v7 }
 0x10f   : > { %v3059_v42 = vsub.f32 %v15869_v55, %v15267_v23  ;;  %v3065_v15 = vsub.f32 %v15871_v30, %v15273_v40  ;;  %v15279_v40 = vand.u32 4294901760, %v15879_v22  ;;  %v15904_v30 = vld [vmem:[#allocation8_spill] sm:$0xff] }
 0x110   : > { %v12259_v24 = vpack.c.bf16 %v3048_v1, %v3036_v58  ;;  %v12271_v54 = vpack.c.bf16 %v3054_v5, %v3042_v3  ;;  %v3077_v58 = vsub.f32 %v15873_v19, %v15274_v56  ;;  %v3072_v1 = vand.u32 4294901760, %v3071_v10 }
 0x111   : > { %v3060_v8 = vand.u32 4294901760, %v3059_v42  ;;  %v3066_v48 = vand.u32 4294901760, %v3065_v15  ;;  %v3095_v42 = vsub.f32 %v15876_v7, %v15276_v37  ;;  %v3089_v10 = vsub.f32 %v15878_v39, %v15277_v20 }
 0x112   : > { %15872 = vst [vmem:[#allocation159_spill] sm:$0xff] %v12259_v24  ;;  %15874 = vst [vmem:[#allocation160_spill] sm:$0xff] %v12271_v54  ;;  %v3078_v43 = vand.u32 4294901760, %v3077_v58  ;;  %v15875_v24 = vld [vmem:[#allocation88_spill] sm:$0xff]  ;;  %v3101_v15 = vsub.f32 %v15879_v22, %v15279_v40  ;;  %v15323_v19 = vand.u32 4294901760, %v15904_v30 }
 0x113   : > { %v15275_v23 = vand.u32 4294901760, %v15875_v24  ;;  %v12278_v41 = vpack.c.bf16 %v3072_v1, %v3060_v8  ;;  %v3096_v8 = vand.u32 4294901760, %v3095_v42  ;;  %v15884_v54 = vld [vmem:[#allocation104_spill] sm:$0xff]  ;;  %v15886_v42 = vld [vmem:[#allocation105_spill] sm:$0xff] }
 0x114   : > { %v12282_v5 = vpack.c.bf16 %v3078_v43, %v3066_v48  ;;  %v15881_v43 = vld [vmem:[#allocation102_spill] sm:$0xff]  ;;  %v3090_v48 = vand.u32 4294901760, %v3089_v10  ;;  %v3102_v56 = vand.u32 4294901760, %v3101_v15  ;;  %v15285_v20 = vand.u32 4294901760, %v15884_v54 }
 0x115   : > { %15877 = vst [vmem:[#allocation161_spill] sm:$0xff] %v12278_v41  ;;  %v3083_v3 = vsub.f32 %v15875_v24, %v15275_v23  ;;  %v15280_v1 = vand.u32 4294901760, %v15881_v43  ;;  %v15286_v40 = vand.u32 4294901760, %v15886_v42 }
 0x116   : > { %15880 = vst [vmem:[#allocation162_spill] sm:$0xff] %v12282_v5  ;;  %v15882_v5 = vld [vmem:[#allocation103_spill] sm:$0xff]  ;;  %v12304_v39 = vpack.c.bf16 %v3102_v56, %v3090_v48  ;;  %v3113_v15 = vsub.f32 %v15884_v54, %v15285_v20  ;;  %v2467_v20 = vlaneseq }
 0x117   : > { %v3084_v58 = vand.u32 4294901760, %v3083_v3  ;;  %v15283_v23 = vand.u32 4294901760, %v15882_v5  ;;  %v3107_v37 = vsub.f32 %v15881_v43, %v15280_v1  ;;  %v15887_v1 = vld [vmem:[#allocation110_spill] sm:$0xff]  ;;  %v15888_v48 = vld [vmem:[#allocation111_spill] sm:$0xff]  ;;  %v15889_v43 = vld [vmem:[#allocation113_spill] sm:$0xff] }
 0x118   : > { %15885 = vst [vmem:[#allocation164_spill] sm:$0xff] %v12304_v39  ;;  %v3114_v56 = vand.u32 4294901760, %v3113_v15  ;;  %v15292_v39 = vand.u32 4294901760, %v15888_v48  ;;  %v15295_v22 = vand.u32 4294901760, %v15889_v43 }
 0x119   : > { %v12298_v41 = vpack.c.bf16 %v3096_v8, %v3084_v58  ;;  %v3119_v3 = vsub.f32 %v15882_v5, %v15283_v23  ;;  %v3108_v10 = vand.u32 4294901760, %v3107_v37  ;;  %v3125_v8 = vsub.f32 %v15886_v42, %v15286_v40  ;;  %v15891_v40 = vld [vmem:[#allocation114_spill] sm:$0xff] }
 0x11a   : > { %v3137_v15 = vsub.f32 %v15889_v43, %v15295_v22  ;;  %v15297_v42 = vand.u32 4294901760, %v15891_v40  ;;  %v12339_v22 = vshrl.u32 %v2467_v20, 7  ;;  %v15304_v20 = vand.u32 4294901760, %v12008_v11 }
 0x11b   : > { %15883 = vst [vmem:[#allocation163_spill] sm:$0xff] %v12298_v41  ;;  %v3120_v58 = vand.u32 4294901760, %v3119_v3  ;;  %v15289_v41 = vand.u32 4294901760, %v15887_v1  ;;  %v3126_v5 = vand.u32 4294901760, %v3125_v8  ;;  %v3143_v3 = vsub.f32 %v15888_v48, %v15292_v39 }
 0x11c   : > { %v3138_v8 = vand.u32 4294901760, %v3137_v15  ;;  %v15299_v39 = vand.u32 4294901760, %v11967_v17  ;;  %v15300_v48 = vand.u32 4294901760, %v11971_v9  ;;  %15894 = vst [vmem:[#allocation167_spill] sm:$0xff] %v12339_v22 }
 0x11d   : > { %v12319_v23 = vpack.c.bf16 %v3120_v58, %v3108_v10  ;;  %v3131_v37 = vsub.f32 %v15887_v1, %v15289_v41  ;;  %v12331_v54 = vpack.c.bf16 %v3126_v5, %v3114_v56  ;;  %v3144_v58 = vand.u32 4294901760, %v3143_v3  ;;  %v15893_v1 = vld [vmem:[#allocation119_spill] sm:$0xff] }
 0x11e   : > { %v3149_v41 = vsub.f32 %v15891_v40, %v15297_v42  ;;  %v15298_v7 = vand.u32 4294901760, %v15893_v1  ;;  %v15301_v56 = vand.u32 4294901760, %v11977_v50  ;;  %v3167_v3 = vsub.f32 %v11967_v17, %v15299_v39  ;;  %v15931_v17 = vld [vmem:[#allocation127_spill] sm:$0xff] }
 0x11f   : > { %15890 = vst [vmem:[#allocation165_spill] sm:$0xff] %v12319_v23  ;;  %15892 = vst [vmem:[#allocation166_spill] sm:$0xff] %v12331_v54  ;;  %v3132_v10 = vand.u32 4294901760, %v3131_v37  ;;  %v3161_v15 = vsub.f32 %v11971_v9, %v15300_v48  ;;  %v3179_v39 = vsub.f32 %v12008_v11, %v15304_v20  ;;  %v15310_v20 = vsub.s32 2, %v12339_v22 }
 0x120   : > { %v3150_v5 = vand.u32 4294901760, %v3149_v41  ;;  %v3155_v37 = vsub.f32 %v15893_v1, %v15298_v7  ;;  %v3173_v41 = vsub.f32 %v11977_v50, %v15301_v56  ;;  %v15309_v56 = vand.u32 4294901760, %v12017_v25 }
 0x121   : > { %v12341_v43 = vpack.c.bf16 %v3144_v58, %v3132_v10  ;;  %v15305_v10 = vand.u32 4294901760, %v12010_v13  ;;  %v15306_v58 = vand.u32 4294901760, %v12012_v16  ;;  %v3162_v54 = vand.u32 4294901760, %v3161_v15 }
 0x122   : > { %v12354_v42 = vpack.c.bf16 %v3150_v5, %v3138_v8  ;;  %v3156_v7 = vand.u32 4294901760, %v3155_v37  ;;  %v3174_v48 = vand.u32 4294901760, %v3173_v41  ;;  %v3180_v37 = vand.u32 4294901760, %v3179_v39 }
 0x123   : > { %15895 = vst [vmem:[#allocation168_spill] sm:$0xff] %v12341_v43  ;;  %v3168_v43 = vand.u32 4294901760, %v3167_v3  ;;  %v3191_v8 = vsub.f32 %v12010_v13, %v15305_v10  ;;  %v3185_v5 = vsub.f32 %v12012_v16, %v15306_v58  ;;  %v3197_v41 = vsub.f32 %v12017_v25, %v15309_v56  ;;  %v15953_v25 = vld [vmem:[#allocation150_spill] sm:$0xff] }
 0x124   : > { %15896 = vst [vmem:[#allocation169_spill] sm:$0xff] %v12354_v42  ;;  %v12373_v3 = vpack.c.bf16 %v3174_v48, %v3162_v54  ;;  %v2825_v10 = vsub.f32 %v15904_v30, %v15323_v19  ;;  %v15915_v54 = vld [vmem:[#allocation16_spill] sm:$0xff] }
 0x125   : > { %v12371_v42 = vpack.c.bf16 %v3168_v43, %v3156_v7  ;;  %v3192_v15 = vand.u32 4294901760, %v3191_v8  ;;  %v3186_v50 = vand.u32 4294901760, %v3185_v5  ;;  %v3198_v7 = vand.u32 4294901760, %v3197_v41  ;;  %v2465_v43 = vld [vmem:[%s15007_s4] sm:$0x7] }
 0x126   : > { %v15923_v34 = vand.u32 4294901760, %v15915_v54 }
 0x127   : > { %v12383_v16 = vpack.c.bf16 %v3192_v15, %v3180_v37  ;;  %v12392_v48 = vpack.c.bf16 %v3198_v7, %v3186_v50  ;;  %v2478_v37 = vrot.slane %v2465_v43, %v15310_v20  ;;  %v15322_v20 = vsub.s32 1, %v12339_v22 }
 0x14c   : > { %v8996_v23 = vpop.f32.mrb[4].mxu0 }
 0x14d   : > { %v1108_v24 = vpop.f32.mrb[5].mxu0 }
 0x158   : > { %v9054_v15 = vpop.f32.mrb[0].mxu1 }
 0x159   : > { %v10867_v41 = vadd.f32 %v9054_v15, %v8996_v23  ;;  %v2455_v56 = vpop.f32.mrb[1].mxu1  ;;  %v15318_v15 = vsub.s32 0, %v12339_v22 }
 0x15a   : > { %v10868_v39 = vadd.f32 %v2455_v56, %v1108_v24  ;;  %v15907_v24 = vld [vmem:[#allocation9_spill] sm:$0xff]  ;;  %v15908_v56 = vld [vmem:[#allocation14_spill] sm:$0xff] }
 0x15b   : > { %v12404_v7 = vadd.f32 %v10867_v41, %v2478_v37 }
 0x15c   : > { %v12406_v58 = vadd.f32 %v10868_v39, %v2478_v37  ;;  %v2470_v39 = vrot.slane %v2465_v43, %v15318_v15  ;;  %v2474_v37 = vrot.slane %v2465_v43, %v15322_v20  ;;  %v15917_v43 = vand.u32 4294901760, %v15908_v56  ;;  %v15918_v20 = vld [vmem:[#allocation17_spill] sm:$0xff] }
 0x15d   : > { %15897 = vst [vmem:[#allocation170_spill] sm:$0xff] %v12404_v7 }
 0x15e   : > { %v2843_v19 = vsub.f32 %v15908_v56, %v15917_v43 }
 0x178   : > { %v1964_v23 = vpop.f32.mrb[0].mxu0 }
 0x179   : > { %v2482_v49 = vadd.f32 %v2470_v39, %v1964_v23  ;;  %v1966_v50 = vpop.f32.mrb[1].mxu0 }
 0x17a   : > { %v2483_v8 = vadd.f32 %v2474_v37, %v1966_v50 }
 0x17b   : > { %v2488_v15 = vmax.f32 %v2482_v49, 0.0  ;;  %v15914_v49 = vand.u32 4294901760, %v15907_v24 }
 0x17c   : > { %v2489_v55 = vmax.f32 %v2483_v8, 0.0  ;;  %v1971_v41 = vpop.f32.mrb[2].mxu0 }
 0x17d   : > { %v12453_v29 = vand.u32 4294901760, %v2488_v15  ;;  %v2485_v50 = vadd.f32 %v2470_v39, %v1971_v41  ;;  %v1973_v5 = vpop.f32.mrb[3].mxu0  ;;  %v2837_v22 = vsub.f32 %v15907_v24, %v15914_v49  ;;  %v15920_v41 = vand.u32 4294901760, %v15909_v53 }
 0x17e   : > { %v12459_v7 = vand.u32 4294901760, %v2489_v55  ;;  %v2486_v8 = vadd.f32 %v2474_v37, %v1973_v5  ;;  %v2826_v37 = vand.u32 4294901760, %v2825_v10  ;;  %v2844_v10 = vand.u32 4294901760, %v2843_v19  ;;  %v15929_v19 = vld [vmem:[#allocation126_spill] sm:$0xff] }
 0x17f   : > { %15913 = vst [vmem:[#allocation8_spill] sm:$0xff] %v12453_v29  ;;  %v12466_v23 = vsub.f32 %v2488_v15, %v12453_v29  ;;  %v2491_v39 = vmax.f32 %v2485_v50, 0.0  ;;  %v2855_v33 = vsub.f32 %v15909_v53, %v15920_v41  ;;  %v2838_v50 = vand.u32 4294901760, %v2837_v22 }
 0x180   : > { %15916 = vst [vmem:[#allocation9_spill] sm:$0xff] %v12459_v7  ;;  %v12474_v51 = vsub.f32 %v2489_v55, %v12459_v7  ;;  %v2492_v5 = vmax.f32 %v2486_v8, 0.0  ;;  %v2849_v41 = vsub.f32 %v15915_v54, %v15923_v34  ;;  %v15926_v8 = vand.u32 4294901760, %v15918_v20 }
 0x181   : > { %15919 = vst [vmem:[#allocation14_spill] sm:$0xff] %v12466_v23  ;;  %v12479_v52 = vand.u32 4294901760, %v12466_v23  ;;  %v12481_v15 = vand.u32 4294901760, %v2491_v39  ;;  %v2856_v34 = vand.u32 4294901760, %v2855_v33  ;;  %v9589_v0 = vpack.c.bf16 %v2838_v50, %v2826_v37  ;;  %v15934_v50 = vld [vmem:[#allocation128_spill] sm:$0xff] }
 0x182   : > { %v12486_v4 = vand.u32 4294901760, %v2492_v5  ;;  %5401 = vmatprep.mubr.f32.mxu0 %v12474_v51  ;;  %v12490_v55 = vand.u32 4294901760, %v12474_v51  ;;  %v2861_v40 = vsub.f32 %v15918_v20, %v15926_v8  ;;  %v2850_v9 = vand.u32 4294901760, %v2849_v41 }
 0x183   : > { %15922 = vst [vmem:[#allocation15_spill] sm:$0xff] %v12481_v15  ;;  %v12496_v49 = vsub.f32 %v2491_v39, %v12481_v15  ;;  %5404 = vmatmul.mubr.f32.vlgmr.msra.gmra.mrb[6].mxu0 %v12466_v23  ;;  %v2792_v22 = vsub.f32 %v12466_v23, %v12479_v52  ;;  %v9591_v39 = vpack.c.bf16 %v2856_v34, %v2844_v10  ;;  %v15938_v34 = vld [vmem:[#allocation136_spill] sm:$0xff] }
 0x184   : > { %15924 = vst [vmem:[#allocation16_spill] sm:$0xff] %v12486_v4  ;;  %15925 = vst [vmem:[#allocation17_spill] sm:$0xff] %v12490_v55  ;;  %v12504_v43 = vsub.f32 %v2492_v5, %v12486_v4  ;;  %10198 = vmatpush3.bf16.msra.mxu0 %v15929_v19  ;;  %v2786_v8 = vsub.f32 %v12474_v51, %v12490_v55  ;;  %v2862_v11 = vand.u32 4294901760, %v2861_v40  ;;  %v15935_v40 = vld [vmem:[#allocation135_spill] sm:$0xff] }
 0x185   : > { %15927 = vst [vmem:[#allocation171_spill] sm:$0xff] %v12496_v49  ;;  %10200 = vmatprep.subr.bf16.mxu0 %v15931_v17  ;;  %v12513_v23 = vand.u32 4294901760, %v12496_v49  ;;  %v12522_v13 = vand.u32 4294901760, %v2792_v22 }
 0x186   : > { %15928 = vst [vmem:[#allocation172_spill] sm:$0xff] %v12504_v43  ;;  %5410 = vmatprep.mubr.f32.mxu0 %v12504_v43  ;;  %v12516_v33 = vand.u32 4294901760, %v2786_v8  ;;  %v12519_v5 = vand.u32 4294901760, %v12504_v43  ;;  %v9593_v10 = vpack.c.bf16 %v2862_v11, %v2850_v9  ;;  %v15943_v9 = vld [vmem:[#allocation143_spill] sm:$0xff]  ;;  %v15944_v11 = vld [vmem:[#allocation145_spill] sm:$0xff] }
 0x187   : > { %5413 = vmatmul.mubr.f32.gmra.mrb[8].mxu0 %v12496_v49  ;;  %15933 = vst [vmem:[#allocation174_spill] sm:$0xff] %v12522_v13  ;;  %v2808_v37 = vsub.f32 %v12496_v49, %v12513_v23 }
 0x188   : > { %15932 = vst [vmem:[#allocation173_spill] sm:$0xff] %v12516_v33  ;;  %10202 = vmatpush3.bf16.msra.mxu0 %v15934_v50  ;;  %2788 = vmatprep.mubr.f32.mxu1 %v12516_v33  ;;  %v2802_v8 = vsub.f32 %v12504_v43, %v12519_v5  ;;  %v15939_v33 = vld [vmem:[#allocation137_spill] sm:$0xff]  ;;  %v15952_v43 = vld [vmem:[#allocation36_spill] sm:$0xff] }
 0x189   : > { %5517 = vmatprep.mubr.f32.mxu0 %v12490_v55  ;;  %2794 = vmatmul.mubr.f32.vlgmr.msra.gmra.mrb[2].mxu1 %v12522_v13  ;;  %v12535_v22 = vand.u32 4294901760, %v2808_v37  ;;  %v15941_v13 = vld [vmem:[#allocation138_spill] sm:$0xff]  ;;  %v15946_v37 = vld [vmem:[#allocation141_spill] sm:$0xff]  ;;  %v15360_v1 = vand.u32 4294901760, %v15952_v43 }
 0x18a   : > { %9590 = vmatpush1.bf16.msra.mxu1 %v9589_v0  ;;  %10204 = vmatprep.subr.bf16.mxu0 %v15935_v40  ;;  %v12533_v41 = vand.u32 4294901760, %v2802_v8  ;;  %v15940_v0 = vld [vmem:[#allocation142_spill] sm:$0xff]  ;;  %v15942_v8 = vld [vmem:[#allocation139_spill] sm:$0xff] }
 0x18b   : > { %9592 = vmatprep.subr.bf16.mxu1 %v9591_v39  ;;  %15937 = vst [vmem:[#allocation176_spill] sm:$0xff] %v12535_v22  ;;  %v15945_v39 = vld [vmem:[#allocation140_spill] sm:$0xff]  ;;  %v15950_v55 = vld [vmem:[#allocation94_spill] sm:$0xff] }
 0x18c   : > { %15936 = vst [vmem:[#allocation175_spill] sm:$0xff] %v12533_v41  ;;  %10206 = vmatpush3.bf16.msra.mxu0 %v15938_v34  ;;  %2804 = vmatprep.mubr.f32.mxu1 %v12533_v41  ;;  %v15948_v41 = vld [vmem:[#allocation149_spill] sm:$0xff] }
 0x18d   : > { %2810 = vmatmul.mubr.f32.gmra.mrb[4].mxu1 %v12535_v22  ;;  %10208 = vmatprep.subr.bf16.mxu0 %v15939_v33  ;;  %v15947_v22 = vld [vmem:[#allocation146_spill] sm:$0xff] }
 0x18e   : > { %9594 = vmatpush1.bf16.msra.mxu1 %v9593_v10  ;;  %3201 = vmatprep.mubr.f32.mxu1 %v12459_v7  ;;  %v15949_v10 = vld [vmem:[#allocation144_spill] sm:$0xff] }
 0x18f   : > { %9596 = vmatprep.subr.bf16.mxu1 %v15940_v0  ;;  %v15951_v0 = vld [vmem:[#allocation35_spill] sm:$0xff] }
 0x190   : > { %10210 = vmatpush3.bf16.msra.mxu0 %v15941_v13  ;;  %v15361_v49 = vand.u32 4294901760, %v15951_v0 }
 0x191   : > { %10212 = vmatprep.subr.bf16.mxu0 %v15942_v8 }
 0x192   : > { %9598 = vmatpush1.bf16.msra.mxu1 %v15943_v9  ;;  %v15954_v9 = vld [vmem:[#allocation151_spill] sm:$0xff] }
 0x193   : > { %9600 = vmatprep.subr.bf16.mxu1 %v15944_v11  ;;  %v15955_v11 = vld [vmem:[#allocation147_spill] sm:$0xff] }
 0x194   : > { %10214 = vmatpush3.bf16.msra.mxu0 %v15945_v39 }
 0x195   : > { %10216 = vmatprep.subr.bf16.mxu0 %v15946_v37 }
 0x196   : > { %9602 = vmatpush1.bf16.msra.mxu1 %v15947_v22  ;;  %v15364_v22 = vand.u32 4294901760, %v15957_v27  ;;  %v15969_v27 = vld [vmem:[#allocation155_spill] sm:$0xff] }
 0x197   : > { %9604 = vmatprep.subr.bf16.mxu1 %v15948_v41  ;;  %v10227_v41 = vpack.c.bf16 %v15360_v1, %v15361_v49  ;;  %v10231_v1 = vpack.c.bf16 %v15365_v62, %v15366_v47  ;;  %v15971_v47 = vld [vmem:[#allocation66_spill] sm:$0xff] }
 0x198   : > { %10218 = vmatpush3.bf16.msra.mxu0 %v15949_v10  ;;  %v10229_v18 = vpack.c.bf16 %v15364_v22, %v15367_v63  ;;  %v15970_v22 = vld [vmem:[#allocation65_spill] sm:$0xff]  ;;  %v15380_v63 = vand.u32 4294901760, %v15971_v47 }
 0x199   : > { %10220 = vmatprep.subr.bf16.mxu0 %v15950_v55  ;;  %v15381_v62 = vand.u32 4294901760, %v15970_v22  ;;  %v15981_v22 = vld [vmem:[#allocation159_spill] sm:$0xff] }
 0x19a   : > { %9606 = vmatpush1.bf16.msra.mxu1 %v15953_v25  ;;  %v15961_v25 = vld [vmem:[#allocation152_spill] sm:$0xff] }
 0x19b   : > { %9608 = vmatprep.subr.bf16.mxu1 %v15954_v9  ;;  %v15962_v9 = vld [vmem:[#allocation153_spill] sm:$0xff] }
 0x19c   : > { %10222 = vmatpush3.bf16.msra.mxu0 %v15955_v11  ;;  %v15965_v11 = vld [vmem:[#allocation56_spill] sm:$0xff] }
 0x19d   : > { %10224 = vmatprep.subr.bf16.mxu0 %v15958_v35  ;;  %v15964_v35 = vld [vmem:[#allocation43_spill] sm:$0xff]  ;;  %v15372_v43 = vand.u32 4294901760, %v15965_v11  ;;  %v15975_v11 = vld [vmem:[#allocation157_spill] sm:$0xff] }
 0x19e   : > { %9610 = vmatpush1.bf16.msra.mxu1 %v15961_v25  ;;  %v15375_v0 = vand.u32 4294901760, %v15964_v35  ;;  %v15966_v25 = vld [vmem:[#allocation63_spill] sm:$0xff]  ;;  %v15980_v35 = vld [vmem:[#allocation158_spill] sm:$0xff] }
 0x19f   : > { %9612 = vmatprep.subr.bf16.mxu1 %v15962_v9  ;;  %v15374_v49 = vand.u32 4294901760, %v15966_v25  ;;  %v15967_v9 = vld [vmem:[#allocation64_spill] sm:$0xff] }
 0x1a0   : > { %10226 = vmatpush3.bf16.msra.mxu0 %v15963_v6  ;;  %v15373_v2 = vand.u32 4294901760, %v15967_v9  ;;  %v15968_v6 = vld [vmem:[#allocation154_spill] sm:$0xff]  ;;  %v15978_v9 = vld [vmem:[#allocation83_spill] sm:$0xff] }
 0x1a1   : > { %10228 = vmatprep.subr.bf16.mxu0 %v10227_v41  ;;  %v10233_v41 = vpack.c.bf16 %v15372_v43, %v15375_v0  ;;  %v15976_v43 = vld [vmem:[#allocation75_spill] sm:$0xff] }
 0x1a2   : > { %9614 = vmatpush1.bf16.msra.mxu1 %v15968_v6  ;;  %v10235_v6 = vpack.c.bf16 %v15373_v2, %v15374_v49  ;;  %v15389_v2 = vand.u32 4294901760, %v15976_v43  ;;  %v15977_v49 = vld [vmem:[#allocation76_spill] sm:$0xff]  ;;  %v15987_v43 = vld [vmem:[#allocation161_spill] sm:$0xff] }
 0x1a3   : > { %5521 = vmatmul.mubr.f32.vlgmr.msra.gmra.mrb[10].mxu0 %v12479_v52  ;;  %9616 = vmatprep.subr.bf16.mxu1 %v15969_v27  ;;  %v15385_v27 = vand.u32 4294901760, %v15972_v46  ;;  %v15388_v0 = vand.u32 4294901760, %v15977_v49  ;;  %v15983_v46 = vld [vmem:[#allocation86_spill] sm:$0xff] }
 0x1a4   : > { %5528 = vmatprep.mubr.f32.mxu0 %v12519_v5  ;;  %10230 = vmatpush3.bf16.msra.mxu0 %v10229_v18  ;;  %v15974_v18 = vld [vmem:[#allocation156_spill] sm:$0xff]  ;;  %v15396_v47 = vand.u32 4294901760, %v15983_v46 }
 0x1a5   : > { %10232 = vmatprep.subr.bf16.mxu0 %v10231_v1  ;;  %v10237_v1 = vpack.c.bf16 %v15380_v63, %v15381_v62  ;;  %v10241_v63 = vpack.c.bf16 %v15388_v0, %v15389_v2 }
 0x1a6   : > { %9618 = vmatpush1.bf16.msra.mxu1 %v15974_v18  ;;  %v10239_v18 = vpack.c.bf16 %v15384_v45, %v15385_v27  ;;  %v15984_v27 = vld [vmem:[#allocation93_spill] sm:$0xff] }
 0x1a7   : > { %5532 = vmatmul.mubr.f32.gmra.mrb[12].mxu0 %v12513_v23  ;;  %9620 = vmatprep.subr.bf16.mxu1 %v15975_v11  ;;  %v15393_v11 = vand.u32 4294901760, %v15978_v9  ;;  %v15989_v9 = vld [vmem:[#allocation97_spill] sm:$0xff] }
 0x1a8   : > { %10234 = vmatpush3.bf16.msra.mxu0 %v10233_v41  ;;  %5698 = vmatprep.mubr.f32.mxu0 %v12459_v7  ;;  %v15979_v41 = vld [vmem:[#allocation84_spill] sm:$0xff]  ;;  %v15404_v49 = vand.u32 4294901760, %v15989_v9 }
 0x1a9   : > { %10236 = vmatprep.subr.bf16.mxu0 %v10235_v6  ;;  %v15392_v25 = vand.u32 4294901760, %v15979_v41  ;;  %v15982_v6 = vld [vmem:[#allocation85_spill] sm:$0xff] }
 0x1aa   : > { %9622 = vmatpush1.bf16.msra.mxu1 %v15980_v35  ;;  %v15397_v62 = vand.u32 4294901760, %v15982_v6  ;;  %v15401_v35 = vand.u32 4294901760, %v15984_v27  ;;  %v15991_v41 = vld [vmem:[#allocation101_spill] sm:$0xff]  ;;  %v15993_v6 = vld [vmem:[#allocation163_spill] sm:$0xff] }
 0x1ab   : > { %9624 = vmatprep.subr.bf16.mxu1 %v15981_v22  ;;  %v10243_v45 = vpack.c.bf16 %v15392_v25, %v15393_v11  ;;  %v15400_v22 = vand.u32 4294901760, %v15985_v61  ;;  %v15990_v11 = vld [vmem:[#allocation100_spill] sm:$0xff]  ;;  %v15995_v27 = vld [vmem:[#allocation107_spill] sm:$0xff] }
 0x1ac   : > { %10238 = vmatpush3.bf16.msra.mxu0 %v10237_v1  ;;  %v15986_v1 = vld [vmem:[#allocation160_spill] sm:$0xff]  ;;  %v10245_v0 = vpack.c.bf16 %v15396_v47, %v15397_v62  ;;  %v15414_v46 = vand.u32 4294901760, %v15995_v27  ;;  %v16023_v27 = vld [vmem:[#allocation49_spill] sm:$0xff] }
 0x1ad   : > { %10240 = vmatprep.subr.bf16.mxu0 %v10239_v18  ;;  %v15988_v18 = vld [vmem:[#allocation96_spill] sm:$0xff]  ;;  %v10247_v25 = vpack.c.bf16 %v15400_v22, %v15401_v35  ;;  %v15996_v35 = vld [vmem:[#allocation115_spill] sm:$0xff] }
 0x1ae   : > { %9626 = vmatpush1.bf16.msra.mxu1 %v15986_v1  ;;  %v15405_v2 = vand.u32 4294901760, %v15988_v18  ;;  %v15409_v1 = vand.u32 4294901760, %v15990_v11  ;;  %v15997_v61 = vld [vmem:[#allocation116_spill] sm:$0xff]  ;;  %v15999_v18 = vld [vmem:[#allocation165_spill] sm:$0xff]  ;;  %v16001_v11 = vld [vmem:[#allocation118_spill] sm:$0xff] }
 0x1af   : > { %9628 = vmatprep.subr.bf16.mxu1 %v15987_v43  ;;  %v15408_v43 = vand.u32 4294901760, %v15991_v41  ;;  %v15410_v9 = vand.u32 4294901760, %v16001_v11  ;;  %v16019_v11 = vld [vmem:[#allocation47_spill] sm:$0xff] }
 0x1b0   : > { %10242 = vmatpush3.bf16.msra.mxu0 %v10241_v63  ;;  %v15992_v63 = vld [vmem:[#allocation162_spill] sm:$0xff]  ;;  %v10249_v47 = vpack.c.bf16 %v15404_v49, %v15405_v2 }
 0x1b1   : > { %10244 = vmatprep.subr.bf16.mxu0 %v10243_v45  ;;  %v15994_v45 = vld [vmem:[#allocation106_spill] sm:$0xff]  ;;  %v10251_v22 = vpack.c.bf16 %v15408_v43, %v15409_v1 }
 0x1b2   : > { %9630 = vmatpush1.bf16.msra.mxu1 %v15992_v63  ;;  %v15415_v62 = vand.u32 4294901760, %v15994_v45  ;;  %v15413_v63 = vand.u32 4294901760, %v15996_v35  ;;  %v16002_v1 = vld [vmem:[#allocation166_spill] sm:$0xff]  ;;  %v12751_v35 = vld [vmem:[#allocation3 + $0x370] sm:$0xff] }
 0x1b3   : > { %9632 = vmatprep.subr.bf16.mxu1 %v15993_v6  ;;  %v15412_v6 = vand.u32 4294901760, %v15997_v61  ;;  %v16024_v45 = vld [vmem:[#allocation48_spill] sm:$0xff] }
 0x1b4   : > { %10246 = vmatpush3.bf16.msra.mxu0 %v10245_v0  ;;  %v15998_v0 = vld [vmem:[#allocation164_spill] sm:$0xff]  ;;  %v10253_v49 = vpack.c.bf16 %v15414_v46, %v15415_v62  ;;  %v16025_v41 = vpack.c.bf16 %v16023_v27, %v16024_v45 }
 0x1b5   : > { %10248 = vmatprep.subr.bf16.mxu0 %v10247_v25  ;;  %v16000_v25 = vld [vmem:[#allocation117_spill] sm:$0xff]  ;;  %v10255_v43 = vpack.c.bf16 %v15412_v6, %v15413_v63  ;;  %v16017_v6 = vld [vmem:[#allocation147_spill] sm:$0xff]  ;;  %v16018_v63 = vld [vmem:[#allocation148_spill] sm:$0xff] }
 0x1b6   : > { %9634 = vmatpush1.bf16.msra.mxu1 %v15998_v0  ;;  %v15411_v2 = vand.u32 4294901760, %v16000_v25  ;;  %v16003_v0 = vld [vmem:[#allocation168_spill] sm:$0xff] }
 0x1b7   : > { %9636 = vmatprep.subr.bf16.mxu1 %v15999_v18  ;;  %v16004_v18 = vld [vmem:[#allocation169_spill] sm:$0xff]  ;;  %v12820_v45 = vld [vmem:[#allocation3 + $0x430] sm:$0xff] }
 0x1b8   : > { %10250 = vmatpush3.bf16.msra.mxu0 %v10249_v47  ;;  %v10257_v47 = vpack.c.bf16 %v15410_v9, %v15411_v2  ;;  %v12734_v9 = vld [vmem:[#allocation3 + $0x358] sm:$0xff]  ;;  %v16015_v2 = vld [vmem:[#allocation44_spill] sm:$0xff] }
 0x1b9   : > { %10252 = vmatprep.subr.bf16.mxu0 %v10251_v22  ;;  %v16005_v22 = vld [vmem:[#allocation125_spill] sm:$0xff]  ;;  %v5833_v62 = vand.u32 4294901760, %v12734_v9 }
 0x1ba   : > { %9638 = vmatpush1.bf16.msra.mxu1 %v16002_v1  ;;  %v16007_v1 = vld [vmem:[#allocation7_spill] sm:$0xff] }
 0x1bb   : > { %9640 = vmatprep.subr.bf16.mxu1 %v16003_v0 }
 0x1bc   : > { %10254 = vmatpush3.bf16.msra.mxu0 %v10253_v49  ;;  %v16006_v49 = vld [vmem:[#allocation6_spill] sm:$0xff] }
 0x1bd   : > { %10256 = vmatprep.subr.bf16.mxu0 %v10255_v43  ;;  %v9651_v0 = vpack.c.bf16 %v16007_v1, %v16006_v49  ;;  %v2490_v43 = vmax.f32 %v12406_v58, 0.0  ;;  %v2595_v58 = vld [vmem:[#allocation3 + $0x328] sm:$0xff] }
 0x1be   : > { %9642 = vmatpush1.bf16.msra.mxu1 %v16004_v18  ;;  %v16010_v18 = vpack.c.bf16 %v11505_v38, %v11500_v36 }
 0x1bf   : > { %9644 = vmatprep.subr.bf16.mxu1 %v12371_v42  ;;  %v9653_v42 = vpack.c.bf16 %v15907_v24, %v15904_v30 }
 0x1c0   : > { %10258 = vmatpush3.bf16.msra.mxu0 %v10257_v47  ;;  %v16009_v47 = vpack.c.bf16 %v11497_v21, %v11495_v14 }
 0x1c1   : > { %10260 = vmatprep.subr.bf16.mxu0 %v16005_v22 }
 0x1c2   : > { %9646 = vmatpush1.bf16.msra.mxu1 %v12373_v3  ;;  %v9657_v3 = vpack.c.bf16 %v15918_v20, %v15915_v54 }
 0x1c3   : > { %5700 = vmatmul.mubr.f32.vlgmr.msra.gmra.mrb[14].mxu0 %v12453_v29  ;;  %9648 = vmatprep.subr.bf16.mxu1 %v12383_v16  ;;  %v9655_v16 = vpack.c.bf16 %v15909_v53, %v15908_v56 }
 0x1c4   : > { %5705 = vmatprep.mubr.f32.mxu0 %v12486_v4  ;;  %10262 = vmatpush3.bf16.msra.mxu0 %v15929_v19  ;;  %v16034_v19 = vld [vmem:[#allocation54_spill] sm:$0xff] }
 0x1c5   : > { %10264 = vmatprep.subr.bf16.mxu0 %v15931_v17  ;;  %v16033_v17 = vld [vmem:[#allocation55_spill] sm:$0xff] }
 0x1c6   : > { %9650 = vmatpush1.bf16.msra.mxu1 %v12392_v48  ;;  %v16008_v48 = vpack.c.bf16 %v11491_v32, %v11489_v26  ;;  %v16035_v22 = vpack.c.bf16 %v16033_v17, %v16034_v19  ;;  %v16040_v17 = vld [vmem:[#allocation62_spill] sm:$0xff]  ;;  %v16041_v19 = vld [vmem:[#allocation61_spill] sm:$0xff] }
 0x1c7   : > { %5707 = vmatmul.mubr.f32.gmra.mrb[16].mxu0 %v12481_v15  ;;  %9652 = vmatprep.subr.bf16.mxu1 %v9651_v0  ;;  %v16011_v0 = vpack.c.bf16 %v11511_v28, %v11509_v44 }
 0x1c8   : > { %10266 = vmatpush3.bf16.msra.mxu0 %v15934_v50  ;;  %5809 = vmatprep.mubr.f32.mxu0 %v12459_v7 }
 0x1c9   : > { %3203 = vmatmul.mubr.f32.vlgmr.msra.gmra.mrb[2].mxu1 %v12453_v29  ;;  %10268 = vmatprep.subr.bf16.mxu0 %v15935_v40 }
 0x1ca   : > { %3209 = vmatprep.mubr.f32.mxu1 %v12486_v4  ;;  %9654 = vmatpush1.bf16.msra.mxu1 %v9653_v42  ;;  %v2592_v42 = vld [vmem:[#allocation3 + $0x310] sm:$0xff] }
 0x1cb   : > { %9656 = vmatprep.subr.bf16.mxu1 %v9655_v16  ;;  %v16012_v16 = vpack.c.bf16 %v15820_v60, %v15819_v57  ;;  %v16075_v60 = vld [vmem:[#allocation102_spill] sm:$0xff] }
 0x1cc   : > { %10270 = vmatpush3.bf16.msra.mxu0 %v15938_v34 }
 0x1cd   : > { %3211 = vmatmul.mubr.f32.gmra.mrb[4].mxu1 %v12481_v15  ;;  %10272 = vmatprep.subr.bf16.mxu0 %v15939_v33  ;;  %v16031_v33 = vld [vmem:[#allocation52_spill] sm:$0xff] }
 0x1ce   : > { %9658 = vmatpush1.bf16.msra.mxu1 %v9657_v3  ;;  %3411 = vmatprep.mubr.f32.mxu1 %v12474_v51  ;;  %v12716_v51 = vand.u32 4294901760, %v2490_v43  ;;  %v5824_v3 = vand.u32 4294901760, %v2592_v42 }
 0x1cf   : > { %9660 = vmatprep.subr.bf16.mxu1 %v16008_v48  ;;  %v5827_v48 = vand.u32 4294901760, %v2595_v58 }
 0x1d0   : > { %10274 = vmatpush3.bf16.msra.mxu0 %v15941_v13  ;;  %v12769_v13 = vld [vmem:[#allocation3 + $0x3a0] sm:$0xff] }
 0x1d1   : > { %10276 = vmatprep.subr.bf16.mxu0 %v15942_v8  ;;  %v12741_v46 = vpack.c.bf16 %v5827_v48, %v5824_v3  ;;  %v5842_v40 = vand.u32 4294901760, %v12769_v13 }
 0x1d2   : > { %9662 = vmatpush1.bf16.msra.mxu1 %v16009_v47  ;;  %v12727_v47 = vsub.f32 %v2490_v43, %v12716_v51 }
 0x1d3   : > { %9664 = vmatprep.subr.bf16.mxu1 %v16010_v18  ;;  %v16014_v18 = vpack.c.bf16 %v15822_v59, %v15821_v12  ;;  %v16064_v59 = vand.u32 4294901760, %v12820_v45 }
 0x1d4   : > { %10278 = vmatpush3.bf16.msra.mxu0 %v15945_v39  ;;  %16013 = vst [vmem:[#allocation142_spill] sm:$0xff] %v12727_v47  ;;  %v12749_v61 = vand.u32 4294901760, %v12727_v47 }
 0x1d5   : > { %10280 = vmatprep.subr.bf16.mxu0 %v15946_v37  ;;  %v16028_v37 = vld [vmem:[#allocation50_spill] sm:$0xff] }
 0x1d6   : > { %9666 = vmatpush1.bf16.msra.mxu1 %v16011_v0  ;;  %v12732_v0 = vld [vmem:[#allocation3 + $0x340] sm:$0xff]  ;;  %16022 = vst [vmem:[#allocation143_spill] sm:$0xff] %v12749_v61  ;;  %v4101_v8 = vsub.f32 %v12727_v47, %v12749_v61 }
 0x1d7   : > { %9668 = vmatprep.subr.bf16.mxu1 %v16012_v16  ;;  %v16016_v16 = vpack.c.bf16 %v15833_v31, %v16015_v2  ;;  %v5830_v43 = vand.u32 4294901760, %v12732_v0  ;;  %v12865_v31 = vsub.f32 %v12734_v9, %v5833_v62 }
 0x1d8   : > { %10282 = vmatpush3.bf16.msra.mxu0 %v15949_v10  ;;  %v16027_v10 = vld [vmem:[#allocation51_spill] sm:$0xff] }
 0x1d9   : > { %10284 = vmatprep.subr.bf16.mxu0 %v15950_v55  ;;  %v15440_v55 = vand.u32 4294901760, %v12751_v35  ;;  %v16029_v39 = vpack.c.bf16 %v16027_v10, %v16028_v37  ;;  %v16042_v10 = vpack.c.bf16 %v16040_v17, %v16041_v19  ;;  %v16044_v37 = vld [vmem:[#allocation69_spill] sm:$0xff]  ;;  %v12826_v17 = vsub.f32 %v2595_v58, %v5827_v48  ;;  %v16053_v58 = vld [vmem:[#allocation79_spill] sm:$0xff] }
 0x1da   : > { %9670 = vmatpush1.bf16.msra.mxu1 %v16014_v18  ;;  %v16020_v18 = vld [vmem:[#allocation46_spill] sm:$0xff]  ;;  %v12862_v2 = vsub.f32 %v12732_v0, %v5830_v43 }
 0x1db   : > { %9672 = vmatprep.subr.bf16.mxu1 %v16016_v16  ;;  %v16021_v25 = vpack.c.bf16 %v16019_v11, %v16020_v18  ;;  %v12753_v16 = vld [vmem:[#allocation3 + $0x388] sm:$0xff] }
 0x1dc   : > { %10286 = vmatpush3.bf16.msra.mxu0 %v16017_v6  ;;  %v12760_v6 = vpack.c.bf16 %v5833_v62, %v5830_v43  ;;  %v16051_v11 = vld [vmem:[#allocation71_spill] sm:$0xff]  ;;  %v16070_v9 = vand.u32 4294901760, %v12753_v16 }
 0x1dd   : > { %10288 = vmatprep.subr.bf16.mxu0 %v16018_v63  ;;  %v16026_v63 = vld [vmem:[#allocation108_spill] sm:$0xff] }
 0x1de   : > { %9674 = vmatpush1.bf16.msra.mxu1 %v16021_v25  ;;  %v15439_v25 = vand.u32 4294901760, %v12753_v16 }
 0x1df   : > { %9676 = vmatprep.subr.bf16.mxu1 %v16025_v41  ;;  %v12771_v41 = vld [vmem:[#allocation3 + $0x3b8] sm:$0xff] }
 0x1e0   : > { %10290 = vmatpush3.bf16.msra.mxu0 %v16026_v63  ;;  %v16030_v63 = vld [vmem:[#allocation53_spill] sm:$0xff]  ;;  %v5845_v50 = vand.u32 4294901760, %v12771_v41 }
 0x1e1   : > { %10292 = vmatprep.subr.bf16.mxu0 %v12741_v46  ;;  %v16032_v34 = vpack.c.bf16 %v16030_v63, %v16031_v33  ;;  %v16037_v63 = vld [vmem:[#allocation59_spill] sm:$0xff]  ;;  %v16038_v33 = vld [vmem:[#allocation58_spill] sm:$0xff] }
 0x1e2   : > { %9678 = vmatpush1.bf16.msra.mxu1 %v16029_v39  ;;  %v12784_v39 = vpack.c.bf16 %v15439_v25, %v15440_v55  ;;  %v16039_v25 = vpack.c.bf16 %v16037_v63, %v16038_v33  ;;  %v12804_v55 = vpack.c.bf16 %v5845_v50, %v5842_v40  ;;  %v12813_v63 = vld [vmem:[#allocation3 + $0x418] sm:$0xff] }
 0x1e3   : > { %5811 = vmatmul.mubr.f32.vlgmr.msra.gmra.mrb[18].mxu0 %v12453_v29  ;;  %9680 = vmatprep.subr.bf16.mxu1 %v16032_v34  ;;  %v12791_v34 = vand.u32 4294901760, %v4101_v8  ;;  %v12795_v29 = vld [vmem:[#allocation3 + $0x3e8] sm:$0xff] }
 0x1e4   : > { %5816 = vmatprep.mubr.f32.mxu0 %v12486_v4  ;;  %10294 = vmatpush3.bf16.msra.mxu0 %v12741_v46  ;;  %v12793_v4 = vld [vmem:[#allocation3 + $0x3d0] sm:$0xff]  ;;  %v12822_v8 = vld [vmem:[#allocation3 + $0x448] sm:$0xff] }
 0x1e5   : > { %10296 = vmatprep.subr.bf16.mxu0 %v12760_v6  ;;  %16036 = vst [vmem:[#allocation145_spill] sm:$0xff] %v12791_v34  ;;  %v16065_v12 = vand.u32 4294901760, %v12822_v8 }
 0x1e6   : > { %9682 = vmatpush1.bf16.msra.mxu1 %v16035_v22  ;;  %v12824_v22 = vsub.f32 %v2592_v42, %v5824_v3  ;;  %v16054_v3 = vld [vmem:[#allocation78_spill] sm:$0xff] }
 0x1e7   : > { %5818 = vmatmul.mubr.f32.gmra.mrb[20].mxu0 %v12481_v15  ;;  %9684 = vmatprep.subr.bf16.mxu1 %v16039_v25  ;;  %v12811_v15 = vld [vmem:[#allocation3 + $0x400] sm:$0xff]  ;;  %v16055_v48 = vpack.c.bf16 %v16053_v58, %v16054_v3  ;;  %v12880_v0 = vpack.c.bf16 %v16065_v12, %v16064_v59  ;;  %v16069_v59 = vand.u32 4294901760, %v12751_v35  ;;  %v12911_v12 = vsub.f32 %v12769_v13, %v5842_v40 }
 0x1e8   : > { %10298 = vmatpush3.bf16.msra.mxu0 %v12760_v6  ;;  %9087 = vmatprep.mubr.f32.mxu0 %v12791_v34  ;;  %v16043_v25 = vld [vmem:[#allocation170_spill] sm:$0xff]  ;;  %v16045_v34 = vld [vmem:[#allocation67_spill] sm:$0xff]  ;;  %v16067_v43 = vand.u32 4294901760, %v12824_v22 }
 0x1e9   : > { %10300 = vmatprep.subr.bf16.mxu0 %v12784_v39  ;;  %v2493_v33 = vmax.f32 %v16043_v25, 0.0  ;;  %v16046_v27 = vpack.c.bf16 %v16044_v37, %v16045_v34  ;;  %v16048_v25 = vand.u32 4294901760, %v12795_v29  ;;  %v15445_v37 = vand.u32 4294901760, %v12813_v63  ;;  %v16050_v34 = vld [vmem:[#allocation72_spill] sm:$0xff]  ;;  %v12857_v58 = vld [vmem:[#allocation3 + $0x460] sm:$0xff]  ;;  %16066 = vst [vmem:[#allocation151_spill] sm:$0xff] %v12880_v0 }
 0x1ea   : > { %9686 = vmatpush1.bf16.msra.mxu1 %v16042_v10  ;;  %v16047_v10 = vand.u32 4294901760, %v12793_v4  ;;  %v16052_v18 = vpack.c.bf16 %v16050_v34, %v16051_v11  ;;  %v16061_v11 = vld [vmem:[#allocation89_spill] sm:$0xff]  ;;  %v12897_v62 = vsub.f32 %v12751_v35, %v16069_v59 }
 0x1eb   : > { %9688 = vmatprep.subr.bf16.mxu1 %v16046_v27  ;;  %v15446_v27 = vand.u32 4294901760, %v12811_v15  ;;  %v12840_v42 = vand.u32 4294901760, %v2493_v33 }
 0x1ec   : > { %10302 = vmatpush3.bf16.msra.mxu0 %v12784_v39  ;;  %v12833_v19 = vpack.c.bf16 %v16048_v25, %v16047_v10  ;;  %v16057_v10 = vld [vmem:[#allocation82_spill] sm:$0xff]  ;;  %v16058_v25 = vld [vmem:[#allocation81_spill] sm:$0xff] }
 0x1ed   : > { %10304 = vmatprep.subr.bf16.mxu0 %v12804_v55  ;;  %v16059_v3 = vpack.c.bf16 %v16057_v10, %v16058_v25  ;;  %v12871_v34 = vsub.f32 %v2493_v33, %v12840_v42  ;;  %v5928_v33 = vsub.f32 %v12824_v22, %v16067_v43  ;;  %v16071_v43 = vld [vmem:[#allocation92_spill] sm:$0xff]  ;;  %v16072_v10 = vld [vmem:[#allocation91_spill] sm:$0xff] }
 0x1ee   : > { %16049 = vst [vmem:[#allocation146_spill] sm:$0xff] %v12833_v19  ;;  %9690 = vmatpush1.bf16.msra.mxu1 %v16052_v18  ;;  %v12855_v18 = vpack.c.bf16 %v15445_v37, %v15446_v27  ;;  %v16062_v37 = vld [vmem:[#allocation88_spill] sm:$0xff]  ;;  %v16073_v25 = vpack.c.bf16 %v16071_v43, %v16072_v10  ;;  %v16083_v43 = vld [vmem:[#allocation105_spill] sm:$0xff] }
 0x1ef   : > { %9692 = vmatprep.subr.bf16.mxu1 %v16055_v48  ;;  %v12859_v48 = vld [vmem:[#allocation3 + $0x478] sm:$0xff]  ;;  %16060 = vst [vmem:[#allocation150_spill] sm:$0xff] %v12871_v34  ;;  %v16063_v27 = vpack.c.bf16 %v16061_v11, %v16062_v37  ;;  %v12902_v37 = vsub.f32 %v12753_v16, %v16070_v9  ;;  %v12914_v11 = vsub.f32 %v12771_v41, %v5845_v50  ;;  %v12917_v35 = vand.u32 4294901760, %v12871_v34  ;;  %v16084_v10 = vld [vmem:[#allocation104_spill] sm:$0xff] }
 0x1f0   : > { %10306 = vmatpush3.bf16.msra.mxu0 %v12804_v55  ;;  %16056 = vst [vmem:[#allocation149_spill] sm:$0xff] %v12855_v18  ;;  %v16078_v16 = vand.u32 4294901760, %v12857_v58  ;;  %v16079_v9 = vand.u32 4294901760, %v12859_v48  ;;  %v5929_v59 = vand.u32 4294901760, %v5928_v33  ;;  %v16082_v50 = vand.u32 4294901760, %v12865_v31  ;;  %v16086_v33 = vld [vmem:[#allocation111_spill] sm:$0xff] }
 0x1f1   : > { %10308 = vmatprep.subr.bf16.mxu0 %v12833_v19  ;;  %16077 = vst [vmem:[#allocation152_spill] sm:$0xff] %v12917_v35 }
 0x1f2   : > { %9694 = vmatpush1.bf16.msra.mxu1 %v16059_v3  ;;  %v16068_v3 = vand.u32 4294901760, %v12826_v17  ;;  %v5949_v40 = vsub.f32 %v12865_v31, %v16082_v50  ;;  %v4112_v50 = vsub.f32 %v12871_v34, %v12917_v35  ;;  %v16097_v35 = vld [vmem:[#allocation119_spill] sm:$0xff] }
 0x1f3   : > { %9696 = vmatprep.subr.bf16.mxu1 %v16063_v27 }
 0x1f4   : > { %10310 = vmatpush3.bf16.msra.mxu0 %v12833_v19  ;;  %v5935_v27 = vsub.f32 %v12826_v17, %v16068_v3  ;;  %v16074_v3 = vld [vmem:[#allocation103_spill] sm:$0xff] }
 0x1f5   : > { %10312 = vmatprep.subr.bf16.mxu0 %v12855_v18  ;;  %v16076_v57 = vpack.c.bf16 %v16074_v3, %v16075_v60  ;;  %v16089_v60 = vand.u32 4294901760, %v12793_v4 }
 0x1f6   : > { %9698 = vmatpush1.bf16.msra.mxu1 %v16073_v25  ;;  %v12924_v25 = vpack.c.bf16 %v16079_v9, %v16078_v16  ;;  %v5936_v3 = vand.u32 4294901760, %v5935_v27  ;;  %v16085_v16 = vpack.c.bf16 %v16083_v43, %v16084_v10  ;;  %v16087_v27 = vld [vmem:[#allocation110_spill] sm:$0xff]  ;;  %v16096_v10 = vld [vmem:[#allocation121_spill] sm:$0xff] }
 0x1f7   : > { %9700 = vmatprep.subr.bf16.mxu1 %v16076_v57  ;;  %v16081_v57 = vand.u32 4294901760, %v12862_v2  ;;  %v16088_v9 = vpack.c.bf16 %v16086_v33, %v16087_v27  ;;  %v12949_v28 = vsub.f32 %v12793_v4, %v16089_v60  ;;  %v16093_v43 = vld [vmem:[#allocation114_spill] sm:$0xff]  ;;  %v16094_v60 = vld [vmem:[#allocation113_spill] sm:$0xff] }
 0x1f8   : > { %10314 = vmatpush3.bf16.msra.mxu0 %v12855_v18  ;;  %16080 = vst [vmem:[#allocation153_spill] sm:$0xff] %v12924_v25  ;;  %v10323_v41 = vpack.c.bf16 %v5936_v3, %v5929_v59  ;;  %v16091_v18 = vand.u32 4294901760, %v12897_v62  ;;  %v16092_v3 = vand.u32 4294901760, %v12902_v37  ;;  %v16095_v4 = vpack.c.bf16 %v16093_v43, %v16094_v60 }
 0x1f9   : > { %10316 = vmatprep.subr.bf16.mxu0 %v12880_v0  ;;  %v5942_v13 = vsub.f32 %v12862_v2, %v16081_v57  ;;  %v5950_v57 = vand.u32 4294901760, %v5949_v40  ;;  %v16100_v40 = vand.u32 4294901760, %v12914_v11 }
 0x1fa   : > { %9702 = vmatpush1.bf16.msra.mxu1 %v16085_v16  ;;  %v16090_v16 = vand.u32 4294901760, %v12795_v29  ;;  %v5956_v27 = vsub.f32 %v12897_v62, %v16091_v18  ;;  %v5963_v59 = vsub.f32 %v12902_v37, %v16092_v3  ;;  %v16105_v3 = vld [vmem:[#allocation123_spill] sm:$0xff] }
 0x1fb   : > { %9704 = vmatprep.subr.bf16.mxu1 %v16088_v9  ;;  %v5943_v9 = vand.u32 4294901760, %v5942_v13  ;;  %v5977_v18 = vsub.f32 %v12914_v11, %v16100_v40 }
 0x1fc   : > { %10318 = vmatpush3.bf16.msra.mxu0 %v12880_v0  ;;  %v12954_v33 = vsub.f32 %v12795_v29, %v16090_v16  ;;  %v16098_v29 = vpack.c.bf16 %v16096_v10, %v16097_v35  ;;  %v16099_v16 = vand.u32 4294901760, %v12911_v12  ;;  %v5957_v35 = vand.u32 4294901760, %v5956_v27  ;;  %v16107_v0 = vld [vmem:[#allocation131_spill] sm:$0xff] }
 0x1fd   : > { %10320 = vmatprep.subr.bf16.mxu0 %v12924_v25  ;;  %v10327_v40 = vpack.c.bf16 %v5950_v57, %v5943_v9  ;;  %v5964_v60 = vand.u32 4294901760, %v5963_v59  ;;  %v5978_v38 = vand.u32 4294901760, %v5977_v18  ;;  %v16113_v18 = vand.u32 4294901760, %v12822_v8 }
 0x1fe   : > { %9706 = vmatpush1.bf16.msra.mxu1 %v16095_v4  ;;  %v5970_v13 = vsub.f32 %v12911_v12, %v16099_v16  ;;  %v16101_v4 = vand.u32 4294901760, %v12811_v15  ;;  %v12988_v16 = vand.u32 4294901760, %v4112_v50  ;;  %v16111_v57 = vand.u32 4294901760, %v12954_v33 }
 0x1ff   : > { %9708 = vmatprep.subr.bf16.mxu1 %v16098_v29  ;;  %v16102_v29 = vand.u32 4294901760, %v12813_v63  ;;  %v10331_v59 = vpack.c.bf16 %v5964_v60, %v5957_v35 }
 0x200   : > { %10322 = vmatpush3.bf16.msra.mxu0 %v12924_v25  ;;  %v12981_v43 = vsub.f32 %v12811_v15, %v16101_v4  ;;  %16103 = vst [vmem:[#allocation154_spill] sm:$0xff] %v12988_v16  ;;  %v16104_v25 = vld [vmem:[#allocation124_spill] sm:$0xff]  ;;  %v16108_v15 = vld [vmem:[#allocation130_spill] sm:$0xff]  ;;  %v5971_v19 = vand.u32 4294901760, %v5970_v13  ;;  %v5991_v50 = vsub.f32 %v12954_v33, %v16111_v57  ;;  %v16112_v13 = vand.u32 4294901760, %v12820_v45 }
 0x201   : > { %v12986_v10 = vsub.f32 %v12813_v63, %v16102_v29  ;;  %10324 = vmatprep.subr.bf16.mxu0 %v10323_v41  ;;  %v16106_v44 = vpack.c.bf16 %v16104_v25, %v16105_v3  ;;  %v16109_v4 = vpack.c.bf16 %v16107_v0, %v16108_v15  ;;  %v16110_v63 = vand.u32 4294901760, %v12949_v28  ;;  %v16117_v57 = vld [vmem:[#allocation10_spill] sm:$0xff] }
 0x202   : > { %v13014_v29 = vsub.f32 %v12822_v8, %v16113_v18  ;;  %v5992_v35 = vand.u32 4294901760, %v5991_v50  ;;  %v16118_v60 = vand.u32 4294901760, %v12981_v43  ;;  %v16120_v8 = vld [vmem:[#allocation14_spill] sm:$0xff]  ;;  %v16123_v50 = vld [vmem:[#allocation172_spill] sm:$0xff] }
 0x203   : > { %9710 = vmatpush1.bf16.msra.mxu1 %v16106_v44  ;;  %9088 = vmatmul.mubr.f32.vlgmr.msra.gmra.mrb[22].mxu0 %v12988_v16  ;;  %v5984_v27 = vsub.f32 %v12949_v28, %v16110_v63  ;;  %v16115_v63 = vld [vmem:[#allocation132_spill] sm:$0xff]  ;;  %v10335_v44 = vpack.c.bf16 %v5978_v38, %v5971_v19  ;;  %v16121_v38 = vand.u32 4294901760, %v12857_v58 }
 0x204   : > { %9712 = vmatprep.subr.bf16.mxu1 %v16109_v4  ;;  %10326 = vmatpush3.bf16.msra.mxu0 %v10323_v41  ;;  %v13009_v41 = vsub.f32 %v12820_v45, %v16112_v13  ;;  %v16114_v4 = vld [vmem:[#allocation134_spill] sm:$0xff]  ;;  %v5998_v45 = vsub.f32 %v12981_v43, %v16118_v60  ;;  %v16119_v13 = vand.u32 4294901760, %v12986_v10  ;;  %v16124_v60 = vld [vmem:[#allocation11_spill] sm:$0xff] }
 0x205   : > { %9122 = vmatprep.mubr.f32.mxu0 %v12716_v51  ;;  %10328 = vmatprep.subr.bf16.mxu0 %v10327_v40  ;;  %v16116_v16 = vpack.c.bf16 %v16114_v4, %v16115_v63  ;;  %v5985_v9 = vand.u32 4294901760, %v5984_v27  ;;  %v13032_v19 = vsub.f32 %v12857_v58, %v16121_v38 }
 0x206   : > { %v6005_v0 = vsub.f32 %v12986_v10, %v16119_v13  ;;  %v16125_v13 = vld [vmem:[#allocation12_spill] sm:$0xff]  ;;  %v5999_v18 = vand.u32 4294901760, %v5998_v45  ;;  %v16127_v58 = vand.u32 4294901760, %v13009_v41 }
 0x207   : > { %9714 = vmatpush1.bf16.msra.mxu1 %v16116_v16 }
 0x208   : > { %9716 = vmatprep.subr.bf16.mxu1 %v16117_v57  ;;  %10330 = vmatpush3.bf16.msra.mxu0 %v10327_v40  ;;  %v16122_v40 = vand.u32 4294901760, %v12859_v48  ;;  %v6006_v16 = vand.u32 4294901760, %v6005_v0  ;;  %v16126_v57 = vld [vmem:[#allocation171_spill] sm:$0xff]  ;;  %v6012_v38 = vsub.f32 %v13009_v41, %v16127_v58  ;;  %v16131_v0 = vld [vmem:[#allocation18_spill] sm:$0xff] }
 0x209   : > { %10332 = vmatprep.subr.bf16.mxu0 %v10331_v59 }
 0x20a   : > { %3414 = vmatmul.mubr.f32.vlgmr.msra.gmra.mrb[2].mxu1 %v16120_v8  ;;  %v13037_v27 = vsub.f32 %v12859_v48, %v16122_v40  ;;  %v10339_v8 = vpack.c.bf16 %v5992_v35, %v5985_v9  ;;  %v16128_v48 = vand.u32 4294901760, %v13014_v29  ;;  %v16130_v9 = vld [vmem:[#allocation17_spill] sm:$0xff] }
 0x20b   : > { %3421 = vmatprep.mubr.f32.mxu1 %v16123_v50  ;;  %9718 = vmatpush1.bf16.msra.mxu1 %v16124_v60  ;;  %v15465_v50 = vand.u32 4294901760, %v13032_v19 }
 0x20c   : > { %9720 = vmatprep.subr.bf16.mxu1 %v16125_v13  ;;  %10334 = vmatpush3.bf16.msra.mxu0 %v10331_v59  ;;  %v6019_v40 = vsub.f32 %v13014_v29, %v16128_v48  ;;  %v15466_v60 = vand.u32 4294901760, %v13037_v27  ;;  %v16129_v13 = vld [vmem:[#allocation13_spill] sm:$0xff]  ;;  %v10343_v59 = vpack.c.bf16 %v6006_v16, %v5999_v18  ;;  %v16132_v48 = vld [vmem:[#allocation19_spill] sm:$0xff]  ;;  %v16134_v16 = vld [vmem:[#allocation22_spill] sm:$0xff] }
 0x20d   : > { %10336 = vmatprep.subr.bf16.mxu0 %v10335_v44  ;;  %v6026_v45 = vsub.f32 %v13032_v19, %v15465_v50  ;;  %v16136_v50 = vld [vmem:[#allocation29_spill] sm:$0xff] }
 0x20e   : > { %3424 = vmatmul.mubr.f32.gmra.mrb[4].mxu1 %v16126_v57  ;;  %v6013_v57 = vand.u32 4294901760, %v6012_v38  ;;  %v6020_v35 = vand.u32 4294901760, %v6019_v40  ;;  %v6033_v58 = vsub.f32 %v13037_v27, %v15466_v60  ;;  %v16135_v38 = vld [vmem:[#allocation26_spill] sm:$0xff]  ;;  %v16138_v60 = vld [vmem:[#allocation32_spill] sm:$0xff] }
 0x20f   : > { %9722 = vmatpush1.bf16.msra.mxu1 %v16129_v13  ;;  %3561 = vmatprep.mubr.f32.mxu1 %v16130_v9  ;;  %v16133_v13 = vld [vmem:[#allocation20_spill] sm:$0xff] }
 0x210   : > { %9724 = vmatprep.subr.bf16.mxu1 %v16131_v0  ;;  %10338 = vmatpush3.bf16.msra.mxu0 %v10335_v44  ;;  %v10347_v9 = vpack.c.bf16 %v6020_v35, %v6013_v57  ;;  %v6027_v44 = vand.u32 4294901760, %v6026_v45  ;;  %v6034_v18 = vand.u32 4294901760, %v6033_v58  ;;  %v16137_v0 = vld [vmem:[#allocation31_spill] sm:$0xff]  ;;  %v16139_v57 = vld [vmem:[#allocation33_spill] sm:$0xff]  ;;  %v16140_v35 = vld [vmem:[#allocation34_spill] sm:$0xff]  ;;  %v10363_v58 = vpack.c.bf16 %v12902_v37, %v12897_v62 }
 0x211   : > { %10340 = vmatprep.subr.bf16.mxu0 %v10339_v8  ;;  %v16141_v45 = vld [vmem:[#allocation39_spill] sm:$0xff] }
 0x212   : > { %v10351_v40 = vpack.c.bf16 %v6034_v18, %v6027_v44  ;;  %v16143_v44 = vld [vmem:[#allocation57_spill] sm:$0xff]  ;;  %v10367_v18 = vpack.c.bf16 %v12914_v11, %v12911_v12 }
 0x213   : > { %9726 = vmatpush1.bf16.msra.mxu1 %v16132_v48 }
 0x214   : > { %9728 = vmatprep.subr.bf16.mxu1 %v16133_v13  ;;  %10342 = vmatpush3.bf16.msra.mxu0 %v10339_v8  ;;  %v10355_v8 = vpack.c.bf16 %v12826_v17, %v12824_v22 }
 0x215   : > { %10344 = vmatprep.subr.bf16.mxu0 %v10343_v59 }
 0x217   : > { %9730 = vmatpush1.bf16.msra.mxu1 %v16134_v16 }
 0x218   : > { %9732 = vmatprep.subr.bf16.mxu1 %v16135_v38  ;;  %10346 = vmatpush3.bf16.msra.mxu0 %v10343_v59  ;;  %v10359_v59 = vpack.c.bf16 %v12865_v31, %v12862_v2 }
 0x219   : > { %10348 = vmatprep.subr.bf16.mxu0 %v10347_v9 }
 0x21b   : > { %9734 = vmatpush1.bf16.msra.mxu1 %v16136_v50 }
 0x21c   : > { %9736 = vmatprep.subr.bf16.mxu1 %v16137_v0  ;;  %10350 = vmatpush3.bf16.msra.mxu0 %v10347_v9  ;;  %v16142_v9 = vld [vmem:[#allocation40_spill] sm:$0xff] }
 0x21d   : > { %10352 = vmatprep.subr.bf16.mxu0 %v10351_v40 }
 0x21f   : > { %9738 = vmatpush1.bf16.msra.mxu1 %v16138_v60 }
 0x220   : > { %9740 = vmatprep.subr.bf16.mxu1 %v16139_v57  ;;  %10354 = vmatpush3.bf16.msra.mxu0 %v10351_v40  ;;  %v16144_v40 = vld [vmem:[#allocation60_spill] sm:$0xff] }
 0x221   : > { %10356 = vmatprep.subr.bf16.mxu0 %v10355_v8 }
 0x223   : > { %9742 = vmatpush1.bf16.msra.mxu1 %v16140_v35  ;;  %9123 = vmatmul.mubr.f32.vlgmr.msra.gmra.mrb[22].mxu0 %v12840_v42  ;;  %v16145_v35 = vld [vmem:[#allocation68_spill] sm:$0xff] }
 0x224   : > { %9744 = vmatprep.subr.bf16.mxu1 %v16141_v45  ;;  %10358 = vmatpush3.bf16.msra.mxu0 %v10355_v8  ;;  %v10371_v8 = vpack.c.bf16 %v12954_v33, %v12949_v28  ;;  %v16147_v45 = vld [vmem:[#allocation77_spill] sm:$0xff] }
 0x225   : > { %9157 = vmatprep.mubr.f32.mxu0 %v12727_v47  ;;  %10360 = vmatprep.subr.bf16.mxu0 %v10359_v59  ;;  %v16146_v47 = vld [vmem:[#allocation70_spill] sm:$0xff] }
 0x227   : > { %9746 = vmatpush1.bf16.msra.mxu1 %v16142_v9  ;;  %v16149_v9 = vld [vmem:[#allocation87_spill] sm:$0xff] }
 0x228   : > { %9748 = vmatprep.subr.bf16.mxu1 %v16143_v44  ;;  %10362 = vmatpush3.bf16.msra.mxu0 %v10359_v59  ;;  %v10375_v59 = vpack.c.bf16 %v12986_v10, %v12981_v43  ;;  %v16148_v44 = vld [vmem:[#allocation80_spill] sm:$0xff] }
 0x229   : > { %10364 = vmatprep.subr.bf16.mxu0 %v10363_v58 }
 0x22b   : > { %9750 = vmatpush1.bf16.msra.mxu1 %v16144_v40  ;;  %v16151_v40 = vld [vmem:[#allocation98_spill] sm:$0xff] }
 0x22c   : > { %9752 = vmatprep.subr.bf16.mxu1 %v16145_v35  ;;  %10366 = vmatpush3.bf16.msra.mxu0 %v10363_v58  ;;  %v10379_v58 = vpack.c.bf16 %v13014_v29, %v13009_v41  ;;  %v16150_v35 = vld [vmem:[#allocation90_spill] sm:$0xff] }
 0x22d   : > { %10368 = vmatprep.subr.bf16.mxu0 %v10367_v18 }
 0x22f   : > { %9754 = vmatpush1.bf16.msra.mxu1 %v16146_v47  ;;  %v16153_v47 = vld [vmem:[#allocation109_spill] sm:$0xff] }
 0x230   : > { %9756 = vmatprep.subr.bf16.mxu1 %v16147_v45  ;;  %10370 = vmatpush3.bf16.msra.mxu0 %v10367_v18  ;;  %v10383_v18 = vpack.c.bf16 %v13037_v27, %v13032_v19  ;;  %v16152_v45 = vld [vmem:[#allocation99_spill] sm:$0xff] }
 0x231   : > { %10372 = vmatprep.subr.bf16.mxu0 %v10371_v8 }
 0x233   : > { %9758 = vmatpush1.bf16.msra.mxu1 %v16148_v44 }
 0x234   : > { %9760 = vmatprep.subr.bf16.mxu1 %v16149_v9  ;;  %10374 = vmatpush3.bf16.msra.mxu0 %v10371_v8  ;;  %v16154_v8 = vld [vmem:[#allocation112_spill] sm:$0xff] }
 0x235   : > { %10376 = vmatprep.subr.bf16.mxu0 %v10375_v59  ;;  %v16155_v9 = vld [vmem:[#allocation120_spill] sm:$0xff] }
 0x237   : > { %9762 = vmatpush1.bf16.msra.mxu1 %v16150_v35  ;;  %v16156_v35 = vld [vmem:[#allocation122_spill] sm:$0xff] }
 0x238   : > { %9764 = vmatprep.subr.bf16.mxu1 %v16151_v40  ;;  %10378 = vmatpush3.bf16.msra.mxu0 %v10375_v59  ;;  %v16157_v59 = vld [vmem:[#allocation129_spill] sm:$0xff]  ;;  %v16158_v40 = vand.u32 4294901760, %v16006_v49  ;;  %v16164_v49 = vand.u32 4294901760, %v15909_v53  ;;  %v16168_v53 = vand.u32 4294901760, %v11491_v32 }
 0x239   : > { %10380 = vmatprep.subr.bf16.mxu0 %v10379_v58 }
 0x23b   : > { %9766 = vmatpush1.bf16.msra.mxu1 %v16152_v45  ;;  %v16159_v45 = vand.u32 4294901760, %v16007_v1 }
 0x23c   : > { %9768 = vmatprep.subr.bf16.mxu1 %v16153_v47  ;;  %10382 = vmatpush3.bf16.msra.mxu0 %v10379_v58  ;;  %v16160_v58 = vld [vmem:[#allocation133_spill] sm:$0xff] }
 0x23d   : > { %10384 = vmatprep.subr.bf16.mxu0 %v10383_v18  ;;  %v9779_v47 = vpack.c.bf16 %v16159_v45, %v16158_v40  ;;  %v16174_v45 = vld [vmem:[#allocation146_spill] sm:$0xff] }
 0x23f   : > { %9770 = vmatpush1.bf16.msra.mxu1 %v16154_v8 }
 0x240   : > { %9772 = vmatprep.subr.bf16.mxu1 %v16155_v9  ;;  %10386 = vmatpush3.bf16.msra.mxu0 %v10383_v18  ;;  %v16161_v18 = vand.u32 4294901760, %v15904_v30  ;;  %v16165_v30 = vand.u32 4294901760, %v15915_v54 }
 0x241   : > { %10388 = vmatprep.subr.bf16.mxu0 %v12741_v46 }
 0x243   : > { %9774 = vmatpush1.bf16.msra.mxu1 %v16156_v35  ;;  %9158 = vmatmul.mubr.f32.vlgmr.msra.gmra.mrb[22].mxu0 %v12871_v34  ;;  %v16162_v35 = vand.u32 4294901760, %v15907_v24  ;;  %v16166_v24 = vand.u32 4294901760, %v15918_v20  ;;  %v16170_v20 = vand.u32 4294901760, %v11497_v21 }
 0x244   : > { %9776 = vmatprep.subr.bf16.mxu1 %v16157_v59  ;;  %10390 = vmatpush3.bf16.msra.mxu0 %v12741_v46  ;;  %v16163_v59 = vand.u32 4294901760, %v15908_v56  ;;  %v16167_v56 = vand.u32 4294901760, %v11489_v26  ;;  %v16171_v26 = vand.u32 4294901760, %v11500_v36  ;;  %v16183_v36 = vld [vmem:[#allocation149_spill] sm:$0xff] }
 0x245   : > { %9192 = vmatprep.mubr.f32.mxu0 %v12749_v61  ;;  %10392 = vmatprep.subr.bf16.mxu0 %v12760_v6  ;;  %v9781_v34 = vpack.c.bf16 %v16162_v35, %v16161_v18  ;;  %v9785_v35 = vpack.c.bf16 %v16166_v24, %v16165_v30 }
 0x246   : > { %v9783_v1 = vpack.c.bf16 %v16164_v49, %v16163_v59  ;;  %v16177_v59 = vld [vmem:[#allocation24_spill] sm:$0xff] }
 0x247   : > { %9778 = vmatpush1.bf16.msra.mxu1 %v16160_v58  ;;  %v16178_v18 = vand.u32 4294901760, %v16177_v59  ;;  %v16193_v59 = vld [vmem:[#allocation151_spill] sm:$0xff] }
 0x248   : > { %9780 = vmatprep.subr.bf16.mxu1 %v9779_v47  ;;  %10394 = vmatpush3.bf16.msra.mxu0 %v12760_v6  ;;  %v9787_v47 = vpack.c.bf16 %v16168_v53, %v16167_v56  ;;  %v16184_v56 = vld [vmem:[#allocation28_spill] sm:$0xff] }
 0x249   : > { %10396 = vmatprep.subr.bf16.mxu0 %v12784_v39  ;;  %v16185_v53 = vand.u32 4294901760, %v16184_v56 }
 0x24a   : > { %3565 = vmatmul.mubr.f32.vlgmr.msra.gmra.mrb[2].mxu1 %v12479_v52  ;;  %v16169_v52 = vand.u32 4294901760, %v11495_v14  ;;  %v16179_v14 = vld [vmem:[#allocation25_spill] sm:$0xff] }
 0x24b   : > { %3573 = vmatprep.mubr.f32.mxu1 %v12519_v5  ;;  %9782 = vmatpush1.bf16.msra.mxu1 %v9781_v34  ;;  %v16172_v5 = vld [vmem:[#allocation21_spill] sm:$0xff]  ;;  %v16180_v21 = vand.u32 4294901760, %v16179_v14 }
 0x24c   : > { %9784 = vmatprep.subr.bf16.mxu1 %v9783_v1  ;;  %10398 = vmatpush3.bf16.msra.mxu0 %v12784_v39  ;;  %v9789_v54 = vpack.c.bf16 %v16170_v20, %v16169_v52  ;;  %v16173_v32 = vand.u32 4294901760, %v16172_v5  ;;  %v16181_v1 = vld [vmem:[#allocation27_spill] sm:$0xff] }
 0x24d   : > { %10400 = vmatprep.subr.bf16.mxu0 %v12804_v55  ;;  %v16182_v30 = vand.u32 4294901760, %v16181_v1 }
 0x24e   : > { %3577 = vmatmul.mubr.f32.gmra.mrb[4].mxu1 %v12513_v23  ;;  %v9791_v34 = vpack.c.bf16 %v16173_v32, %v16171_v26  ;;  %v16175_v23 = vld [vmem:[#allocation23_spill] sm:$0xff]  ;;  %v16188_v26 = vld [vmem:[#allocation44_spill] sm:$0xff]  ;;  %v16190_v32 = vld [vmem:[#allocation45_spill] sm:$0xff] }
 0x24f   : > { %9786 = vmatpush1.bf16.msra.mxu1 %v9785_v35  ;;  %3840 = vmatprep.mubr.f32.mxu1 %v12459_v7  ;;  %v16176_v40 = vand.u32 4294901760, %v16175_v23  ;;  %v9795_v24 = vpack.c.bf16 %v16182_v30, %v16180_v21  ;;  %v16189_v5 = vand.u32 4294901760, %v16188_v26  ;;  %v16196_v21 = vld [vmem:[#allocation47_spill] sm:$0xff] }
 0x250   : > { %9788 = vmatprep.subr.bf16.mxu1 %v9787_v47  ;;  %10402 = vmatpush3.bf16.msra.mxu0 %v12804_v55  ;;  %v16186_v47 = vld [vmem:[#allocation30_spill] sm:$0xff]  ;;  %v16197_v1 = vand.u32 4294901760, %v16196_v21 }
 0x251   : > { %10404 = vmatprep.subr.bf16.mxu0 %v16174_v45  ;;  %v9793_v49 = vpack.c.bf16 %v16178_v18, %v16176_v40  ;;  %v16187_v52 = vand.u32 4294901760, %v16186_v47  ;;  %v16200_v47 = vld [vmem:[#allocation49_spill] sm:$0xff] }
 0x253   : > { %9790 = vmatpush1.bf16.msra.mxu1 %v9789_v54  ;;  %v9797_v20 = vpack.c.bf16 %v16187_v52, %v16185_v53  ;;  %v16201_v52 = vand.u32 4294901760, %v16200_v47 }
 0x254   : > { %9792 = vmatprep.subr.bf16.mxu1 %v9791_v34  ;;  %10406 = vmatpush3.bf16.msra.mxu0 %v16174_v45  ;;  %v16191_v34 = vand.u32 4294901760, %v16190_v32 }
 0x255   : > { %10408 = vmatprep.subr.bf16.mxu0 %v16183_v36 }
 0x256   : > { %v8419_v35 = vpop.f32.mrb[6].mxu0  ;;  %v9799_v23 = vpack.c.bf16 %v16191_v34, %v16189_v5  ;;  %v16205_v5 = vand.u32 4294901760, %v12826_v17  ;;  %v16206_v34 = vld [vmem:[#allocation50_spill] sm:$0xff]  ;;  %v16215_v17 = vand.u32 4294901760, %v12865_v31  ;;  %v16226_v31 = vand.u32 4294901760, %v12902_v37 }
 0x257   : > { %9794 = vmatpush1.bf16.msra.mxu1 %v9793_v49  ;;  %v8420_v54 = vpop.f32.mrb[7].mxu0  ;;  %v16194_v49 = vld [vmem:[#allocation46_spill] sm:$0xff] }
 0x258   : > { %9796 = vmatprep.subr.bf16.mxu1 %v9795_v24  ;;  %v13166_v40 = vadd.f32 %v8420_v54, %v8419_v35  ;;  %10410 = vmatpush3.bf16.msra.mxu0 %v16183_v36  ;;  %v16195_v14 = vand.u32 4294901760, %v16194_v49  ;;  %v16198_v24 = vld [vmem:[#allocation48_spill] sm:$0xff]  ;;  %v16203_v54 = vld [vmem:[#allocation153_spill] sm:$0xff]  ;;  %v16207_v49 = vand.u32 4294901760, %v16206_v34 }
 0x259   : > { %10412 = vmatprep.subr.bf16.mxu0 %v16193_v59  ;;  %v16199_v53 = vand.u32 4294901760, %v16198_v24 }
 0x25a   : > { %16192 = vst [vmem:[#allocation155_spill] sm:$0xff] %v13166_v40  ;;  %v8422_v18 = vpop.f32.mrb[8].mxu0  ;;  %v9801_v30 = vpack.c.bf16 %v16197_v1, %v16195_v14  ;;  %v16210_v1 = vld [vmem:[#allocation52_spill] sm:$0xff] }
 0x25b   : > { %9798 = vmatpush1.bf16.msra.mxu1 %v9797_v20  ;;  %v8423_v56 = vpop.f32.mrb[9].mxu0  ;;  %v9803_v26 = vpack.c.bf16 %v16201_v52, %v16199_v53  ;;  %v16204_v20 = vand.u32 4294901760, %v12824_v22  ;;  %v16211_v24 = vand.u32 4294901760, %v16210_v1  ;;  %v16214_v22 = vand.u32 4294901760, %v12862_v2 }
 0x25c   : > { %9800 = vmatprep.subr.bf16.mxu1 %v9799_v23  ;;  %v13178_v35 = vadd.f32 %v8423_v56, %v8422_v18  ;;  %10414 = vmatpush3.bf16.msra.mxu0 %v16193_v59  ;;  %v16208_v23 = vld [vmem:[#allocation51_spill] sm:$0xff]  ;;  %v16212_v18 = vld [vmem:[#allocation53_spill] sm:$0xff]  ;;  %v16225_v2 = vand.u32 4294901760, %v12897_v62  ;;  %v16236_v62 = vand.u32 4294901760, %v12914_v11 }
 0x25d   : > { %10416 = vmatprep.subr.bf16.mxu0 %v16203_v54  ;;  %v10419_v32 = vpack.c.bf16 %v16205_v5, %v16204_v20  ;;  %v16209_v14 = vand.u32 4294901760, %v16208_v23  ;;  %v16213_v56 = vand.u32 4294901760, %v16212_v18  ;;  %v10423_v47 = vpack.c.bf16 %v16215_v17, %v16214_v22  ;;  %v16218_v20 = vld [vmem:[#allocation55_spill] sm:$0xff]  ;;  %v16227_v18 = vld [vmem:[#allocation61_spill] sm:$0xff]  ;;  %v16229_v22 = vld [vmem:[#allocation62_spill] sm:$0xff] }
 0x25e   : > { %16202 = vst [vmem:[#allocation156_spill] sm:$0xff] %v13178_v35  ;;  %v16219_v5 = vand.u32 4294901760, %v16218_v20  ;;  %v16230_v17 = vand.u32 4294901760, %v16229_v22  ;;  %v16233_v20 = vld [vmem:[#allocation69_spill] sm:$0xff] }
 0x25f   : > { %9802 = vmatpush1.bf16.msra.mxu1 %v9801_v30  ;;  %v9805_v21 = vpack.c.bf16 %v16209_v14, %v16207_v49  ;;  %v9807_v53 = vpack.c.bf16 %v16213_v56, %v16211_v24  ;;  %v16216_v30 = vld [vmem:[#allocation54_spill] sm:$0xff]  ;;  %v16223_v14 = vld [vmem:[#allocation59_spill] sm:$0xff]  ;;  %v16228_v56 = vand.u32 4294901760, %v16227_v18 }
 0x260   : > { %9804 = vmatprep.subr.bf16.mxu1 %v9803_v26  ;;  %10418 = vmatpush3.bf16.msra.mxu0 %v16203_v54  ;;  %v16217_v52 = vand.u32 4294901760, %v16216_v30  ;;  %v16220_v26 = vld [vmem:[#allocation152_spill] sm:$0xff]  ;;  %v16221_v49 = vld [vmem:[#allocation58_spill] sm:$0xff]  ;;  %v16224_v1 = vand.u32 4294901760, %v16223_v14  ;;  %v16231_v30 = vld [vmem:[#allocation67_spill] sm:$0xff] }
 0x261   : > { %10420 = vmatprep.subr.bf16.mxu0 %v10419_v32  ;;  %v16222_v23 = vand.u32 4294901760, %v16221_v49  ;;  %v16235_v49 = vand.u32 4294901760, %v12911_v12  ;;  %v16239_v14 = vld [vmem:[#allocation72_spill] sm:$0xff]  ;;  %v16243_v18 = vld [vmem:[#allocation79_spill] sm:$0xff]  ;;  %v16246_v12 = vand.u32 4294901760, %v12954_v33 }
 0x262   : > { %v9809_v34 = vpack.c.bf16 %v16219_v5, %v16217_v52  ;;  %v16232_v52 = vand.u32 4294901760, %v16231_v30  ;;  %v16234_v5 = vand.u32 4294901760, %v16233_v20  ;;  %v16249_v30 = vld [vmem:[#allocation82_spill] sm:$0xff] }
 0x263   : > { %9806 = vmatpush1.bf16.msra.mxu1 %v9805_v21  ;;  %9193 = vmatmul.mubr.f32.vlgmr.msra.gmra.mrb[22].mxu0 %v16220_v26  ;;  %v9811_v24 = vpack.c.bf16 %v16224_v1, %v16222_v23  ;;  %v10427_v21 = vpack.c.bf16 %v16226_v31, %v16225_v2  ;;  %v10431_v37 = vpack.c.bf16 %v16236_v62, %v16235_v49  ;;  %v16240_v1 = vand.u32 4294901760, %v16239_v14  ;;  %v16253_v49 = vld [vmem:[#allocation89_spill] sm:$0xff] }
 0x264   : > { %9808 = vmatprep.subr.bf16.mxu1 %v9807_v53  ;;  %10422 = vmatpush3.bf16.msra.mxu0 %v10419_v32  ;;  %v9813_v53 = vpack.c.bf16 %v16230_v17, %v16228_v56  ;;  %v9815_v32 = vpack.c.bf16 %v16234_v5, %v16232_v52  ;;  %v16244_v56 = vand.u32 4294901760, %v16243_v18  ;;  %v16247_v17 = vld [vmem:[#allocation81_spill] sm:$0xff]  ;;  %v16250_v52 = vand.u32 4294901760, %v16249_v30  ;;  %v16251_v5 = vld [vmem:[#allocation88_spill] sm:$0xff] }
 0x265   : > { %9227 = vmatprep.mubr.f32.mxu0 %v12716_v51  ;;  %10424 = vmatprep.subr.bf16.mxu0 %v10423_v47  ;;  %v16254_v62 = vand.u32 4294901760, %v16253_v49  ;;  %v16269_v30 = vld [vmem:[#allocation105_spill] sm:$0xff] }
 0x267   : > { %9810 = vmatpush1.bf16.msra.mxu1 %v9809_v34  ;;  %v16237_v34 = vld [vmem:[#allocation71_spill] sm:$0xff] }
 0x268   : > { %9812 = vmatprep.subr.bf16.mxu1 %v9811_v24  ;;  %10426 = vmatpush3.bf16.msra.mxu0 %v10423_v47  ;;  %v16238_v23 = vand.u32 4294901760, %v16237_v34  ;;  %v16241_v24 = vld [vmem:[#allocation78_spill] sm:$0xff]  ;;  %v16245_v47 = vand.u32 4294901760, %v12949_v28  ;;  %v16256_v28 = vand.u32 4294901760, %v12986_v10 }
 0x269   : > { %10428 = vmatprep.subr.bf16.mxu0 %v10427_v21  ;;  %v16242_v31 = vand.u32 4294901760, %v16241_v24 }
 0x26a   : > { %v9817_v2 = vpack.c.bf16 %v16240_v1, %v16238_v23  ;;  %v10435_v11 = vpack.c.bf16 %v16246_v12, %v16245_v47  ;;  %v16257_v23 = vld [vmem:[#allocation91_spill] sm:$0xff]  ;;  %v16259_v1 = vld [vmem:[#allocation92_spill] sm:$0xff] }
 0x26b   : > { %9814 = vmatpush1.bf16.msra.mxu1 %v9813_v53  ;;  %v9819_v22 = vpack.c.bf16 %v16244_v56, %v16242_v31  ;;  %v16248_v53 = vand.u32 4294901760, %v16247_v17  ;;  %v16258_v14 = vand.u32 4294901760, %v16257_v23  ;;  %v16261_v31 = vld [vmem:[#allocation102_spill] sm:$0xff]  ;;  %v16263_v56 = vld [vmem:[#allocation103_spill] sm:$0xff]  ;;  %v16267_v17 = vld [vmem:[#allocation104_spill] sm:$0xff] }
 0x26c   : > { %9816 = vmatprep.subr.bf16.mxu1 %v9815_v32  ;;  %10430 = vmatpush3.bf16.msra.mxu0 %v10427_v21  ;;  %v16252_v32 = vand.u32 4294901760, %v16251_v5  ;;  %v16255_v21 = vand.u32 4294901760, %v12981_v43  ;;  %v16262_v18 = vand.u32 4294901760, %v16261_v31  ;;  %v16266_v43 = vand.u32 4294901760, %v13014_v29 }
 0x26d   : > { %10432 = vmatprep.subr.bf16.mxu0 %v10431_v37  ;;  %v9821_v20 = vpack.c.bf16 %v16250_v52, %v16248_v53  ;;  %v16268_v53 = vand.u32 4294901760, %v16267_v17  ;;  %v16270_v52 = vand.u32 4294901760, %v16269_v30  ;;  %v16277_v29 = vand.u32 4294901760, %v13037_v27 }
 0x26e   : > { %v9823_v34 = vpack.c.bf16 %v16254_v62, %v16252_v32  ;;  %v10439_v33 = vpack.c.bf16 %v16256_v28, %v16255_v21  ;;  %v16271_v32 = vld [vmem:[#allocation110_spill] sm:$0xff]  ;;  %v16273_v62 = vld [vmem:[#allocation111_spill] sm:$0xff]  ;;  %v16288_v27 = vand.u32 4294901760, %v16104_v25  ;;  %v16289_v17 = vand.u32 4294901760, %v16108_v15  ;;  %v16296_v15 = vld [vmem:[#allocation16_spill] sm:$0xff] }
 0x26f   : > { %9818 = vmatpush1.bf16.msra.mxu1 %v9817_v2  ;;  %v16260_v2 = vand.u32 4294901760, %v16259_v1  ;;  %v16272_v49 = vand.u32 4294901760, %v16271_v32  ;;  %v16294_v25 = vld [vmem:[#allocation10_spill] sm:$0xff]  ;;  %v16300_v32 = vld [vmem:[#allocation13_spill] sm:$0xff] }
 0x270   : > { %9820 = vmatprep.subr.bf16.mxu1 %v9819_v22  ;;  %10434 = vmatpush3.bf16.msra.mxu0 %v10431_v37  ;;  %v16264_v22 = vand.u32 4294901760, %v16263_v56  ;;  %v16265_v37 = vand.u32 4294901760, %v13009_v41  ;;  %v16276_v41 = vand.u32 4294901760, %v13032_v19  ;;  %v16282_v56 = vld [vmem:[#allocation119_spill] sm:$0xff]  ;;  %v16287_v19 = vand.u32 4294901760, %v16105_v3  ;;  %v16295_v3 = vld [vmem:[#allocation8_spill] sm:$0xff] }
 0x271   : > { %10436 = vmatprep.subr.bf16.mxu0 %v10435_v11  ;;  %v9825_v24 = vpack.c.bf16 %v16260_v2, %v16258_v14  ;;  %v16278_v14 = vld [vmem:[#allocation113_spill] sm:$0xff]  ;;  %v16280_v2 = vld [vmem:[#allocation114_spill] sm:$0xff] }
 0x272   : > { %v9827_v47 = vpack.c.bf16 %v16264_v22, %v16262_v18  ;;  %v10443_v10 = vpack.c.bf16 %v16266_v43, %v16265_v37  ;;  %v10447_v28 = vpack.c.bf16 %v16277_v29, %v16276_v41  ;;  %v16279_v1 = vand.u32 4294901760, %v16278_v14  ;;  %v16314_v41 = vld [vmem:[#allocation98_spill] sm:$0xff] }
 0x273   : > { %9822 = vmatpush1.bf16.msra.mxu1 %v9821_v20  ;;  %v9829_v20 = vpack.c.bf16 %v16270_v52, %v16268_v53  ;;  %v16283_v22 = vand.u32 4294901760, %v16282_v56  ;;  %v16290_v53 = vld [vmem:[#allocation131_spill] sm:$0xff]  ;;  %v2590_v56 = vld [vmem:[#allocation3 + $0x300] sm:$0xff] }
 0x274   : > { %9824 = vmatprep.subr.bf16.mxu1 %v9823_v34  ;;  %10438 = vmatpush3.bf16.msra.mxu0 %v10435_v11  ;;  %v16274_v34 = vand.u32 4294901760, %v16273_v62  ;;  %v16291_v30 = vand.u32 4294901760, %v16290_v53 }
 0x275   : > { %10440 = vmatprep.subr.bf16.mxu0 %v10439_v33 }
 0x276   : > { %v8457_v12 = vpop.f32.mrb[10].mxu0  ;;  %v9831_v11 = vpack.c.bf16 %v16274_v34, %v16272_v49  ;;  %v9839_v52 = vpack.c.bf16 %v16291_v30, %v16289_v17 }
 0x277   : > { %9826 = vmatpush1.bf16.msra.mxu1 %v9825_v24  ;;  %v8458_v5 = vpop.f32.mrb[11].mxu0  ;;  %v16281_v24 = vand.u32 4294901760, %v16280_v2 }
 0x278   : > { %9828 = vmatprep.subr.bf16.mxu1 %v9827_v47  ;;  %v13269_v21 = vadd.f32 %v8458_v5, %v8457_v12  ;;  %10442 = vmatpush3.bf16.msra.mxu0 %v10439_v33  ;;  %v16284_v47 = vld [vmem:[#allocation121_spill] sm:$0xff]  ;;  %v9837_v12 = vpack.c.bf16 %v16288_v27, %v16287_v19  ;;  %v4003_v19 = vand.u32 4294901760, %v2590_v56 }
 0x279   : > { %10444 = vmatprep.subr.bf16.mxu0 %v10443_v10  ;;  %v9833_v31 = vpack.c.bf16 %v16281_v24, %v16279_v1  ;;  %v16285_v37 = vand.u32 4294901760, %v16284_v47  ;;  %v16317_v1 = vld [vmem:[#allocation109_spill] sm:$0xff]  ;;  %v2591_v24 = vld [vmem:[#allocation3 + $0x308] sm:$0xff] }
 0x27a   : > { %16275 = vst [vmem:[#allocation157_spill] sm:$0xff] %v13269_v21  ;;  %v8460_v23 = vpop.f32.mrb[12].mxu0  ;;  %v2597_v47 = vld [vmem:[#allocation3 + $0x338] sm:$0xff] }
 0x27b   : > { %9830 = vmatpush1.bf16.msra.mxu1 %v9829_v20  ;;  %v8461_v18 = vpop.f32.mrb[13].mxu0  ;;  %v9835_v33 = vpack.c.bf16 %v16285_v37, %v16283_v22  ;;  %v16292_v20 = vand.u32 4294901760, %v16115_v63  ;;  %v16298_v63 = vld [vmem:[#allocation12_spill] sm:$0xff]  ;;  %v2593_v22 = vld [vmem:[#allocation3 + $0x318] sm:$0xff]  ;;  %v4009_v53 = vand.u32 4294901760, %v2597_v47 }
 0x27c   : > { %9832 = vmatprep.subr.bf16.mxu1 %v9831_v11  ;;  %v13283_v43 = vadd.f32 %v8461_v18, %v8460_v23  ;;  %10446 = vmatpush3.bf16.msra.mxu0 %v10443_v10  ;;  %v16293_v10 = vand.u32 4294901760, %v16114_v4  ;;  %v16297_v4 = vld [vmem:[#allocation11_spill] sm:$0xff]  ;;  %v2600_v37 = vld [vmem:[#allocation3 + $0x350] sm:$0xff]  ;;  %v4007_v27 = vand.u32 4294901760, %v2593_v22 }
 0x27d   : > { %10448 = vmatprep.subr.bf16.mxu0 %v10447_v28  ;;  %v4013_v30 = vand.u32 4294901760, %v2600_v37  ;;  %v13391_v35 = vsub.f32 %v2597_v47, %v4009_v53 }
 0x27e   : > { %16286 = vst [vmem:[#allocation158_spill] sm:$0xff] %v13283_v43  ;;  %v9841_v5 = vpack.c.bf16 %v16293_v10, %v16292_v20  ;;  %v2603_v20 = vld [vmem:[#allocation3 + $0x368] sm:$0xff]  ;;  %v13362_v10 = vpack.c.bf16 %v4007_v27, %v4003_v19  ;;  %v2624_v43 = vld [vmem:[#allocation3 + $0x410] sm:$0xff] }
 0x27f   : > { %9834 = vmatpush1.bf16.msra.mxu1 %v9833_v31  ;;  %v4001_v31 = vand.u32 4294901760, %v2591_v24 }
 0x280   : > { %9836 = vmatprep.subr.bf16.mxu1 %v9835_v33  ;;  %10450 = vmatpush3.bf16.msra.mxu0 %v10447_v28  ;;  %v16316_v28 = vld [vmem:[#allocation99_spill] sm:$0xff]  ;;  %v16319_v33 = vld [vmem:[#allocation122_spill] sm:$0xff] }
 0x281   : > { %10452 = vmatprep.subr.bf16.mxu0 %v12741_v46 }
 0x283   : > { %9838 = vmatpush1.bf16.msra.mxu1 %v9837_v12  ;;  %9228 = vmatmul.mubr.f32.vlgmr.msra.gmra.mrb[22].mxu0 %v12840_v42  ;;  %v16320_v12 = vld [vmem:[#allocation129_spill] sm:$0xff] }
 0x284   : > { %9840 = vmatprep.subr.bf16.mxu1 %v9839_v52  ;;  %10454 = vmatpush3.bf16.msra.mxu0 %v12741_v46  ;;  %v16299_v46 = vld [vmem:[#allocation15_spill] sm:$0xff]  ;;  %v2596_v52 = vld [vmem:[#allocation3 + $0x330] sm:$0xff] }
 0x285   : > { %9262 = vmatprep.mubr.f32.mxu0 %v12716_v51  ;;  %10456 = vmatprep.subr.bf16.mxu0 %v12760_v6 }
 0x287   : > { %9842 = vmatpush1.bf16.msra.mxu1 %v9841_v5  ;;  %v4011_v5 = vand.u32 4294901760, %v2596_v52 }
 0x288   : > { %9844 = vmatprep.subr.bf16.mxu1 %v16294_v25  ;;  %10458 = vmatpush3.bf16.msra.mxu0 %v12760_v6  ;;  %v16301_v6 = vld [vmem:[#allocation18_spill] sm:$0xff] }
 0x289   : > { %10460 = vmatprep.subr.bf16.mxu0 %v12784_v39  ;;  %v13395_v21 = vsub.f32 %v2596_v52, %v4011_v5 }
 0x28a   : > { %3842 = vmatmul.mubr.f32.vlgmr.msra.gmra.mrb[2].mxu1 %v16295_v3 }
 0x28b   : > { %3848 = vmatprep.mubr.f32.mxu1 %v16296_v15  ;;  %9846 = vmatpush1.bf16.msra.mxu1 %v16297_v4  ;;  %v13365_v4 = vpack.c.bf16 %v4013_v30, %v4009_v53 }
 0x28c   : > { %9848 = vmatprep.subr.bf16.mxu1 %v16298_v63  ;;  %10462 = vmatpush3.bf16.msra.mxu0 %v12784_v39  ;;  %v4017_v63 = vand.u32 4294901760, %v2603_v20 }
 0x28d   : > { %10464 = vmatprep.subr.bf16.mxu0 %v12804_v55 }
 0x28e   : > { %3850 = vmatmul.mubr.f32.gmra.mrb[4].mxu1 %v16299_v46 }
 0x28f   : > { %9850 = vmatpush1.bf16.msra.mxu1 %v16300_v32  ;;  %3985 = vmatprep.mubr.f32.mxu1 %v12459_v7 }
 0x290   : > { %9852 = vmatprep.subr.bf16.mxu1 %v16301_v6  ;;  %10466 = vmatpush3.bf16.msra.mxu0 %v12804_v55  ;;  %v2602_v6 = vld [vmem:[#allocation3 + $0x360] sm:$0xff] }
 0x291   : > { %10468 = vmatprep.subr.bf16.mxu0 %v16174_v45 }
 0x293   : > { %9854 = vmatpush1.bf16.msra.mxu1 %v16132_v48 }
 0x294   : > { %9856 = vmatprep.subr.bf16.mxu1 %v16133_v13  ;;  %10470 = vmatpush3.bf16.msra.mxu0 %v16174_v45  ;;  %v16308_v45 = vld [vmem:[#allocation60_spill] sm:$0xff] }
 0x295   : > { %10472 = vmatprep.subr.bf16.mxu0 %v16183_v36 }
 0x296   : > { %v8495_v39 = vpop.f32.mrb[14].mxu0 }
 0x297   : > { %9858 = vmatpush1.bf16.msra.mxu1 %v16134_v16  ;;  %v8496_v49 = vpop.f32.mrb[15].mxu0  ;;  %v16304_v16 = vld [vmem:[#allocation34_spill] sm:$0xff] }
 0x298   : > { %9860 = vmatprep.subr.bf16.mxu1 %v16135_v38  ;;  %v13323_v62 = vadd.f32 %v8496_v49, %v8495_v39  ;;  %10474 = vmatpush3.bf16.msra.mxu0 %v16183_v36  ;;  %v16306_v38 = vld [vmem:[#allocation40_spill] sm:$0xff]  ;;  %v2605_v39 = vld [vmem:[#allocation3 + $0x378] sm:$0xff] }
 0x299   : > { %10476 = vmatprep.subr.bf16.mxu0 %v16193_v59  ;;  %v16309_v36 = vld [vmem:[#allocation68_spill] sm:$0xff]  ;;  %v2609_v49 = vld [vmem:[#allocation3 + $0x398] sm:$0xff] }
 0x29a   : > { %16302 = vst [vmem:[#allocation159_spill] sm:$0xff] %v13323_v62  ;;  %v8498_v55 = vpop.f32.mrb[16].mxu0  ;;  %v13393_v62 = vsub.f32 %v2600_v37, %v4013_v30 }
 0x29b   : > { %9862 = vmatpush1.bf16.msra.mxu1 %v16136_v50  ;;  %v8499_v13 = vpop.f32.mrb[17].mxu0  ;;  %v16305_v50 = vld [vmem:[#allocation39_spill] sm:$0xff] }
 0x29c   : > { %9864 = vmatprep.subr.bf16.mxu1 %v16137_v0  ;;  %v13329_v48 = vadd.f32 %v8499_v13, %v8498_v55  ;;  %10478 = vmatpush3.bf16.msra.mxu0 %v16193_v59  ;;  %v16307_v0 = vld [vmem:[#allocation57_spill] sm:$0xff]  ;;  %v16310_v59 = vld [vmem:[#allocation70_spill] sm:$0xff]  ;;  %v2612_v55 = vld [vmem:[#allocation3 + $0x3b0] sm:$0xff]  ;;  %v4019_v13 = vand.u32 4294901760, %v2602_v6 }
 0x29d   : > { %10480 = vmatprep.subr.bf16.mxu0 %v16203_v54 }
 0x29e   : > { %16303 = vst [vmem:[#allocation160_spill] sm:$0xff] %v13329_v48  ;;  %v2621_v48 = vld [vmem:[#allocation3 + $0x3f8] sm:$0xff]  ;;  %v13413_v53 = vsub.f32 %v2602_v6, %v4019_v13 }
 0x29f   : > { %9866 = vmatpush1.bf16.msra.mxu1 %v16138_v60  ;;  %v16311_v60 = vld [vmem:[#allocation77_spill] sm:$0xff]  ;;  %v4041_v37 = vand.u32 4294901760, %v2621_v48 }
 0x2a0   : > { %9868 = vmatprep.subr.bf16.mxu1 %v16139_v57  ;;  %10482 = vmatpush3.bf16.msra.mxu0 %v16203_v54  ;;  %v16312_v57 = vld [vmem:[#allocation87_spill] sm:$0xff]  ;;  %v16313_v54 = vld [vmem:[#allocation90_spill] sm:$0xff] }
 0x2a1   : > { %v13474_v26 = vsub.f32 %v2621_v48, %v4041_v37 }
 0x2a3   : > { %9870 = vmatpush1.bf16.msra.mxu1 %v16304_v16  ;;  %9263 = vmatmul.mubr.f32.vlgmr.msra.gmra.mrb[22].mxu0 %v12840_v42  ;;  %v4023_v16 = vand.u32 4294901760, %v2605_v39 }
 0x2a4   : > { %9872 = vmatprep.subr.bf16.mxu1 %v16305_v50 }
 0x2a5   : > { %v13415_v30 = vsub.f32 %v2605_v39, %v4023_v16 }
 0x2a7   : > { %9874 = vmatpush1.bf16.msra.mxu1 %v16306_v38  ;;  %v4025_v38 = vand.u32 4294901760, %v2609_v49 }
 0x2a8   : > { %9876 = vmatprep.subr.bf16.mxu1 %v16307_v0  ;;  %v4029_v0 = vand.u32 4294901760, %v2612_v55 }
 0x2a9   : > { %v13417_v52 = vsub.f32 %v2609_v49, %v4025_v38  ;;  %v13452_v49 = vld [vmem:[#allocation3 + $0x470] sm:$0xff] }
 0x2ab   : > { %9878 = vmatpush1.bf16.msra.mxu1 %v16308_v45  ;;  %v2608_v45 = vld [vmem:[#allocation3 + $0x390] sm:$0xff] }
 0x2ac   : > { %9880 = vmatprep.subr.bf16.mxu1 %v16309_v36  ;;  %v2611_v36 = vld [vmem:[#allocation3 + $0x3a8] sm:$0xff] }
 0x2af   : > { %9882 = vmatpush1.bf16.msra.mxu1 %v16310_v59  ;;  %v2615_v59 = vld [vmem:[#allocation3 + $0x3c8] sm:$0xff] }
 0x2b0   : > { %9884 = vmatprep.subr.bf16.mxu1 %v16311_v60  ;;  %v2618_v60 = vld [vmem:[#allocation3 + $0x3e0] sm:$0xff] }
 0x2b3   : > { %9886 = vmatpush1.bf16.msra.mxu1 %v16148_v44  ;;  %v2594_v44 = vld [vmem:[#allocation3 + $0x320] sm:$0xff] }
 0x2b4   : > { %9888 = vmatprep.subr.bf16.mxu1 %v16312_v57  ;;  %v4005_v18 = vand.u32 4294901760, %v2594_v44  ;;  %v13377_v57 = vpack.c.bf16 %v4023_v16, %v4019_v13 }
 0x2b6   : > { %v8533_v34 = vpop.f32.mrb[18].mxu0  ;;  %v13359_v17 = vpack.c.bf16 %v4005_v18, %v4001_v31  ;;  %16321 = vst [vmem:[#allocation163_spill] sm:$0xff] %v13377_v57 }
 0x2b7   : > { %9890 = vmatpush1.bf16.msra.mxu1 %v16313_v54  ;;  %v8534_v11 = vpop.f32.mrb[19].mxu0  ;;  %v4027_v54 = vand.u32 4294901760, %v2608_v45 }
 0x2b8   : > { %9892 = vmatprep.subr.bf16.mxu1 %v16314_v41  ;;  %v13349_v29 = vadd.f32 %v8534_v11, %v8533_v34  ;;  %v4031_v34 = vand.u32 4294901760, %v2611_v36  ;;  %v16322_v11 = vmov 0.0   ;;  %v13381_v41 = vpack.c.bf16 %v4029_v0, %v4025_v38 }
 0x2ba   : > { %16315 = vst [vmem:[#allocation161_spill] sm:$0xff] %v13349_v29  ;;  %v8536_v23 = vpop.f32.mrb[20].mxu0  ;;  %16323 = vst [vmem:[#allocation164_spill] sm:$0xff] %v13381_v41  ;;  %v13389_v29 = vsub.f32 %v2593_v22, %v4007_v27  ;;  %v13406_v22 = vsub.f32 %v2603_v20, %v4017_v63  ;;  %v13423_v20 = vsub.f32 %v2608_v45, %v4027_v54 }
 0x2bb   : > { %9894 = vmatpush1.bf16.msra.mxu1 %v16316_v28  ;;  %v8537_v14 = vpop.f32.mrb[21].mxu0  ;;  %v4033_v28 = vand.u32 4294901760, %v2615_v59 }
 0x2bc   : > { %9896 = vmatprep.subr.bf16.mxu1 %v16317_v1  ;;  %v13353_v2 = vadd.f32 %v8537_v14, %v8536_v23  ;;  %v4037_v23 = vand.u32 4294901760, %v2618_v60  ;;  %v2614_v14 = vld [vmem:[#allocation3 + $0x3c0] sm:$0xff]  ;;  %v2617_v1 = vld [vmem:[#allocation3 + $0x3d8] sm:$0xff] }
 0x2be   : > { %16318 = vst [vmem:[#allocation162_spill] sm:$0xff] %v13353_v2  ;;  %v13387_v2 = vsub.f32 %v2590_v56, %v4003_v19  ;;  %v13404_v56 = vld [vmem:[#allocation3 + $0x408] sm:$0xff]  ;;  %v13409_v47 = vpack.c.bf16 %v4037_v23, %v4033_v28  ;;  %v4045_v19 = vand.u32 4294901760, %v2624_v43 }
 0x2bf   : > { %9898 = vmatpush1.bf16.msra.mxu1 %v16154_v8  ;;  %v2599_v8 = vld [vmem:[#allocation3 + $0x348] sm:$0xff] }
 0x2c0   : > { %9900 = vmatprep.subr.bf16.mxu1 %v16155_v9  ;;  %v2606_v9 = vld [vmem:[#allocation3 + $0x380] sm:$0xff]  ;;  %v4015_v25 = vand.u32 4294901760, %v2599_v8  ;;  %16325 = vst [vmem:[#allocation166_spill] sm:$0xff] %v13409_v47  ;;  %v13441_v13 = vpack.c.bf16 %v4045_v19, %v4041_v37  ;;  %v16335_v37 = vand.u32 4294901760, %v13389_v29 }
 0x2c1   : > { %v4021_v32 = vand.u32 4294901760, %v2606_v9 }
 0x2c2   : > { %v13397_v40 = vsub.f32 %v2599_v8, %v4015_v25  ;;  %v2627_v8 = vld [vmem:[#allocation3 + $0x428] sm:$0xff]  ;;  %16327 = vst [vmem:[#allocation169_spill] sm:$0xff] %v13441_v13 }
 0x2c3   : > { %9902 = vmatpush1.bf16.msra.mxu1 %v16319_v33  ;;  %v13373_v50 = vpack.c.bf16 %v4021_v32, %v4017_v63  ;;  %v13383_v33 = vsub.f32 %v2591_v24, %v4001_v31  ;;  %v13400_v24 = vpack.c.bf16 %v4031_v34, %v4027_v54  ;;  %v4039_v31 = vand.u32 4294901760, %v2617_v1 }
 0x2c4   : > { %9904 = vmatprep.subr.bf16.mxu1 %v16320_v12  ;;  %v13385_v12 = vsub.f32 %v2594_v44, %v4005_v18  ;;  %v4035_v44 = vand.u32 4294901760, %v2614_v14  ;;  %v13402_v18 = vld [vmem:[#allocation3 + $0x3f0] sm:$0xff]  ;;  %v13411_v27 = vsub.f32 %v2606_v9, %v4021_v32  ;;  %v13429_v9 = vld [vmem:[#allocation3 + $0x438] sm:$0xff]  ;;  %v13432_v32 = vsub.f32 %v2611_v36, %v4031_v34 }
 0x2c5   : > { %16324 = vst [vmem:[#allocation165_spill] sm:$0xff] %v13400_v24  ;;  %v4043_v63 = vand.u32 4294901760, %v13402_v18  ;;  %v4049_v16 = vand.u32 4294901760, %v2627_v8  ;;  %v13450_v34 = vld [vmem:[#allocation3 + $0x458] sm:$0xff]  ;;  %v13454_v39 = vsub.f32 %v2617_v1, %v4039_v31 }
 0x2c6   : > { %v13434_v6 = vpack.c.bf16 %v4039_v31, %v4035_v44  ;;  %v13446_v45 = vsub.f32 %v2614_v14, %v4035_v44  ;;  %v16329_v14 = vand.u32 4294901760, %v13383_v33  ;;  %v16330_v54 = vand.u32 4294901760, %v13385_v12 }
 0x2c7   : > { %9906 = vmatpush1.bf16.msra.mxu1 %v16160_v58  ;;  %v13370_v58 = vpack.c.bf16 %v4015_v25, %v4011_v5  ;;  %v13419_v5 = vld [vmem:[#allocation3 + $0x440] sm:$0xff]  ;;  %v13421_v25 = vsub.f32 %v2612_v55, %v4029_v0  ;;  %v13439_v55 = vsub.f32 %v2615_v59, %v4033_v28  ;;  %v13444_v0 = vsub.f32 %v2618_v60, %v4037_v23  ;;  %v13458_v28 = vld [vmem:[#allocation3 + $0x450] sm:$0xff] }
 0x2c8   : > { %9908 = vmatprep.subr.bf16.mxu1 %v13359_v17  ;;  %16326 = vst [vmem:[#allocation168_spill] sm:$0xff] %v13434_v6  ;;  %v4053_v38 = vand.u32 4294901760, %v13419_v5  ;;  %v4123_v44 = vsub.f32 %v13383_v33, %v16329_v14  ;;  %v4135_v1 = vsub.f32 %v13385_v12, %v16330_v54  ;;  %v16332_v14 = vand.u32 4294901760, %v13429_v9 }
 0x2c9   : > { %v16334_v31 = vand.u32 4294901760, %v13387_v2  ;;  %v4141_v23 = vsub.f32 %v13389_v29, %v16335_v37  ;;  %v16336_v54 = vand.u32 4294901760, %v13391_v35  ;;  %v16338_v37 = vand.u32 4294901760, %v13450_v34 }
 0x2ca   : > { %3987 = vmatmul.mubr.f32.vlgmr.msra.gmra.mrb[2].mxu1 %v16295_v3  ;;  %v13460_v3 = vld [vmem:[#allocation3 + $0x468] sm:$0xff]  ;;  %v13476_v60 = vpack.c.bf16 %v4053_v38, %v4049_v16 }
 0x2cb   : > { %3993 = vmatprep.mubr.f32.mxu1 %v16296_v15  ;;  %9910 = vmatpush1.bf16.msra.mxu1 %v13362_v10  ;;  %v13427_v15 = vld [vmem:[#allocation3 + $0x420] sm:$0xff]  ;;  %v4129_v48 = vsub.f32 %v13387_v2, %v16334_v31  ;;  %v4147_v7 = vsub.f32 %v13391_v35, %v16336_v54 }
 0x2cc   : > { %9912 = vmatprep.subr.bf16.mxu1 %v13365_v4  ;;  %v4051_v36 = vand.u32 4294901760, %v13427_v15  ;;  %16331 = vst [vmem:[#allocation7_spill] sm:$0xff] %v13476_v60 }
 0x2ce   : > { %3995 = vmatmul.mubr.f32.gmra.mrb[4].mxu1 %v16299_v46  ;;  %v4047_v46 = vand.u32 4294901760, %v13404_v56 }
 0x2cf   : > { %9914 = vmatpush1.bf16.msra.mxu1 %v13370_v58  ;;  %4097 = vmatprep.mubr.f32.mxu1 %v16322_v11 }
 0x2d0   : > { %9916 = vmatprep.subr.bf16.mxu1 %v13373_v50  ;;  %v13456_v59 = vpack.c.bf16 %v4047_v46, %v4043_v63  ;;  %v13516_v54 = vsub.f32 %v13404_v56, %v4047_v46  ;;  %v16343_v46 = vand.u32 4294901760, %v13458_v28  ;;  %v16344_v56 = vand.u32 4294901760, %v13460_v3 }
 0x2d2   : > { %16328 = vst [vmem:[#allocation6_spill] sm:$0xff] %v13456_v59 }
 0x2d3   : > { %9918 = vmatpush1.bf16.msra.mxu1 %v13377_v57  ;;  %v16349_v57 = vand.u32 4294901760, %v13417_v52 }
 0x2d4   : > { %9920 = vmatprep.subr.bf16.mxu1 %v13381_v41  ;;  %v16341_v41 = vand.u32 4294901760, %v13395_v21 }
 0x2d7   : > { %9922 = vmatpush1.bf16.msra.mxu1 %v13400_v24  ;;  %v13504_v24 = vsub.f32 %v13402_v18, %v4043_v63  ;;  %v4148_v63 = vand.u32 4294901760, %v4147_v7  ;;  %v13548_v7 = vsub.f32 %v13427_v15, %v4051_v36  ;;  %v15495_v18 = vand.u32 4294901760, %v13423_v20  ;;  %v16351_v15 = vld [vmem:[#allocation145_spill] sm:$0xff] }
 0x2d8   : > { %9924 = vmatprep.subr.bf16.mxu1 %v13409_v47  ;;  %v13484_v47 = vpack.c.bf16 %v16332_v14, %v4051_v36  ;;  %v4136_v14 = vand.u32 4294901760, %v4135_v1  ;;  %v15490_v1 = vand.u32 4294901760, %v13411_v27 }
 0x2da   : > { %16333 = vst [vmem:[#allocation170_spill] sm:$0xff] %v13484_v47 }
 0x2db   : > { %9926 = vmatpush1.bf16.msra.mxu1 %v13434_v6  ;;  %v13480_v6 = vsub.f32 %v2624_v43, %v4045_v19  ;;  %v4124_v19 = vand.u32 4294901760, %v4123_v44  ;;  %v16339_v43 = vand.u32 4294901760, %v13452_v49 }
 0x2dc   : > { %9928 = vmatprep.subr.bf16.mxu1 %v13441_v13  ;;  %v16337_v13 = vand.u32 4294901760, %v13393_v62 }
 0x2dd   : > { %v13511_v61 = vpack.c.bf16 %v16339_v43, %v16338_v37  ;;  %v4153_v43 = vsub.f32 %v13395_v21, %v16341_v41  ;;  %v16342_v37 = vand.u32 4294901760, %v13397_v40 }
 0x2de   : > { %v4159_v31 = vsub.f32 %v13393_v62, %v16337_v13  ;;  %v4130_v13 = vand.u32 4294901760, %v4129_v48 }
 0x2df   : > { %9930 = vmatpush1.bf16.msra.mxu1 %v13456_v59  ;;  %16340 = vst [vmem:[#allocation124_spill] sm:$0xff] %v13511_v61  ;;  %v13518_v59 = vsub.f32 %v2627_v8, %v4049_v16  ;;  %v4165_v44 = vsub.f32 %v13397_v40, %v16342_v37  ;;  %v13533_v8 = vpack.c.bf16 %v16344_v56, %v16343_v46 }
 0x2e0   : > { %9932 = vmatprep.subr.bf16.mxu1 %v13476_v60  ;;  %v4142_v60 = vand.u32 4294901760, %v4141_v23  ;;  %v9939_v16 = vpack.c.bf16 %v4136_v14, %v4124_v19  ;;  %v4160_v48 = vand.u32 4294901760, %v4159_v31  ;;  %v16346_v23 = vand.u32 4294901760, %v13406_v22 }
 0x2e1   : > { %16345 = vst [vmem:[#allocation123_spill] sm:$0xff] %v13533_v8  ;;  %v4183_v37 = vsub.f32 %v13411_v27, %v15490_v1  ;;  %v13545_v46 = vsub.f32 %v13419_v5, %v4053_v38  ;;  %v16347_v19 = vand.u32 4294901760, %v13413_v53  ;;  %v16348_v31 = vand.u32 4294901760, %v13415_v30 }
 0x2e2   : > { %v4171_v41 = vsub.f32 %v13406_v22, %v16346_v23  ;;  %v9941_v23 = vpack.c.bf16 %v4142_v60, %v4130_v13  ;;  %v4154_v1 = vand.u32 4294901760, %v4153_v43  ;;  %v9943_v5 = vpack.c.bf16 %v4160_v48, %v4148_v63 }
 0x2e3   : > { %9934 = vmatpush1.bf16.msra.mxu1 %v13484_v47  ;;  %v4177_v14 = vsub.f32 %v13413_v53, %v16347_v19  ;;  %v4189_v56 = vsub.f32 %v13415_v30, %v16348_v31  ;;  %v15496_v38 = vand.u32 4294901760, %v13432_v32  ;;  %v4184_v47 = vand.u32 4294901760, %v4183_v37 }
 0x2e4   : > { %9936 = vmatprep.subr.bf16.mxu1 %v13511_v61  ;;  %v4166_v61 = vand.u32 4294901760, %v4165_v44  ;;  %v4172_v19 = vand.u32 4294901760, %v4171_v41  ;;  %v4195_v60 = vsub.f32 %v13417_v52, %v16349_v57  ;;  %v16350_v44 = vand.u32 4294901760, %v13421_v25 }
 0x2e5   : > { %v4178_v43 = vand.u32 4294901760, %v4177_v14  ;;  %v4190_v31 = vand.u32 4294901760, %v4189_v56  ;;  %v15499_v63 = vand.u32 4294901760, %v13446_v45  ;;  %v4213_v37 = vsub.f32 %v13432_v32, %v15496_v38 }
 0x2e6   : > { %v4207_v13 = vsub.f32 %v13421_v25, %v16350_v44  ;;  %v9945_v36 = vpack.c.bf16 %v4166_v61, %v4154_v1  ;;  %v16352_v14 = vand.u32 4294901760, %v13439_v55  ;;  %v16353_v61 = vand.u32 4294901760, %v13444_v0 }
 0x2e7   : > { %9938 = vmatpush1.bf16.msra.mxu1 %v13533_v8  ;;  %v16355_v41 = vand.u32 4294901760, %v13450_v34  ;;  %v9949_v48 = vpack.c.bf16 %v4190_v31, %v4178_v43  ;;  %v4214_v31 = vand.u32 4294901760, %v4213_v37 }
 0x2e8   : > { %9940 = vmatprep.subr.bf16.mxu1 %v9939_v16  ;;  %v4201_v16 = vsub.f32 %v13423_v20, %v15495_v18  ;;  %v4219_v56 = vsub.f32 %v13439_v55, %v16352_v14  ;;  %v4231_v1 = vsub.f32 %v13444_v0, %v16353_v61  ;;  %v4196_v18 = vand.u32 4294901760, %v4195_v60 }
 0x2e9   : > { %v4208_v57 = vand.u32 4294901760, %v4207_v13  ;;  %v13593_v38 = vsub.f32 %v13450_v34, %v16355_v41  ;;  %v4225_v14 = vsub.f32 %v13446_v45, %v15499_v63  ;;  %v16356_v61 = vand.u32 4294901760, %v13454_v39 }
 0x2ea   : > { %4103 = vmatmul.mubr.f32.vlgmr.msra.gmra.mrb[2].mxu1 %v16351_v15  ;;  %v16354_v15 = vand.u32 4294901760, %v13429_v9  ;;  %v15501_v60 = vand.u32 4294901760, %v13504_v24  ;;  %v4202_v43 = vand.u32 4294901760, %v4201_v16  ;;  %v4220_v41 = vand.u32 4294901760, %v4219_v56 }
 0x2eb   : > { %9942 = vmatpush1.bf16.msra.mxu1 %v9941_v23  ;;  %4108 = vmatprep.mubr.f32.mxu1 %v16322_v11  ;;  %v9947_v23 = vpack.c.bf16 %v4184_v47, %v4172_v19  ;;  %v4237_v8 = vsub.f32 %v13454_v39, %v16356_v61  ;;  %v16358_v47 = vand.u32 4294901760, %v13474_v26  ;;  %v16359_v19 = vand.u32 4294901760, %v13480_v6 }
 0x2ec   : > { %v13588_v44 = vsub.f32 %v13429_v9, %v16354_v15  ;;  %9944 = vmatprep.subr.bf16.mxu1 %v9943_v5  ;;  %v16357_v9 = vld [vmem:[#allocation154_spill] sm:$0xff]  ;;  %v4232_v15 = vand.u32 4294901760, %v4231_v1  ;;  %v16360_v61 = vand.u32 4294901760, %v13452_v49  ;;  %v16361_v13 = vand.u32 4294901760, %v13458_v28 }
 0x2ed   : > { %v4243_v5 = vsub.f32 %v13474_v26, %v16358_v47  ;;  %v4255_v34 = vsub.f32 %v13480_v6, %v16359_v19  ;;  %v9951_v47 = vpack.c.bf16 %v4208_v57, %v4196_v18  ;;  %v15500_v19 = vand.u32 4294901760, %v13518_v59 }
 0x2ee   : > { %4114 = vmatmul.mubr.f32.gmra.mrb[4].mxu1 %v16357_v9  ;;  %v13614_v9 = vsub.f32 %v13452_v49, %v16360_v61  ;;  %v16362_v16 = vand.u32 4294901760, %v13460_v3  ;;  %v4226_v56 = vand.u32 4294901760, %v4225_v14  ;;  %v4238_v1 = vand.u32 4294901760, %v4237_v8 }
 0x2ef   : > { %9946 = vmatpush1.bf16.msra.mxu1 %v9945_v36  ;;  %4344 = vmatprep.mubr.f32.mxu1 %v16322_v11  ;;  %v13621_v36 = vsub.f32 %v13458_v28, %v16361_v13  ;;  %v4244_v49 = vand.u32 4294901760, %v4243_v5  ;;  %v4256_v61 = vand.u32 4294901760, %v4255_v34  ;;  %v4249_v18 = vsub.f32 %v13504_v24, %v15501_v60 }
 0x2f0   : > { %9948 = vmatprep.subr.bf16.mxu1 %v9947_v23  ;;  %v13626_v37 = vsub.f32 %v13460_v3, %v16362_v16  ;;  %v16363_v57 = vand.u32 4294901760, %v13516_v54  ;;  %v9953_v28 = vpack.c.bf16 %v4214_v31, %v4202_v43  ;;  %v9955_v13 = vpack.c.bf16 %v4232_v15, %v4220_v41 }
 0x2f1   : > { %v15507_v63 = vand.u32 4294901760, %v13548_v7  ;;  %v15503_v3 = vand.u32 4294901760, %v13588_v44  ;;  %v4267_v8 = vsub.f32 %v13518_v59, %v15500_v19  ;;  %v16364_v14 = vand.u32 4294901760, %v13545_v46 }
 0x2f2   : > { %v4261_v23 = vsub.f32 %v13516_v54, %v16363_v57  ;;  %v15502_v34 = vand.u32 4294901760, %v13593_v38  ;;  %v15504_v16 = vand.u32 4294901760, %v13614_v9  ;;  %v9959_v43 = vpack.c.bf16 %v4256_v61, %v4244_v49 }
 0x2f3   : > { %9950 = vmatpush1.bf16.msra.mxu1 %v9949_v48  ;;  %v4279_v5 = vsub.f32 %v13545_v46, %v16364_v14  ;;  %v9957_v48 = vpack.c.bf16 %v4238_v1, %v4226_v56  ;;  %v4250_v31 = vand.u32 4294901760, %v4249_v18  ;;  %v4273_v15 = vsub.f32 %v13548_v7, %v15507_v63 }
 0x2f4   : > { %9952 = vmatprep.subr.bf16.mxu1 %v9951_v47  ;;  %v4262_v41 = vand.u32 4294901760, %v4261_v23  ;;  %v4285_v47 = vsub.f32 %v13588_v44, %v15503_v3  ;;  %v15506_v57 = vand.u32 4294901760, %v13621_v36  ;;  %v15505_v14 = vand.u32 4294901760, %v13626_v37 }
 0x2f5   : > { %v4268_v19 = vand.u32 4294901760, %v4267_v8  ;;  %v4280_v60 = vand.u32 4294901760, %v4279_v5  ;;  %v4291_v56 = vsub.f32 %v13593_v38, %v15502_v34  ;;  %v4303_v1 = vsub.f32 %v13614_v9, %v15504_v16 }
 0x2f6   : > { %v9961_v49 = vpack.c.bf16 %v4262_v41, %v4250_v31  ;;  %v4274_v61 = vand.u32 4294901760, %v4273_v15  ;;  %v4286_v18 = vand.u32 4294901760, %v4285_v47  ;;  %v4297_v23 = vsub.f32 %v13621_v36, %v15506_v57  ;;  %v6535_v57 = vld [vmem:[%s15010_s7 + $0xb0] sm:$0xff] }
 0x2f7   : > { %9954 = vmatpush1.bf16.msra.mxu1 %v9953_v28  ;;  %v4309_v28 = vsub.f32 %v13626_v37, %v15505_v14  ;;  %v4292_v8 = vand.u32 4294901760, %v4291_v56  ;;  %v4304_v5 = vand.u32 4294901760, %v4303_v1  ;;  %v9971_v41 = vpack.c.bf16 %v13385_v12, %v13383_v33 }
 0x2f8   : > { %9956 = vmatprep.subr.bf16.mxu1 %v9955_v13  ;;  %v9963_v13 = vpack.c.bf16 %v4280_v60, %v4268_v19  ;;  %v9965_v34 = vpack.c.bf16 %v4286_v18, %v4274_v61  ;;  %v4298_v3 = vand.u32 4294901760, %v4297_v23  ;;  %v9973_v15 = vpack.c.bf16 %v13389_v29, %v13387_v2 }
 0x2f9   : > { %v4310_v16 = vand.u32 4294901760, %v4309_v28  ;;  %v9975_v60 = vpack.c.bf16 %v13393_v62, %v13391_v35  ;;  %v9977_v19 = vpack.c.bf16 %v13397_v40, %v13395_v21  ;;  %v9987_v47 = vpack.c.bf16 %v13444_v0, %v13439_v55 }
 0x2fa   : > { %v9989_v56 = vpack.c.bf16 %v13454_v39, %v13446_v45  ;;  %v9991_v1 = vpack.c.bf16 %v13480_v6, %v13474_v26  ;;  %v9995_v61 = vpack.c.bf16 %v13545_v46, %v13518_v59  ;;  %v9997_v18 = vpack.c.bf16 %v13588_v44, %v13548_v7 }
 0x2fb   : > { %9958 = vmatpush1.bf16.msra.mxu1 %v9957_v48  ;;  %v9967_v48 = vpack.c.bf16 %v4304_v5, %v4292_v8  ;;  %v9969_v31 = vpack.c.bf16 %v4310_v16, %v4298_v3  ;;  %v9979_v3 = vpack.c.bf16 %v13411_v27, %v13406_v22  ;;  %v9983_v16 = vpack.c.bf16 %v13421_v25, %v13417_v52  ;;  %v16366_v8 = vld [vmem:[#allocation150_spill] sm:$0xff]  ;;  %v16367_v5 = vld [vmem:[#allocation163_spill] sm:$0xff] }
 0x2fc   : > { %9960 = vmatprep.subr.bf16.mxu1 %v9959_v43  ;;  %v9985_v43 = vpack.c.bf16 %v13432_v32, %v13423_v20  ;;  %v9999_v23 = vpack.c.bf16 %v13614_v9, %v13593_v38  ;;  %v10001_v28 = vpack.c.bf16 %v13626_v37, %v13621_v36 }
 0x2ff   : > { %9962 = vmatpush1.bf16.msra.mxu1 %v9961_v49  ;;  %v9993_v49 = vpack.c.bf16 %v13516_v54, %v13504_v24 }
 0x300   : > { %9964 = vmatprep.subr.bf16.mxu1 %v9963_v13  ;;  %v16365_v13 = vld [vmem:[#allocation142_spill] sm:$0xff] }
 0x303   : > { %9966 = vmatpush1.bf16.msra.mxu1 %v9965_v34  ;;  %v9981_v34 = vpack.c.bf16 %v13415_v30, %v13413_v53 }
 0x304   : > { %9968 = vmatprep.subr.bf16.mxu1 %v9967_v48  ;;  %v16368_v48 = vld [vmem:[#allocation164_spill] sm:$0xff] }
 0x307   : > { %9970 = vmatpush1.bf16.msra.mxu1 %v9969_v31  ;;  %v16369_v31 = vld [vmem:[#allocation165_spill] sm:$0xff] }
 0x308   : > { %9972 = vmatprep.subr.bf16.mxu1 %v9971_v41  ;;  %v16370_v41 = vld [vmem:[#allocation166_spill] sm:$0xff] }
 0x30a   : > { %4346 = vmatmul.mubr.f32.vlgmr.msra.gmra.mrb[2].mxu1 %v12716_v51 }
 0x30b   : > { %9974 = vmatpush1.bf16.msra.mxu1 %v9973_v15  ;;  %4351 = vmatprep.mubr.f32.mxu1 %v16322_v11  ;;  %v16371_v15 = vld [vmem:[#allocation168_spill] sm:$0xff] }
 0x30c   : > { %9976 = vmatprep.subr.bf16.mxu1 %v9975_v60  ;;  %v16372_v60 = vld [vmem:[#allocation169_spill] sm:$0xff] }
 0x30e   : > { %4353 = vmatmul.mubr.f32.gmra.mrb[4].mxu1 %v12840_v42 }
 0x30f   : > { %9978 = vmatpush1.bf16.msra.mxu1 %v9977_v19  ;;  %4487 = vmatprep.mubr.f32.mxu1 %v16322_v11  ;;  %v16373_v19 = vld [vmem:[#allocation6_spill] sm:$0xff] }
 0x310   : > { %9980 = vmatprep.subr.bf16.mxu1 %v9979_v3  ;;  %v16374_v3 = vld [vmem:[#allocation7_spill] sm:$0xff] }
 0x313   : > { %9982 = vmatpush1.bf16.msra.mxu1 %v9981_v34  ;;  %v16375_v34 = vld [vmem:[#allocation170_spill] sm:$0xff] }
 0x314   : > { %9984 = vmatprep.subr.bf16.mxu1 %v9983_v16  ;;  %v16376_v16 = vld [vmem:[#allocation124_spill] sm:$0xff] }
 0x317   : > { %9986 = vmatpush1.bf16.msra.mxu1 %v9985_v43  ;;  %v16377_v43 = vand.u32 4294901760, %v13383_v33  ;;  %v16385_v33 = vand.u32 4294901760, %v13395_v21  ;;  %v16393_v21 = vand.u32 4294901760, %v13421_v25 }
 0x318   : > { %9988 = vmatprep.subr.bf16.mxu1 %v9987_v47  ;;  %v16378_v47 = vand.u32 4294901760, %v13385_v12  ;;  %v16386_v12 = vand.u32 4294901760, %v13397_v40  ;;  %v6529_v40 = vld [vmem:[%s15010_s7 + $0x80] sm:$0xff] }
 0x319   : > { %v6617_v25 = vand.u32 4294901760, %v6529_v40 }
 0x31b   : > { %9990 = vmatpush1.bf16.msra.mxu1 %v9989_v56  ;;  %v10035_v56 = vpack.c.bf16 %v16378_v47, %v16377_v43  ;;  %v10041_v43 = vpack.c.bf16 %v16386_v12, %v16385_v33  ;;  %v16397_v33 = vand.u32 4294901760, %v13444_v0 }
 0x31c   : > { %9992 = vmatprep.subr.bf16.mxu1 %v9991_v1  ;;  %v16379_v1 = vld [vmem:[#allocation123_spill] sm:$0xff] }
 0x31f   : > { %9994 = vmatpush1.bf16.msra.mxu1 %v9993_v49  ;;  %v16380_v49 = vand.u32 4294901760, %v13387_v2  ;;  %v16388_v2 = vand.u32 4294901760, %v13411_v27  ;;  %v6513_v27 = vld [vmem:[%s15010_s7] sm:$0xff] }
 0x320   : > { %9996 = vmatprep.subr.bf16.mxu1 %v9995_v61  ;;  %v16381_v61 = vand.u32 4294901760, %v13389_v29  ;;  %v16387_v29 = vand.u32 4294901760, %v13406_v22  ;;  %v6530_v22 = vld [vmem:[%s15010_s7 + $0x88] sm:$0xff] }
 0x322   : > { %v10043_v47 = vpack.c.bf16 %v16388_v2, %v16387_v29 }
 0x323   : > { %9998 = vmatpush1.bf16.msra.mxu1 %v9997_v18  ;;  %v10037_v18 = vpack.c.bf16 %v16381_v61, %v16380_v49  ;;  %v16392_v61 = vand.u32 4294901760, %v13417_v52 }
 0x324   : > { %10000 = vmatprep.subr.bf16.mxu1 %v9999_v23  ;;  %v16382_v23 = vand.u32 4294901760, %v13391_v35  ;;  %v16389_v35 = vld [vmem:[#allocation152_spill] sm:$0xff] }
 0x327   : > { %10002 = vmatpush1.bf16.msra.mxu1 %v10001_v28  ;;  %v16383_v28 = vand.u32 4294901760, %v13393_v62  ;;  %v16390_v62 = vand.u32 4294901760, %v13413_v53  ;;  %v16394_v53 = vand.u32 4294901760, %v13423_v20  ;;  %v6532_v20 = vld [vmem:[%s15010_s7 + $0x98] sm:$0xff] }
 0x328   : > { %10004 = vmatprep.subr.bf16.mxu1 %v13359_v17  ;;  %v6626_v2 = vand.u32 4294901760, %v6532_v20 }
 0x32a   : > { %4490 = vmatmul.mubr.f32.vlgmr.msra.gmra.mrb[2].mxu1 %v16365_v13  ;;  %v10039_v13 = vpack.c.bf16 %v16383_v28, %v16382_v23  ;;  %v6620_v23 = vand.u32 4294901760, %v6530_v22  ;;  %v6514_v28 = vld [vmem:[%s15010_s7 + $0x8] sm:$0xff] }
 0x32b   : > { %10006 = vmatpush1.bf16.msra.mxu1 %v13362_v10  ;;  %4495 = vmatprep.mubr.f32.mxu1 %v16322_v11 }
 0x32c   : > { %10008 = vmatprep.subr.bf16.mxu1 %v13365_v4  ;;  %v13791_v0 = vsub.f32 %v6530_v22, %v6620_v23 }
 0x32e   : > { %4498 = vmatmul.mubr.f32.gmra.mrb[4].mxu1 %v16366_v8  ;;  %v16384_v8 = vld [vmem:[#allocation143_spill] sm:$0xff] }
 0x32f   : > { %10010 = vmatpush1.bf16.msra.mxu1 %v13370_v58  ;;  %4600 = vmatprep.mubr.f32.mxu1 %v16322_v11 }
 0x330   : > { %10012 = vmatprep.subr.bf16.mxu1 %v13373_v50 }
 0x333   : > { %10014 = vmatpush1.bf16.msra.mxu1 %v16367_v5 }
 0x334   : > { %10016 = vmatprep.subr.bf16.mxu1 %v16368_v48 }
 0x337   : > { %10018 = vmatpush1.bf16.msra.mxu1 %v16369_v31 }
 0x338   : > { %10020 = vmatprep.subr.bf16.mxu1 %v16370_v41 }
 0x33b   : > { %10022 = vmatpush1.bf16.msra.mxu1 %v16371_v15 }
 0x33c   : > { %10024 = vmatprep.subr.bf16.mxu1 %v16372_v60 }
 0x33f   : > { %10026 = vmatpush1.bf16.msra.mxu1 %v16373_v19 }
 0x340   : > { %10028 = vmatprep.subr.bf16.mxu1 %v16374_v3 }
 0x343   : > { %10030 = vmatpush1.bf16.msra.mxu1 %v16375_v34 }
 0x344   : > { %10032 = vmatprep.subr.bf16.mxu1 %v16376_v16 }
 0x347   : > { %10034 = vmatpush1.bf16.msra.mxu1 %v16379_v1 }
 0x348   : > { %10036 = vmatprep.subr.bf16.mxu1 %v10035_v56  ;;  %v16391_v56 = vand.u32 4294901760, %v13415_v30  ;;  %v16395_v30 = vand.u32 4294901760, %v13432_v32  ;;  %v16396_v32 = vand.u32 4294901760, %v13439_v55  ;;  %v13789_v55 = vsub.f32 %v6529_v40, %v6617_v25 }
 0x34a   : > { %4604 = vmatmul.mubr.f32.vlgmr.msra.gmra.mrb[2].mxu1 %v16384_v8  ;;  %v10045_v49 = vpack.c.bf16 %v16391_v56, %v16390_v62  ;;  %v10049_v52 = vpack.c.bf16 %v16395_v30, %v16394_v53  ;;  %v6531_v8 = vld [vmem:[%s15010_s7 + $0x90] sm:$0xff]  ;;  %v10051_v12 = vpack.c.bf16 %v16397_v33, %v16396_v32  ;;  %v6516_v62 = vld [vmem:[%s15010_s7 + $0x18] sm:$0xff]  ;;  %v13787_v56 = vpack.c.bf16 %v6620_v23, %v6617_v25  ;;  %v6517_v53 = vld [vmem:[%s15010_s7 + $0x20] sm:$0xff] }
 0x34b   : > { %10038 = vmatpush1.bf16.msra.mxu1 %v10037_v18  ;;  %4609 = vmatprep.mubr.f32.mxu1 %v16322_v11  ;;  %v10047_v18 = vpack.c.bf16 %v16393_v21, %v16392_v61  ;;  %v6623_v29 = vand.u32 4294901760, %v6531_v8  ;;  %v6534_v21 = vld [vmem:[%s15010_s7 + $0xa8] sm:$0xff]  ;;  %v13812_v25 = vsub.f32 %v6532_v20, %v6626_v2  ;;  %v6578_v33 = vand.u32 4294901760, %v6516_v62 }
 0x34c   : > { %10040 = vmatprep.subr.bf16.mxu1 %v10039_v13  ;;  %v6569_v13 = vand.u32 4294901760, %v6513_v27  ;;  %16398 = vst [vmem:[#allocation130_spill] sm:$0xff] %v13787_v56  ;;  %v6518_v30 = vld [vmem:[%s15010_s7 + $0x28] sm:$0xff]  ;;  %10484 = vmatprep.subr.bf16.mxu0 %v13787_v56 }
 0x34d   : > { %v13808_v22 = vpack.c.bf16 %v6626_v2, %v6623_v29  ;;  %16403 = vst [vmem:[#allocation171_spill] sm:$0xff] %v13812_v25  ;;  %v6584_v20 = vand.u32 4294901760, %v6518_v30  ;;  %v6519_v2 = vld [vmem:[%s15010_s7 + $0x30] sm:$0xff] }
 0x34e   : > { %4613 = vmatmul.mubr.f32.gmra.mrb[4].mxu1 %v16389_v35  ;;  %v6515_v35 = vld [vmem:[%s15010_s7 + $0x10] sm:$0xff]  ;;  %v13793_v61 = vsub.f32 %v6513_v27, %v6569_v13  ;;  %v13810_v27 = vsub.f32 %v6531_v8, %v6623_v29  ;;  %v6581_v8 = vand.u32 4294901760, %v6517_v53  ;;  %v6536_v29 = vld [vmem:[%s15010_s7 + $0xb8] sm:$0xff] }
 0x34f   : > { %10042 = vmatpush1.bf16.msra.mxu1 %v10041_v43  ;;  %4779 = vmatprep.mubr.f32.mxu1 %v16322_v11  ;;  %v6572_v43 = vand.u32 4294901760, %v6514_v28  ;;  %16401 = vst [vmem:[#allocation14_spill] sm:$0xff] %v13808_v22  ;;  %v6575_v23 = vand.u32 4294901760, %v6515_v35 }
 0x350   : > { %10044 = vmatprep.subr.bf16.mxu1 %v10043_v47  ;;  %v6533_v47 = vld [vmem:[%s15010_s7 + $0xa0] sm:$0xff]  ;;  %16402 = vst [vmem:[#allocation172_spill] sm:$0xff] %v13810_v27 }
 0x351   : > { %v13804_v32 = vpack.c.bf16 %v6572_v43, %v6569_v13  ;;  %v13806_v40 = vsub.f32 %v6514_v28, %v6572_v43  ;;  %v6629_v14 = vand.u32 4294901760, %v6533_v47  ;;  %v16404_v28 = vand.u32 4294901760, %v13446_v45 }
 0x352   : > { %v16405_v13 = vand.u32 4294901760, %v13454_v39  ;;  %v13829_v63 = vsub.f32 %v6515_v35, %v6575_v23  ;;  %v6635_v39 = vand.u32 4294901760, %v6535_v57  ;;  %v13847_v35 = vsub.f32 %v6518_v30, %v6584_v20 }
 0x353   : > { %16399 = vst [vmem:[#allocation134_spill] sm:$0xff] %v13804_v32  ;;  %16400 = vst [vmem:[#allocation132_spill] sm:$0xff] %v13806_v40  ;;  %10046 = vmatpush1.bf16.msra.mxu1 %v10045_v49  ;;  %10486 = vmatpush3.bf16.msra.mxu0 %v13804_v32  ;;  %v6632_v49 = vand.u32 4294901760, %v6534_v21  ;;  %v13833_v45 = vsub.f32 %v6533_v47, %v6629_v14  ;;  %v13845_v40 = vsub.f32 %v6517_v53, %v6581_v8 }
 0x354   : > { %10048 = vmatprep.subr.bf16.mxu1 %v10047_v18  ;;  %v10053_v43 = vpack.c.bf16 %v16405_v13, %v16404_v28  ;;  %v13831_v18 = vsub.f32 %v6516_v62, %v6578_v33  ;;  %10488 = vmatprep.subr.bf16.mxu0 %v13808_v22  ;;  %v6520_v28 = vld [vmem:[%s15010_s7 + $0x38] sm:$0xff]  ;;  %v13839_v13 = vpack.c.bf16 %v6578_v33, %v6575_v23  ;;  %v6638_v62 = vand.u32 4294901760, %v6536_v29  ;;  %v6521_v23 = vld [vmem:[%s15010_s7 + $0x40] sm:$0xff]  ;;  %v6522_v33 = vld [vmem:[%s15010_s7 + $0x48] sm:$0xff] }
 0x355   : > { %16407 = vst [vmem:[#allocation19_spill] sm:$0xff] %v13833_v45  ;;  %v13841_v25 = vpack.c.bf16 %v6632_v49, %v6629_v14  ;;  %v13843_v27 = vsub.f32 %v6534_v21, %v6632_v49  ;;  %16411 = vst [vmem:[#allocation29_spill] sm:$0xff] %v13845_v40  ;;  %v13849_v47 = vsub.f32 %v6535_v57, %v6635_v39  ;;  %v6587_v45 = vand.u32 4294901760, %v6519_v2  ;;  %v6538_v14 = vld [vmem:[%s15010_s7 + $0xc8] sm:$0xff] }
 0x356   : > { %16406 = vst [vmem:[#allocation17_spill] sm:$0xff] %v13831_v18  ;;  %16408 = vst [vmem:[#allocation20_spill] sm:$0xff] %v13839_v13  ;;  %v6537_v18 = vld [vmem:[%s15010_s7 + $0xc0] sm:$0xff]  ;;  %v16414_v21 = vand.u32 4294901760, %v13474_v26  ;;  %v16415_v53 = vand.u32 4294901760, %v13480_v6  ;;  %v6590_v30 = vand.u32 4294901760, %v6520_v28  ;;  %v13868_v49 = vsub.f32 %v6536_v29, %v6638_v62 }
 0x357   : > { %16409 = vst [vmem:[#allocation22_spill] sm:$0xff] %v13841_v25  ;;  %16410 = vst [vmem:[#allocation26_spill] sm:$0xff] %v13843_v27  ;;  %10050 = vmatpush1.bf16.msra.mxu1 %v10049_v52  ;;  %10490 = vmatpush3.bf16.msra.mxu0 %v13839_v13  ;;  %v6641_v57 = vand.u32 4294901760, %v6537_v18  ;;  %v6644_v26 = vand.u32 4294901760, %v6538_v14  ;;  %v6593_v6 = vand.u32 4294901760, %v6521_v23  ;;  %v13883_v29 = vpack.c.bf16 %v6638_v62, %v6635_v39  ;;  %v6524_v62 = vld [vmem:[%s15010_s7 + $0x58] sm:$0xff] }
 0x358   : > { %16412 = vst [vmem:[#allocation31_spill] sm:$0xff] %v13847_v35  ;;  %16413 = vst [vmem:[#allocation32_spill] sm:$0xff] %v13849_v47  ;;  %10052 = vmatprep.subr.bf16.mxu1 %v10051_v12  ;;  %v10055_v52 = vpack.c.bf16 %v16415_v53, %v16414_v21  ;;  %v13870_v12 = vsub.f32 %v6519_v2, %v6587_v45  ;;  %10492 = vmatprep.subr.bf16.mxu0 %v13841_v25  ;;  %v16418_v21 = vand.u32 4294901760, %v13504_v24  ;;  %v6539_v24 = vld [vmem:[%s15010_s7 + $0xd0] sm:$0xff] }
 0x359   : > { %16416 = vst [vmem:[#allocation33_spill] sm:$0xff] %v13868_v49  ;;  %v16419_v53 = vand.u32 4294901760, %v13516_v54  ;;  %v13877_v35 = vpack.c.bf16 %v6584_v20, %v6581_v8  ;;  %v13879_v40 = vsub.f32 %v6520_v28, %v6590_v30  ;;  %v13881_v27 = vsub.f32 %v6537_v18, %v6641_v57  ;;  %16421 = vst [vmem:[#allocation120_spill] sm:$0xff] %v13883_v29  ;;  %v6540_v54 = vld [vmem:[%s15010_s7 + $0xd8] sm:$0xff]  ;;  %v6523_v28 = vld [vmem:[%s15010_s7 + $0x50] sm:$0xff] }
 0x35a   : > { %16417 = vst [vmem:[#allocation80_spill] sm:$0xff] %v13870_v12  ;;  %v13885_v2 = vsub.f32 %v6538_v14, %v6644_v26  ;;  %v6596_v12 = vand.u32 4294901760, %v6522_v33  ;;  %v13887_v49 = vsub.f32 %v6521_v23, %v6593_v6  ;;  %v16423_v8 = vand.u32 4294901760, %v13518_v59 }
 0x35b   : > { %v10057_v47 = vpack.c.bf16 %v16419_v53, %v16418_v21  ;;  %16420 = vst [vmem:[#allocation112_spill] sm:$0xff] %v13877_v35  ;;  %10054 = vmatpush1.bf16.msra.mxu1 %v10053_v43  ;;  %v16424_v43 = vand.u32 4294901760, %v13545_v46  ;;  %10494 = vmatpush3.bf16.msra.mxu0 %v13877_v35  ;;  %v6647_v18 = vand.u32 4294901760, %v6539_v24  ;;  %v6650_v39 = vand.u32 4294901760, %v6540_v54 }
 0x35c   : > { %16422 = vst [vmem:[#allocation133_spill] sm:$0xff] %v13887_v49  ;;  %10056 = vmatprep.subr.bf16.mxu1 %v10055_v52  ;;  %v13906_v14 = vsub.f32 %v6522_v33, %v6596_v12  ;;  %10496 = vmatprep.subr.bf16.mxu0 %v13883_v29  ;;  %v6599_v59 = vand.u32 4294901760, %v6523_v28  ;;  %v6602_v52 = vand.u32 4294901760, %v6524_v62  ;;  %v13909_v46 = vpack.c.bf16 %v6590_v30, %v6587_v45 }
 0x35d   : > { %v10059_v20 = vpack.c.bf16 %v16424_v43, %v16423_v8  ;;  %v13911_v23 = vsub.f32 %v6539_v24, %v6647_v18  ;;  %v13913_v21 = vsub.f32 %v6540_v54, %v6650_v39  ;;  %v16427_v53 = vand.u32 4294901760, %v13548_v7 }
 0x35e   : > { %16425 = vst [vmem:[#allocation21_spill] sm:$0xff] %v13906_v14  ;;  %16426 = vst [vmem:[#allocation146_spill] sm:$0xff] %v13909_v46  ;;  %v16428_v8 = vand.u32 4294901760, %v13588_v44  ;;  %v13919_v49 = vpack.c.bf16 %v6644_v26, %v6641_v57  ;;  %v13921_v33 = vsub.f32 %v6523_v28, %v6599_v59  ;;  %v13923_v14 = vsub.f32 %v6524_v62, %v6602_v52 }
 0x35f   : > { %10058 = vmatpush1.bf16.msra.mxu1 %v10057_v47  ;;  %v16430_v45 = vand.u32 4294901760, %v13593_v38  ;;  %v16431_v30 = vand.u32 4294901760, %v13614_v9  ;;  %10498 = vmatpush3.bf16.msra.mxu0 %v13909_v46  ;;  %v13931_v7 = vpack.c.bf16 %v6596_v12, %v6593_v6  ;;  %v16433_v44 = vand.u32 4294901760, %v13621_v36  ;;  %v16442_v9 = vld [vmem:[#allocation128_spill] sm:$0xff]  ;;  %v16443_v36 = vld [vmem:[#allocation173_spill] sm:$0xff]  ;;  %v16457_v6 = vld [vmem:[#allocation38_spill] sm:$0xff] }
 0x360   : > { %v10061_v43 = vpack.c.bf16 %v16428_v8, %v16427_v53  ;;  %16429 = vst [vmem:[#allocation23_spill] sm:$0xff] %v13919_v49  ;;  %10060 = vmatprep.subr.bf16.mxu1 %v10059_v20  ;;  %10500 = vmatprep.subr.bf16.mxu0 %v13919_v49  ;;  %v16434_v47 = vand.u32 4294901760, %v13626_v37  ;;  %v13937_v26 = vpack.c.bf16 %v6650_v39, %v6647_v18  ;;  %v16444_v37 = vld [vmem:[#allocation135_spill] sm:$0xff]  ;;  %v16458_v54 = vand.u32 4294901760, %v16457_v6  ;;  %v16459_v18 = vld [vmem:[#allocation144_spill] sm:$0xff]  ;;  %v16460_v39 = vld [vmem:[#allocation94_spill] sm:$0xff] }
 0x361   : > { %v10063_v24 = vpack.c.bf16 %v16431_v30, %v16430_v45  ;;  %16432 = vst [vmem:[#allocation24_spill] sm:$0xff] %v13931_v7  ;;  %v13941_v38 = vpack.c.bf16 %v6602_v52, %v6599_v59  ;;  %v16461_v59 = vld [vmem:[#allocation41_spill] sm:$0xff]  ;;  %v16463_v8 = vld [vmem:[#allocation42_spill] sm:$0xff] }
 0x362   : > { %v10065_v57 = vpack.c.bf16 %v16434_v47, %v16433_v44  ;;  %16435 = vst [vmem:[#allocation25_spill] sm:$0xff] %v13937_v26  ;;  %v5043_v20 = vsub.f32 %v16457_v6, %v16458_v54  ;;  %v16462_v52 = vand.u32 4294901760, %v16461_v59  ;;  %v16465_v44 = vld [vmem:[#allocation147_spill] sm:$0xff]  ;;  %v16479_v6 = vld [vmem:[#allocation108_spill] sm:$0xff] }
 0x363   : > { %10062 = vmatpush1.bf16.msra.mxu1 %v10061_v43  ;;  %10502 = vmatpush3.bf16.msra.mxu0 %v13931_v7  ;;  %16436 = vst [vmem:[#allocation27_spill] sm:$0xff] %v13941_v38  ;;  %v16464_v43 = vand.u32 4294901760, %v16463_v8  ;;  %v16466_v47 = vld [vmem:[#allocation43_spill] sm:$0xff] }
 0x364   : > { %10064 = vmatprep.subr.bf16.mxu1 %v10063_v24  ;;  %10504 = vmatprep.subr.bf16.mxu0 %v13937_v26  ;;  %v5162_v53 = vsub.f32 %v16461_v59, %v16462_v52  ;;  %v5044_v24 = vand.u32 4294901760, %v5043_v20 }
 0x365   : > { %v5169_v45 = vsub.f32 %v16463_v8, %v16464_v43 }
 0x367   : > { %10066 = vmatpush1.bf16.msra.mxu1 %v10065_v57  ;;  %10506 = vmatpush3.bf16.msra.mxu0 %v13941_v38  ;;  %v16467_v57 = vand.u32 4294901760, %v16466_v47 }
 0x368   : > { %10068 = vmatprep.subr.bf16.mxu1 %v13359_v17 }
 0x36a   : > { %4781 = vmatmul.mubr.f32.vlgmr.msra.gmra.mrb[2].mxu1 %v12716_v51 }
 0x36b   : > { %10070 = vmatpush1.bf16.msra.mxu1 %v13362_v10  ;;  %4786 = vmatprep.mubr.f32.mxu1 %v16322_v11 }
 0x36c   : > { %10072 = vmatprep.subr.bf16.mxu1 %v13365_v4  ;;  %v16439_v4 = vld [vmem:[#allocation125_spill] sm:$0xff] }
 0x36e   : > { %4788 = vmatmul.mubr.f32.gmra.mrb[4].mxu1 %v12840_v42 }
 0x36f   : > { %10074 = vmatpush1.bf16.msra.mxu1 %v13370_v58  ;;  %4890 = vmatprep.mubr.f32.mxu1 %v16322_v11  ;;  %v16440_v58 = vld [vmem:[#allocation126_spill] sm:$0xff] }
 0x370   : > { %10076 = vmatprep.subr.bf16.mxu1 %v13373_v50  ;;  %v16441_v50 = vld [vmem:[#allocation127_spill] sm:$0xff] }
 0x373   : > { %10078 = vmatpush1.bf16.msra.mxu1 %v16367_v5  ;;  %v16445_v5 = vld [vmem:[#allocation136_spill] sm:$0xff] }
 0x374   : > { %10080 = vmatprep.subr.bf16.mxu1 %v16368_v48  ;;  %v16446_v48 = vld [vmem:[#allocation137_spill] sm:$0xff] }
 0x376   : > { %v13956_v17 = vpop.f32.mrb[22].mxu0 }
 0x377   : > { %10082 = vmatpush1.bf16.msra.mxu1 %v16369_v31  ;;  %16437 = vst [vmem:[#allocation149_spill] sm:$0xff] %v13956_v17  ;;  %v13958_v10 = vpop.f32.mrb[23].mxu0  ;;  %v16447_v31 = vld [vmem:[#allocation138_spill] sm:$0xff] }
 0x378   : > { %16438 = vst [vmem:[#allocation28_spill] sm:$0xff] %v13958_v10  ;;  %10084 = vmatprep.subr.bf16.mxu1 %v16370_v41  ;;  %v16449_v41 = vld [vmem:[#allocation140_spill] sm:$0xff] }
 0x37b   : > { %10086 = vmatpush1.bf16.msra.mxu1 %v16371_v15  ;;  %v16451_v15 = vld [vmem:[#allocation35_spill] sm:$0xff] }
 0x37c   : > { %10088 = vmatprep.subr.bf16.mxu1 %v16372_v60 }
 0x37f   : > { %10090 = vmatpush1.bf16.msra.mxu1 %v16373_v19  ;;  %v16453_v19 = vld [vmem:[#allocation36_spill] sm:$0xff] }
 0x380   : > { %10092 = vmatprep.subr.bf16.mxu1 %v16374_v3  ;;  %v16454_v3 = vand.u32 4294901760, %v16453_v19 }
 0x383   : > { %10094 = vmatpush1.bf16.msra.mxu1 %v16375_v34  ;;  %v5155_v34 = vsub.f32 %v16453_v19, %v16454_v3  ;;  %v16475_v19 = vld [vmem:[#allocation65_spill] sm:$0xff] }
 0x384   : > { %10096 = vmatprep.subr.bf16.mxu1 %v16376_v16  ;;  %v16455_v16 = vld [vmem:[#allocation37_spill] sm:$0xff]  ;;  %v16476_v3 = vand.u32 4294901760, %v16475_v19 }
 0x385   : > { %v5156_v62 = vand.u32 4294901760, %v5155_v34 }
 0x386   : > { %v5064_v34 = vsub.f32 %v16475_v19, %v16476_v3  ;;  %v16494_v19 = vld [vmem:[#allocation176_spill] sm:$0xff] }
 0x387   : > { %10098 = vmatpush1.bf16.msra.mxu1 %v16379_v1  ;;  %v16456_v1 = vand.u32 4294901760, %v16455_v16 }
 0x388   : > { %10100 = vmatprep.subr.bf16.mxu1 %v16439_v4  ;;  %v5050_v4 = vsub.f32 %v16466_v47, %v16467_v57 }
 0x389   : > { %v5036_v12 = vsub.f32 %v16455_v16, %v16456_v1  ;;  %v16477_v16 = vld [vmem:[#allocation66_spill] sm:$0xff] }
 0x38a   : > { %4892 = vmatmul.mubr.f32.vlgmr.msra.gmra.mrb[2].mxu1 %v12716_v51  ;;  %v16448_v51 = vld [vmem:[#allocation139_spill] sm:$0xff]  ;;  %v16478_v1 = vand.u32 4294901760, %v16477_v16  ;;  %v5051_v54 = vand.u32 4294901760, %v5050_v4  ;;  %v16487_v4 = vld [vmem:[#allocation76_spill] sm:$0xff] }
 0x38b   : > { %10102 = vmatpush3.bf16.msra.mxu1 %v16440_v58  ;;  %4897 = vmatprep.mubr.f32.mxu1 %v16322_v11  ;;  %v16450_v11 = vld [vmem:[#allocation141_spill] sm:$0xff]  ;;  %v5037_v30 = vand.u32 4294901760, %v5036_v12  ;;  %v16468_v58 = vld [vmem:[#allocation56_spill] sm:$0xff] }
 0x38c   : > { %10104 = vmatprep.subr.bf16.mxu1 %v16441_v50  ;;  %v16469_v50 = vand.u32 4294901760, %v16468_v58  ;;  %v5071_v12 = vsub.f32 %v16477_v16, %v16478_v1  ;;  %v16495_v1 = vld [vmem:[#allocation85_spill] sm:$0xff] }
 0x38e   : > { %4899 = vmatmul.mubr.f32.gmra.mrb[4].mxu1 %v12840_v42  ;;  %v16452_v42 = vand.u32 4294901760, %v16451_v15 }
 0x38f   : > { %10106 = vmatpush3.bf16.msra.mxu1 %v16442_v9  ;;  %5006 = vmatprep.mubr.f32.mxu1 %v16443_v36  ;;  %v5057_v9 = vsub.f32 %v16468_v58, %v16469_v50  ;;  %v16470_v36 = vld [vmem:[#allocation63_spill] sm:$0xff]  ;;  %v16488_v58 = vand.u32 4294901760, %v16487_v4 }
 0x390   : > { %10108 = vmatprep.subr.bf16.mxu1 %v16444_v37  ;;  %v5148_v60 = vsub.f32 %v16451_v15, %v16452_v42  ;;  %v16471_v37 = vand.u32 4294901760, %v16470_v36  ;;  %v5163_v15 = vand.u32 4294901760, %v5162_v53  ;;  %v5170_v42 = vand.u32 4294901760, %v5169_v45  ;;  %v16482_v53 = vld [vmem:[#allocation74_spill] sm:$0xff] }
 0x391   : > { %v5058_v20 = vand.u32 4294901760, %v5057_v9  ;;  %v16483_v8 = vand.u32 4294901760, %v16482_v53  ;;  %v16484_v45 = vld [vmem:[#allocation174_spill] sm:$0xff]  ;;  %v5085_v50 = vsub.f32 %v16487_v4, %v16488_v58  ;;  %v16489_v9 = vld [vmem:[#allocation175_spill] sm:$0xff] }
 0x392   : > { %v5149_v28 = vand.u32 4294901760, %v5148_v60  ;;  %v10133_v60 = vpack.c.bf16 %v5044_v24, %v5037_v30  ;;  %v10135_v59 = vpack.c.bf16 %v5170_v42, %v5163_v15  ;;  %v5065_v30 = vand.u32 4294901760, %v5064_v34 }
 0x393   : > { %10110 = vmatpush3.bf16.msra.mxu1 %v16445_v5  ;;  %v5176_v5 = vsub.f32 %v16470_v36, %v16471_v37  ;;  %v5197_v43 = vsub.f32 %v16482_v53, %v16483_v8  ;;  %v5072_v24 = vand.u32 4294901760, %v5071_v12  ;;  %v10137_v36 = vpack.c.bf16 %v5058_v20, %v5051_v54  ;;  %v16498_v54 = vld [vmem:[#allocation86_spill] sm:$0xff] }
 0x394   : > { %10112 = vmatprep.subr.bf16.mxu1 %v16446_v48  ;;  %v16472_v48 = vld [vmem:[#allocation64_spill] sm:$0xff]  ;;  %v5086_v16 = vand.u32 4294901760, %v5085_v50  ;;  %v16499_v20 = vand.u32 4294901760, %v16498_v54 }
 0x395   : > { %v10141_v3 = vpack.c.bf16 %v5072_v24, %v5065_v30  ;;  %v16504_v24 = vld [vmem:[#allocation96_spill] sm:$0xff] }
 0x397   : > { %10114 = vmatpush3.bf16.msra.mxu1 %v16447_v31  ;;  %v16473_v31 = vand.u32 4294901760, %v16472_v48 }
 0x398   : > { %10116 = vmatprep.subr.bf16.mxu1 %v16448_v51 }
 0x399   : > { %v5183_v51 = vsub.f32 %v16472_v48, %v16473_v31  ;;  %v5198_v48 = vand.u32 4294901760, %v5197_v43  ;;  %v16490_v31 = vld [vmem:[#allocation83_spill] sm:$0xff] }
 0x39b   : > { %10118 = vmatpush3.bf16.msra.mxu1 %v16449_v41  ;;  %v16474_v41 = vld [vmem:[#allocation148_spill] sm:$0xff] }
 0x39c   : > { %10120 = vmatprep.subr.bf16.mxu1 %v16450_v11  ;;  %v10131_v11 = vpack.c.bf16 %v5156_v62, %v5149_v28  ;;  %v16480_v28 = vld [vmem:[#allocation73_spill] sm:$0xff] }
 0x39d   : > { %v16481_v62 = vand.u32 4294901760, %v16480_v28 }
 0x39f   : > { %10122 = vmatpush3.bf16.msra.mxu1 %v16459_v18  ;;  %v5177_v18 = vand.u32 4294901760, %v5176_v5  ;;  %v5190_v52 = vsub.f32 %v16480_v28, %v16481_v62  ;;  %v16502_v62 = vld [vmem:[#allocation95_spill] sm:$0xff] }
 0x3a0   : > { %10124 = vmatprep.subr.bf16.mxu1 %v16460_v39  ;;  %v5184_v39 = vand.u32 4294901760, %v5183_v51  ;;  %v16491_v51 = vand.u32 4294901760, %v16490_v31 }
 0x3a1   : > { %v5191_v5 = vand.u32 4294901760, %v5190_v52  ;;  %v16503_v52 = vand.u32 4294901760, %v16502_v62 }
 0x3a2   : > { %v10139_v37 = vpack.c.bf16 %v5184_v39, %v5177_v18  ;;  %v5099_v18 = vsub.f32 %v16498_v54, %v16499_v20  ;;  %v16500_v39 = vld [vmem:[#allocation93_spill] sm:$0xff] }
 0x3a3   : > { %10126 = vmatpush3.bf16.msra.mxu1 %v16465_v44  ;;  %v16485_v44 = vld [vmem:[#allocation75_spill] sm:$0xff]  ;;  %v5225_v53 = vsub.f32 %v16502_v62, %v16503_v52  ;;  %v10143_v8 = vpack.c.bf16 %v5198_v48, %v5191_v5  ;;  %v16518_v62 = vld [vmem:[#allocation116_spill] sm:$0xff] }
 0x3a4   : > { %10128 = vmatprep.subr.bf16.mxu1 %v16474_v41  ;;  %v16486_v47 = vand.u32 4294901760, %v16485_v44  ;;  %v5204_v41 = vsub.f32 %v16490_v31, %v16491_v51  ;;  %v16519_v52 = vand.u32 4294901760, %v16518_v62 }
 0x3a5   : > { %v5226_v31 = vand.u32 4294901760, %v5225_v53 }
 0x3a6   : > { %v5078_v57 = vsub.f32 %v16485_v44, %v16486_v47  ;;  %v5205_v43 = vand.u32 4294901760, %v5204_v41  ;;  %v16505_v44 = vand.u32 4294901760, %v16504_v24  ;;  %v16510_v41 = vld [vmem:[#allocation101_spill] sm:$0xff]  ;;  %v5253_v53 = vsub.f32 %v16518_v62, %v16519_v52 }
 0x3a7   : > { %10130 = vmatpush3.bf16.msra.mxu1 %v16479_v6  ;;  %v16497_v6 = vld [vmem:[#allocation9_spill] sm:$0xff] }
 0x3a8   : > { %10132 = vmatprep.subr.bf16.mxu1 %v10131_v11  ;;  %v16492_v11 = vld [vmem:[#allocation84_spill] sm:$0xff]  ;;  %v5079_v34 = vand.u32 4294901760, %v5078_v57  ;;  %v5106_v47 = vsub.f32 %v16504_v24, %v16505_v44  ;;  %v16506_v57 = vld [vmem:[#allocation97_spill] sm:$0xff] }
 0x3a9   : > { %v16493_v15 = vand.u32 4294901760, %v16492_v11  ;;  %v16507_v4 = vand.u32 4294901760, %v16506_v57 }
 0x3aa   : > { %5012 = vmatmul.mubr.f32.vlgmr.msra.gmra.mrb[6].mxu1 %v16484_v45  ;;  %v10145_v30 = vpack.c.bf16 %v5086_v16, %v5079_v34 }
 0x3ab   : > { %5021 = vmatprep.mubr.f32.mxu1 %v16489_v9  ;;  %10134 = vmatpush3.bf16.msra.mxu1 %v10133_v60  ;;  %v5211_v42 = vsub.f32 %v16492_v11, %v16493_v15  ;;  %v16496_v60 = vand.u32 4294901760, %v16495_v1  ;;  %v5113_v58 = vsub.f32 %v16506_v57, %v16507_v4  ;;  %v5100_v9 = vand.u32 4294901760, %v5099_v18 }
 0x3ac   : > { %10136 = vmatprep.subr.bf16.mxu1 %v10135_v59  ;;  %v16501_v59 = vand.u32 4294901760, %v16500_v39  ;;  %v16511_v11 = vand.u32 4294901760, %v16510_v41 }
 0x3ad   : > { %v5092_v12 = vsub.f32 %v16495_v1, %v16496_v60  ;;  %v5212_v45 = vand.u32 4294901760, %v5211_v42  ;;  %v5107_v42 = vand.u32 4294901760, %v5106_v47  ;;  %v16522_v47 = vld [vmem:[#allocation118_spill] sm:$0xff] }
 0x3ae   : > { %5027 = vmatmul.mubr.f32.gmra.mrb[8].mxu1 %v16494_v19  ;;  %v5218_v28 = vsub.f32 %v16500_v39, %v16501_v59  ;;  %v5239_v15 = vsub.f32 %v16510_v41, %v16511_v11  ;;  %v5114_v19 = vand.u32 4294901760, %v5113_v58  ;;  %v16516_v39 = vld [vmem:[#allocation115_spill] sm:$0xff]  ;;  %v16523_v57 = vand.u32 4294901760, %v16522_v47  ;;  %v16525_v41 = vld [vmem:[#allocation16_spill] sm:$0xff] }
 0x3af   : > { %10138 = vmatpush3.bf16.msra.mxu1 %v10137_v36  ;;  %5257 = vmatprep.mubr.f32.mxu1 %v16497_v6  ;;  %v5093_v50 = vand.u32 4294901760, %v5092_v12  ;;  %v10147_v51 = vpack.c.bf16 %v5212_v45, %v5205_v43  ;;  %v16514_v12 = vld [vmem:[#allocation107_spill] sm:$0xff]  ;;  %v16517_v59 = vand.u32 4294901760, %v16516_v39 }
 0x3b0   : > { %10140 = vmatprep.subr.bf16.mxu1 %v10139_v37  ;;  %v5219_v36 = vand.u32 4294901760, %v5218_v28  ;;  %v16508_v37 = vld [vmem:[#allocation100_spill] sm:$0xff]  ;;  %v16515_v6 = vand.u32 4294901760, %v16514_v12  ;;  %v5240_v18 = vand.u32 4294901760, %v5239_v15  ;;  %v5141_v4 = vsub.f32 %v16522_v47, %v16523_v57  ;;  %v16526_v11 = vld [vmem:[#allocation15_spill] sm:$0xff]  ;;  %v6541_v15 = vld [vmem:[%s15010_s7 + $0xe0] sm:$0xff] }
 0x3b1   : > { %v16509_v5 = vand.u32 4294901760, %v16508_v37  ;;  %v10149_v34 = vpack.c.bf16 %v5100_v9, %v5093_v50  ;;  %v5246_v28 = vsub.f32 %v16516_v39, %v16517_v59  ;;  %v5254_v9 = vand.u32 4294901760, %v5253_v53  ;;  %v6527_v59 = vld [vmem:[%s15010_s7 + $0x70] sm:$0xff] }
 0x3b2   : > { %v10151_v16 = vpack.c.bf16 %v5226_v31, %v5219_v36  ;;  %v5127_v54 = vsub.f32 %v16514_v12, %v16515_v6  ;;  %v6611_v62 = vand.u32 4294901760, %v6527_v59 }
 0x3b3   : > { %10142 = vmatpush3.bf16.msra.mxu1 %v10141_v3  ;;  %v5232_v48 = vsub.f32 %v16508_v37, %v16509_v5  ;;  %v16512_v3 = vld [vmem:[#allocation106_spill] sm:$0xff]  ;;  %v5247_v50 = vand.u32 4294901760, %v5246_v28  ;;  %v6528_v28 = vld [vmem:[%s15010_s7 + $0x78] sm:$0xff] }
 0x3b4   : > { %10144 = vmatprep.subr.bf16.mxu1 %v10143_v8  ;;  %v16513_v1 = vand.u32 4294901760, %v16512_v3  ;;  %v10153_v8 = vpack.c.bf16 %v5114_v19, %v5107_v42  ;;  %v5128_v45 = vand.u32 4294901760, %v5127_v54  ;;  %v6542_v42 = vld [vmem:[%s15010_s7 + $0xe8] sm:$0xff]  ;;  %v6653_v19 = vand.u32 4294901760, %v6541_v15  ;;  %v6543_v54 = vld [vmem:[%s15010_s7 + $0xf0] sm:$0xff] }
 0x3b5   : > { %v5233_v20 = vand.u32 4294901760, %v5232_v48  ;;  %v10159_v37 = vpack.c.bf16 %v5254_v9, %v5247_v50  ;;  %v16524_v48 = vld [vmem:[#allocation8_spill] sm:$0xff]  ;;  %v6614_v52 = vand.u32 4294901760, %v6528_v28 }
 0x3b6   : > { %v5120_v60 = vsub.f32 %v16512_v3, %v16513_v1  ;;  %v6526_v3 = vld [vmem:[%s15010_s7 + $0x68] sm:$0xff] }
 0x3b7   : > { %10146 = vmatpush3.bf16.msra.mxu1 %v10145_v30  ;;  %v16520_v30 = vld [vmem:[#allocation117_spill] sm:$0xff]  ;;  %v10155_v58 = vpack.c.bf16 %v5240_v18, %v5233_v20  ;;  %v6659_v18 = vand.u32 4294901760, %v6543_v54 }
 0x3b8   : > { %10148 = vmatprep.subr.bf16.mxu1 %v10147_v51  ;;  %v5121_v43 = vand.u32 4294901760, %v5120_v60  ;;  %v16521_v24 = vand.u32 4294901760, %v16520_v30  ;;  %v5142_v51 = vand.u32 4294901760, %v5141_v4  ;;  %v6608_v60 = vand.u32 4294901760, %v6526_v3  ;;  %v6544_v20 = vld [vmem:[%s15010_s7 + $0xf8] sm:$0xff] }
 0x3b9   : > { %v6662_v39 = vand.u32 4294901760, %v6544_v20  ;;  %v14153_v4 = vsub.f32 %v6541_v15, %v6653_v19  ;;  %v16540_v15 = vld [vmem:[#allocation172_spill] sm:$0xff] }
 0x3ba   : > { %v5134_v44 = vsub.f32 %v16520_v30, %v16521_v24  ;;  %v10157_v36 = vpack.c.bf16 %v5128_v45, %v5121_v43  ;;  %v15530_v43 = vand.u32 4294901760, %v13789_v55  ;;  %v15529_v45 = vand.u32 4294901760, %v13791_v0  ;;  %v16531_v24 = vld [vmem:[#allocation132_spill] sm:$0xff] }
 0x3bb   : > { %10150 = vmatpush3.bf16.msra.mxu1 %v10149_v34  ;;  %v6656_v34 = vand.u32 4294901760, %v6542_v42  ;;  %v14134_v53 = vpack.c.bf16 %v6662_v39, %v6659_v18  ;;  %v15526_v30 = vand.u32 4294901760, %v13793_v61  ;;  %16532 = vst [vmem:[#allocation46_spill] sm:$0xff] %v14153_v4  ;;  %v14159_v9 = vsub.f32 %v6526_v3, %v6608_v60  ;;  %v16542_v3 = vld [vmem:[#allocation17_spill] sm:$0xff] }
 0x3bc   : > { %10152 = vmatprep.subr.bf16.mxu1 %v10151_v16  ;;  %v5135_v31 = vand.u32 4294901760, %v5134_v44  ;;  %v6525_v16 = vld [vmem:[%s15010_s7 + $0x60] sm:$0xff]  ;;  %v15525_v44 = vand.u32 4294901760, %v16531_v24  ;;  %v6811_v47 = vsub.f32 %v13789_v55, %v15530_v43  ;;  %v6818_v57 = vsub.f32 %v13791_v0, %v15529_v45 }
 0x3bd   : > { %v6605_v1 = vand.u32 4294901760, %v6525_v16  ;;  %v14114_v12 = vpack.c.bf16 %v6656_v34, %v6653_v19  ;;  %16529 = vst [vmem:[#allocation45_spill] sm:$0xff] %v14134_v53  ;;  %16535 = vst [vmem:[#allocation49_spill] sm:$0xff] %v14159_v9  ;;  %v16541_v19 = vld [vmem:[#allocation171_spill] sm:$0xff]  ;;  %v16548_v45 = vld [vmem:[#allocation33_spill] sm:$0xff] }
 0x3be   : > { %v10161_v5 = vpack.c.bf16 %v5142_v51, %v5135_v31  ;;  %v14163_v31 = vsub.f32 %v6544_v20, %v6662_v39  ;;  %v14165_v51 = vsub.f32 %v6527_v59, %v6611_v62  ;;  %v15538_v43 = vand.u32 4294901760, %v16548_v45 }
 0x3bf   : > { %10154 = vmatpush3.bf16.msra.mxu1 %v10153_v8  ;;  %16527 = vst [vmem:[#allocation30_spill] sm:$0xff] %v14114_v12  ;;  %v14116_v6 = vpack.c.bf16 %v6608_v60, %v6605_v1  ;;  %10508 = vmatprep.subr.bf16.mxu0 %v14114_v12  ;;  %v14136_v8 = vpack.c.bf16 %v6614_v52, %v6611_v62 }
 0x3c0   : > { %10156 = vmatprep.subr.bf16.mxu1 %v10155_v58  ;;  %v14155_v58 = vsub.f32 %v6542_v42, %v6656_v34  ;;  %v14157_v50 = vsub.f32 %v6525_v16, %v6605_v1  ;;  %16537 = vst [vmem:[#allocation50_spill] sm:$0xff] %v14163_v31  ;;  %16538 = vst [vmem:[#allocation51_spill] sm:$0xff] %v14165_v51  ;;  %v15521_v42 = vand.u32 4294901760, %v16540_v15  ;;  %v15522_v34 = vand.u32 4294901760, %v16541_v19 }
 0x3c1   : > { %16528 = vst [vmem:[#allocation44_spill] sm:$0xff] %v14116_v6  ;;  %10510 = vmatpush3.bf16.msra.mxu0 %v14116_v6  ;;  %16530 = vst [vmem:[#allocation151_spill] sm:$0xff] %v14136_v8  ;;  %v15523_v16 = vand.u32 4294901760, %v13829_v63  ;;  %v15524_v1 = vand.u32 4294901760, %v16542_v3 }
 0x3c2   : > { %10512 = vmatprep.subr.bf16.mxu0 %v14134_v53  ;;  %16533 = vst [vmem:[#allocation47_spill] sm:$0xff] %v14155_v58  ;;  %16534 = vst [vmem:[#allocation48_spill] sm:$0xff] %v14157_v50  ;;  %v6832_v39 = vsub.f32 %v16541_v19, %v15522_v34 }
 0x3c3   : > { %10158 = vmatpush3.bf16.msra.mxu1 %v10157_v36  ;;  %v14161_v36 = vsub.f32 %v6543_v54, %v6659_v18  ;;  %v6825_v18 = vsub.f32 %v16540_v15, %v15521_v42  ;;  %v6713_v59 = vsub.f32 %v13829_v63, %v15523_v16 }
 0x3c4   : > { %10160 = vmatprep.subr.bf16.mxu1 %v10159_v37  ;;  %v14167_v37 = vsub.f32 %v6528_v28, %v6614_v52  ;;  %v6720_v28 = vsub.f32 %v16542_v3, %v15524_v1  ;;  %v16543_v52 = vld [vmem:[#allocation19_spill] sm:$0xff]  ;;  %v16545_v1 = vld [vmem:[#allocation29_spill] sm:$0xff] }
 0x3c5   : > { %10514 = vmatpush3.bf16.msra.mxu0 %v14136_v8  ;;  %16536 = vst [vmem:[#allocation153_spill] sm:$0xff] %v14161_v36 }
 0x3c6   : > { %16539 = vst [vmem:[#allocation52_spill] sm:$0xff] %v14167_v37  ;;  %v6721_v42 = vand.u32 4294901760, %v6720_v28 }
 0x3c7   : > { %10162 = vmatpush3.bf16.msra.mxu1 %v10161_v5  ;;  %v6812_v5 = vand.u32 4294901760, %v6811_v47  ;;  %v15527_v47 = vand.u32 4294901760, %v16543_v52 }
 0x3c8   : > { %10644 = vmatprep.subr.bf16.mxu1 %v13787_v56  ;;  %v14399_v56 = vld [vmem:[%s15010_s7 + $0x128] sm:$0xff] }
 0x3c9   : > { %v6839_v34 = vsub.f32 %v16543_v52, %v15527_v47  ;;  %v16547_v47 = vld [vmem:[#allocation32_spill] sm:$0xff]  ;;  %16561 = vst [vmem:[#allocation62_spill] sm:$0xff] %v14399_v56 }
 0x3ca   : > { %5259 = vmatmul.mubr.f32.vlgmr.msra.gmra.mrb[10].mxu1 %v16524_v48  ;;  %v6819_v48 = vand.u32 4294901760, %v6818_v57  ;;  %v16544_v57 = vld [vmem:[#allocation26_spill] sm:$0xff] }
 0x3cb   : > { %5264 = vmatprep.mubr.f32.mxu1 %v16525_v41  ;;  %10646 = vmatpush3.bf16.msra.mxu1 %v13804_v32  ;;  %v6699_v41 = vsub.f32 %v13793_v61, %v15526_v30 }
 0x3cc   : > { %10648 = vmatprep.subr.bf16.mxu1 %v13808_v22  ;;  %v10515_v60 = vpack.c.bf16 %v6819_v48, %v6812_v5  ;;  %v15528_v5 = vand.u32 4294901760, %v16544_v57  ;;  %v6826_v48 = vand.u32 4294901760, %v6825_v18  ;;  %v6840_v18 = vand.u32 4294901760, %v6839_v34 }
 0x3cd   : > { %v6700_v54 = vand.u32 4294901760, %v6699_v41  ;;  %v6833_v41 = vand.u32 4294901760, %v6832_v39 }
 0x3ce   : > { %5266 = vmatmul.mubr.f32.gmra.mrb[12].mxu1 %v16526_v11  ;;  %v6706_v11 = vsub.f32 %v16531_v24, %v15525_v44  ;;  %10516 = vmatprep.subr.bf16.mxu0 %v10515_v60  ;;  %v6846_v16 = vsub.f32 %v16544_v57, %v15528_v5  ;;  %v15534_v60 = vand.u32 4294901760, %v16545_v1  ;;  %v15535_v5 = vand.u32 4294901760, %v16547_v47 }
 0x3cf   : > { %10650 = vmatpush3.bf16.msra.mxu1 %v13839_v13  ;;  %v14203_v44 = vpack.c.bf16 %v6833_v41, %v6826_v48  ;;  %v15541_v48 = vand.u32 4294901760, %v13879_v40 }
 0x3d0   : > { %10652 = vmatprep.subr.bf16.mxu1 %v13841_v25  ;;  %v6707_v20 = vand.u32 4294901760, %v6706_v11  ;;  %v6714_v11 = vand.u32 4294901760, %v6713_v59  ;;  %v6847_v39 = vand.u32 4294901760, %v6846_v16  ;;  %v6727_v59 = vsub.f32 %v16545_v1, %v15534_v60 }
 0x3d1   : > { %v6853_v41 = vsub.f32 %v16547_v47, %v15535_v5  ;;  %v6748_v60 = vsub.f32 %v13879_v40, %v15541_v48  ;;  %v15563_v25 = vand.u32 4294901760, %v14161_v36 }
 0x3d2   : > { %v14191_v62 = vpack.c.bf16 %v6707_v20, %v6700_v54  ;;  %v16546_v54 = vld [vmem:[#allocation31_spill] sm:$0xff]  ;;  %v14205_v30 = vpack.c.bf16 %v6721_v42, %v6714_v11  ;;  %v14217_v42 = vpack.c.bf16 %v6847_v39, %v6840_v18  ;;  %v6728_v34 = vand.u32 4294901760, %v6727_v59 }
 0x3d3   : > { %10654 = vmatpush3.bf16.msra.mxu1 %v13877_v35  ;;  %v15533_v20 = vand.u32 4294901760, %v16546_v54  ;;  %v6860_v11 = vsub.f32 %v16548_v45, %v15538_v43  ;;  %v15545_v39 = vand.u32 4294901760, %v13881_v27  ;;  %v15544_v59 = vand.u32 4294901760, %v13885_v2 }
 0x3d4   : > { %10656 = vmatprep.subr.bf16.mxu1 %v13883_v29  ;;  %v15560_v29 = vand.u32 4294901760, %v14157_v50 }
 0x3d5   : > { %v6734_v28 = vsub.f32 %v16546_v54, %v15533_v20  ;;  %v6861_v5 = vand.u32 4294901760, %v6860_v11  ;;  %v6867_v43 = vsub.f32 %v13881_v27, %v15545_v39  ;;  %v15552_v39 = vand.u32 4294901760, %v13913_v21 }
 0x3d7   : > { %10658 = vmatpush3.bf16.msra.mxu1 %v13909_v46  ;;  %v6735_v16 = vand.u32 4294901760, %v6734_v28  ;;  %v6854_v28 = vand.u32 4294901760, %v6853_v41  ;;  %v6868_v41 = vand.u32 4294901760, %v6867_v43 }
 0x3d8   : > { %10660 = vmatprep.subr.bf16.mxu1 %v13919_v49  ;;  %v15553_v49 = vand.u32 4294901760, %v13921_v33 }
 0x3d9   : > { %v14231_v18 = vpack.c.bf16 %v6735_v16, %v6728_v34  ;;  %v16551_v34 = vld [vmem:[#allocation21_spill] sm:$0xff] }
 0x3da   : > { %v15547_v16 = vand.u32 4294901760, %v16551_v34 }
 0x3db   : > { %10662 = vmatpush3.bf16.msra.mxu1 %v13931_v7 }
 0x3dc   : > { %10664 = vmatprep.subr.bf16.mxu1 %v13937_v26  ;;  %v14243_v26 = vpack.c.bf16 %v6861_v5, %v6854_v28  ;;  %v15554_v5 = vand.u32 4294901760, %v13923_v14  ;;  %v6888_v28 = vsub.f32 %v13913_v21, %v15552_v39 }
 0x3df   : > { %10666 = vmatpush3.bf16.msra.mxu1 %v13941_v38  ;;  %v16550_v38 = vld [vmem:[#allocation133_spill] sm:$0xff] }
 0x3e0   : > { %10668 = vmatprep.subr.bf16.mxu1 %v14114_v12  ;;  %v6749_v12 = vand.u32 4294901760, %v6748_v60  ;;  %v15548_v48 = vand.u32 4294901760, %v16550_v38 }
 0x3e2   : > { %v6755_v60 = vsub.f32 %v16550_v38, %v15548_v48 }
 0x3e3   : > { %10670 = vmatpush3.bf16.msra.mxu1 %v14116_v6 }
 0x3e4   : > { %10672 = vmatprep.subr.bf16.mxu1 %v14134_v53 }
 0x3e7   : > { %10674 = vmatpush3.bf16.msra.mxu1 %v14136_v8  ;;  %v16549_v8 = vld [vmem:[#allocation80_spill] sm:$0xff] }
 0x3e8   : > { %v15539_v53 = vand.u32 4294901760, %v16549_v8 }
 0x3ea   : > { %v6741_v20 = vsub.f32 %v16549_v8, %v15539_v53  ;;  %v6874_v53 = vsub.f32 %v13885_v2, %v15544_v59  ;;  %v15549_v59 = vand.u32 4294901760, %v13911_v23 }
 0x3ec   : > { %v6742_v6 = vand.u32 4294901760, %v6741_v20  ;;  %v6875_v11 = vand.u32 4294901760, %v6874_v53  ;;  %v6762_v20 = vsub.f32 %v16551_v34, %v15547_v16  ;;  %v6881_v43 = vsub.f32 %v13911_v23, %v15549_v59 }
 0x3ed   : > { %v6769_v16 = vsub.f32 %v13921_v33, %v15553_v49  ;;  %v6889_v59 = vand.u32 4294901760, %v6888_v28 }
 0x3ee   : > { %v14245_v7 = vpack.c.bf16 %v6749_v12, %v6742_v6  ;;  %v14257_v12 = vpack.c.bf16 %v6875_v11, %v6868_v41  ;;  %v6756_v6 = vand.u32 4294901760, %v6755_v60  ;;  %v6763_v53 = vand.u32 4294901760, %v6762_v20 }
 0x3ef   : > { %v6776_v41 = vsub.f32 %v13923_v14, %v15554_v5  ;;  %v15555_v11 = vand.u32 4294901760, %v14153_v4  ;;  %v15558_v60 = vand.u32 4294901760, %v14155_v58  ;;  %v6882_v20 = vand.u32 4294901760, %v6881_v43 }
 0x3f0   : > { %v14268_v48 = vpack.c.bf16 %v6763_v53, %v6756_v6  ;;  %v6770_v46 = vand.u32 4294901760, %v6769_v16  ;;  %v15561_v53 = vand.u32 4294901760, %v14159_v9  ;;  %v6783_v43 = vsub.f32 %v14157_v50, %v15560_v29 }
 0x3f1   : > { %v6777_v39 = vand.u32 4294901760, %v6776_v41  ;;  %v6895_v49 = vsub.f32 %v14153_v4, %v15555_v11  ;;  %v6902_v6 = vsub.f32 %v14155_v58, %v15558_v60  ;;  %v14283_v5 = vpack.c.bf16 %v6889_v59, %v6882_v20 }
 0x3f2   : > { %v6790_v11 = vsub.f32 %v14159_v9, %v15561_v53  ;;  %v6784_v35 = vand.u32 4294901760, %v6783_v43  ;;  %v15564_v60 = vand.u32 4294901760, %v14163_v31  ;;  %v15565_v59 = vand.u32 4294901760, %v14165_v51 }
 0x3f3   : > { %v14288_v16 = vpack.c.bf16 %v6777_v39, %v6770_v46  ;;  %v6896_v28 = vand.u32 4294901760, %v6895_v49  ;;  %v6903_v41 = vand.u32 4294901760, %v6902_v6  ;;  %v15566_v29 = vand.u32 4294901760, %v14167_v37 }
 0x3f4   : > { %v6791_v13 = vand.u32 4294901760, %v6790_v11  ;;  %v6909_v49 = vsub.f32 %v14161_v36, %v15563_v25  ;;  %v6916_v46 = vsub.f32 %v14163_v31, %v15564_v60  ;;  %v6797_v39 = vsub.f32 %v14165_v51, %v15565_v59 }
 0x3f5   : > { %v14296_v20 = vpack.c.bf16 %v6903_v41, %v6896_v28  ;;  %v6804_v11 = vsub.f32 %v14167_v37, %v15566_v29  ;;  %v15595_v36 = vand.u32 4294901760, %v14399_v56 }
 0x3f6   : > { %v14308_v6 = vpack.c.bf16 %v6791_v13, %v6784_v35  ;;  %v6910_v43 = vand.u32 4294901760, %v6909_v49  ;;  %v6917_v28 = vand.u32 4294901760, %v6916_v46  ;;  %v6798_v41 = vand.u32 4294901760, %v6797_v39  ;;  %v16555_v46 = vld [vmem:[#allocation167_spill] sm:$0xff] }
 0x3f7   : > { %v6805_v53 = vand.u32 4294901760, %v6804_v11  ;;  %v14336_v11 = vld [vmem:[%s15010_s7 + $0x100] sm:$0xff]  ;;  %v16556_v13 = vsub.s32 0, %v16555_v46  ;;  %v16557_v29 = vsub.s32 1, %v16555_v46 }
 0x3f8   : > { %v14313_v22 = vpack.c.bf16 %v6917_v28, %v6910_v43  ;;  %16552 = vst [vmem:[#allocation53_spill] sm:$0xff] %v14336_v11  ;;  %v14341_v43 = vld [vmem:[%s15010_s7 + $0x108] sm:$0xff]  ;;  %v15568_v28 = vand.u32 4294901760, %v14336_v11 }
 0x3f9   : > { %v14315_v25 = vpack.c.bf16 %v6805_v53, %v6798_v41  ;;  %16553 = vst [vmem:[#allocation54_spill] sm:$0xff] %v14341_v43  ;;  %v15567_v41 = vand.u32 4294901760, %v14341_v43  ;;  %v14371_v53 = vld [vmem:[%s15009_s6] sm:$0x7] }
 0x3fa   : > { %v2643_v49 = vrot.slane %v14371_v53, %v16556_v13  ;;  %v2647_v59 = vrot.slane %v14371_v53, %v16557_v29  ;;  %v14394_v29 = vld [vmem:[%s15010_s7 + $0x120] sm:$0xff] }
 0x3fb   : > { %v14351_v39 = vpack.c.bf16 %v15567_v41, %v15568_v28  ;;  %v14382_v41 = vld [vmem:[%s15010_s7 + $0x110] sm:$0xff]  ;;  %v14387_v28 = vld [vmem:[%s15010_s7 + $0x118] sm:$0xff]  ;;  %16560 = vst [vmem:[#allocation61_spill] sm:$0xff] %v14394_v29  ;;  %v15596_v17 = vand.u32 4294901760, %v14394_v29 }
 0x3fc   : > { %16558 = vst [vmem:[#allocation58_spill] sm:$0xff] %v14382_v41  ;;  %16559 = vst [vmem:[#allocation59_spill] sm:$0xff] %v14387_v28  ;;  %v16563_v9 = vand.u32 4294901760, %v14382_v41 }
 0x3fd   : > { %16554 = vst [vmem:[#allocation55_spill] sm:$0xff] %v14351_v39  ;;  %10676 = vmatprep.subr.bf16.mxu1 %v14351_v39 }
 0x45d   : > { %v4893_v35 = vpop.f32.mrb[2].mxu1 }
 0x45e   : > { %v10869_v60 = vadd.f32 %v4893_v35, %v2643_v49  ;;  %v4895_v43 = vpop.f32.mrb[3].mxu1 }
 0x45f   : > { %v10870_v11 = vadd.f32 %v4895_v43, %v2647_v59 }
 0x460   : > { %v6507_v32 = vmax.f32 %v10869_v60, 0.0 }
 0x461   : > { %v6508_v10 = vmax.f32 %v10870_v11, 0.0  ;;  %v4900_v51 = vpop.f32.mrb[4].mxu1  ;;  %v16564_v11 = vand.u32 4294901760, %v14387_v28 }
 0x462   : > { %v14401_v35 = vand.u32 4294901760, %v6507_v32  ;;  %v10871_v43 = vadd.f32 %v4900_v51, %v2643_v49  ;;  %v4902_v60 = vpop.f32.mrb[5].mxu1 }
 0x463   : > { %v14403_v37 = vand.u32 4294901760, %v6508_v10  ;;  %v10872_v13 = vadd.f32 %v4902_v60, %v2647_v59  ;;  %v14414_v4 = vpack.c.bf16 %v16564_v11, %v16563_v9  ;;  %v14423_v59 = vld [vmem:[%s15010_s7 + $0x130] sm:$0xff]  ;;  %v14442_v60 = vpack.c.bf16 %v15595_v36, %v15596_v17 }
 0x464   : > { %v14408_v31 = vsub.f32 %v6507_v32, %v14401_v35  ;;  %v6510_v50 = vmax.f32 %v10871_v43, 0.0  ;;  %v14428_v32 = vld [vmem:[%s15010_s7 + $0x138] sm:$0xff]  ;;  %v16569_v29 = vand.u32 4294901760, %v14423_v59 }
 0x465   : > { %16565 = vst [vmem:[#allocation69_spill] sm:$0xff] %v14414_v4  ;;  %v14417_v51 = vsub.f32 %v6508_v10, %v14403_v37  ;;  %v6511_v49 = vmax.f32 %v10872_v13, 0.0  ;;  %7472 = vmatprep.mubr.f32.mxu1 %v14403_v37  ;;  %16566 = vst [vmem:[#allocation71_spill] sm:$0xff] %v14428_v32 }
 0x466   : > { %16562 = vst [vmem:[#allocation67_spill] sm:$0xff] %v14408_v31  ;;  %v15597_v43 = vand.u32 4294901760, %v14408_v31  ;;  %v14431_v9 = vand.u32 4294901760, %v6510_v50  ;;  %7474 = vmatmul.mubr.f32.vlgmr.msra.gmra.mrb[14].mxu1 %v14401_v35  ;;  %16567 = vst [vmem:[#allocation72_spill] sm:$0xff] %v14442_v60 }
 0x467   : > { %v14434_v10 = vand.u32 4294901760, %v6511_v49  ;;  %10678 = vmatpush3.bf16.msra.mxu1 %v14351_v39  ;;  %v16568_v36 = vand.u32 4294901760, %v14417_v51 }
 0x468   : > { %v6673_v11 = vsub.f32 %v14408_v31, %v15597_v43  ;;  %v14448_v28 = vsub.f32 %v6510_v50, %v14431_v9  ;;  %10680 = vmatprep.subr.bf16.mxu1 %v14414_v4  ;;  %v14465_v43 = vld [vmem:[%s15010_s7 + $0x140] sm:$0xff]  ;;  %v16570_v31 = vand.u32 4294901760, %v14428_v32 }
 0x469   : > { %v14454_v39 = vsub.f32 %v6511_v49, %v14434_v10  ;;  %7479 = vmatprep.mubr.f32.mxu1 %v14434_v10  ;;  %v6667_v17 = vsub.f32 %v14417_v51, %v16568_v36  ;;  %v14470_v49 = vld [vmem:[%s15010_s7 + $0x148] sm:$0xff] }
 0x46a   : > { %7481 = vmatmul.mubr.f32.gmra.mrb[16].mxu1 %v14431_v9  ;;  %v15608_v50 = vand.u32 4294901760, %v14448_v28  ;;  %v6674_v36 = vand.u32 4294901760, %v6673_v11  ;;  %v14482_v58 = vpack.c.bf16 %v16570_v31, %v16569_v29  ;;  %v15614_v11 = vand.u32 4294901760, %v14470_v49  ;;  %v14497_v31 = vld [vmem:[%s15010_s7 + $0x158] sm:$0xff] }
 0x46b   : > { %v6668_v13 = vand.u32 4294901760, %v6667_v17  ;;  %v15609_v41 = vand.u32 4294901760, %v14454_v39  ;;  %10682 = vmatpush3.bf16.msra.mxu1 %v14414_v4  ;;  %v15617_v4 = vand.u32 4294901760, %v14465_v43  ;;  %v15612_v32 = vand.u32 4294901760, %v14497_v31 }
 0x46c   : > { %v6688_v56 = vsub.f32 %v14448_v28, %v15608_v50  ;;  %10684 = vmatprep.subr.bf16.mxu1 %v14442_v60  ;;  %16571 = vst [vmem:[#allocation78_spill] sm:$0xff] %v14482_v58  ;;  %v14492_v50 = vld [vmem:[%s15010_s7 + $0x150] sm:$0xff] }
 0x46d   : > { %6669 = vmatprep.mubr.f32.mxu0 %v6668_v13  ;;  %v6682_v17 = vsub.f32 %v14454_v39, %v15609_v41  ;;  %v15613_v41 = vand.u32 4294901760, %v14492_v50 }
 0x46e   : > { %6675 = vmatmul.mubr.f32.vlgmr.msra.gmra.mrb[24].mxu0 %v6674_v36  ;;  %v6689_v13 = vand.u32 4294901760, %v6688_v56  ;;  %v14507_v36 = vpack.c.bf16 %v15614_v11, %v15617_v4  ;;  %v14519_v56 = vld [vmem:[%s15010_s7 + $0x168] sm:$0xff] }
 0x46f   : > { %10518 = vmatpush3.bf16.msra.mxu0 %v14191_v62  ;;  %v6683_v29 = vand.u32 4294901760, %v6682_v17  ;;  %10686 = vmatpush3.bf16.msra.mxu1 %v14442_v60  ;;  %v14514_v62 = vld [vmem:[%s15010_s7 + $0x160] sm:$0xff] }
 0x470   : > { %10520 = vmatprep.subr.bf16.mxu0 %v14203_v44  ;;  %10688 = vmatprep.subr.bf16.mxu1 %v14482_v58  ;;  %16572 = vst [vmem:[#allocation79_spill] sm:$0xff] %v14507_v36  ;;  %v14530_v44 = vpack.c.bf16 %v15612_v32, %v15613_v41  ;;  %v15616_v17 = vand.u32 4294901760, %v14514_v62 }
 0x471   : > { %6684 = vmatprep.mubr.f32.mxu0 %v6683_v29  ;;  %v15615_v29 = vand.u32 4294901760, %v14519_v56 }
 0x472   : > { %6690 = vmatmul.mubr.f32.gmra.mrb[26].mxu0 %v6689_v13  ;;  %16573 = vst [vmem:[#allocation81_spill] sm:$0xff] %v14530_v44 }
 0x473   : > { %10522 = vmatpush3.bf16.msra.mxu0 %v14205_v30  ;;  %6920 = vmatprep.mubr.f32.mxu0 %v14403_v37  ;;  %v14537_v30 = vld [vmem:[%s15010_s7 + $0x170] sm:$0xff]  ;;  %v14552_v13 = vpack.c.bf16 %v15615_v29, %v15616_v17 }
 0x474   : > { %10524 = vmatprep.subr.bf16.mxu0 %v14217_v42  ;;  %10690 = vmatpush3.bf16.msra.mxu1 %v14482_v58  ;;  %16574 = vst [vmem:[#allocation82_spill] sm:$0xff] %v14537_v30  ;;  %v14542_v42 = vld [vmem:[%s15010_s7 + $0x178] sm:$0xff]  ;;  %v15619_v32 = vand.u32 4294901760, %v14537_v30 }
 0x475   : > { %10692 = vmatprep.subr.bf16.mxu1 %v14507_v36  ;;  %16575 = vst [vmem:[#allocation88_spill] sm:$0xff] %v14542_v42  ;;  %16576 = vst [vmem:[#allocation89_spill] sm:$0xff] %v14552_v13  ;;  %v15618_v41 = vand.u32 4294901760, %v14542_v42  ;;  %v16613_v42 = vld [vmem:[#allocation67_spill] sm:$0xff] }
 0x477   : > { %10526 = vmatpush3.bf16.msra.mxu0 %v14231_v18  ;;  %v16577_v18 = vsub.s32 2, %v16555_v46  ;;  %v14567_v29 = vpack.c.bf16 %v15618_v41, %v15619_v32  ;;  %v16596_v32 = vld [vmem:[#allocation159_spill] sm:$0xff] }
 0x478   : > { %10528 = vmatprep.subr.bf16.mxu0 %v14243_v26  ;;  %10694 = vmatpush3.bf16.msra.mxu1 %v14507_v36  ;;  %v16605_v36 = vld [vmem:[#allocation158_spill] sm:$0xff] }
 0x479   : > { %10696 = vmatprep.subr.bf16.mxu1 %v14530_v44  ;;  %v2651_v11 = vrot.slane %v14371_v53, %v16577_v18  ;;  %16578 = vst [vmem:[#allocation91_spill] sm:$0xff] %v14567_v29 }
 0x47b   : > { %10530 = vmatpush3.bf16.msra.mxu0 %v14245_v7 }
 0x47c   : > { %10532 = vmatprep.subr.bf16.mxu0 %v14257_v12  ;;  %10698 = vmatpush3.bf16.msra.mxu1 %v14530_v44 }
 0x47d   : > { %v8343_v26 = vpop.f32.mrb[6].mxu1  ;;  %10700 = vmatprep.subr.bf16.mxu1 %v14552_v13 }
 0x47e   : > { %v8344_v17 = vpop.f32.mrb[7].mxu1 }
 0x47f   : > { %v8345_v4 = vadd.f32 %v8344_v17, %v8343_v26  ;;  %10534 = vmatpush3.bf16.msra.mxu0 %v14268_v48  ;;  %v16580_v48 = vpack.c.bf16 %v16531_v24, %v13793_v61 }
 0x480   : > { %10536 = vmatprep.subr.bf16.mxu0 %v14283_v5  ;;  %10702 = vmatpush3.bf16.msra.mxu1 %v14552_v13  ;;  %v16581_v5 = vpack.c.bf16 %v16541_v19, %v16540_v15  ;;  %v16599_v13 = vld [vmem:[#allocation48_spill] sm:$0xff] }
 0x481   : > { %v5014_v7 = vadd.f32 %v8345_v4, %v2651_v11  ;;  %v8346_v12 = vpop.f32.mrb[8].mxu1  ;;  %10704 = vmatprep.subr.bf16.mxu1 %v14567_v29  ;;  %v16579_v4 = vpack.c.bf16 %v13791_v0, %v13789_v55 }
 0x482   : > { %v8347_v46 = vpop.f32.mrb[9].mxu1 }
 0x483   : > { %v8348_v53 = vadd.f32 %v8347_v46, %v8346_v12  ;;  %10538 = vmatpush3.bf16.msra.mxu0 %v14288_v16  ;;  %v16584_v16 = vpack.c.bf16 %v16546_v54, %v16545_v1  ;;  %v16588_v46 = vpack.c.bf16 %v16551_v34, %v16550_v38 }
 0x484   : > { %10540 = vmatprep.subr.bf16.mxu0 %v14296_v20  ;;  %10706 = vmatpush3.bf16.msra.mxu1 %v14567_v29  ;;  %v16585_v20 = vpack.c.bf16 %v16548_v45, %v16547_v47 }
 0x485   : > { %v5029_v18 = vadd.f32 %v8348_v53, %v2651_v11  ;;  %v16587_v11 = vpack.c.bf16 %v13885_v2, %v13881_v27  ;;  %v16589_v53 = vpack.c.bf16 %v13913_v21, %v13911_v23 }
 0x487   : > { %10542 = vmatpush3.bf16.msra.mxu0 %v14308_v6  ;;  %v16586_v6 = vpack.c.bf16 %v13879_v40, %v16549_v8 }
 0x488   : > { %10544 = vmatprep.subr.bf16.mxu0 %v14313_v22  ;;  %v16582_v22 = vpack.c.bf16 %v16542_v3, %v13829_v63 }
 0x48b   : > { %10546 = vmatpush3.bf16.msra.mxu0 %v14315_v25  ;;  %v16583_v25 = vpack.c.bf16 %v16544_v57, %v16543_v52 }
 0x48c   : > { %10548 = vmatprep.subr.bf16.mxu0 %v16579_v4 }
 0x48e   : > { %6922 = vmatmul.mubr.f32.vlgmr.msra.gmra.mrb[28].mxu0 %v14401_v35 }
 0x48f   : > { %6927 = vmatprep.mubr.f32.mxu0 %v14434_v10  ;;  %10550 = vmatpush3.bf16.msra.mxu0 %v16580_v48 }
 0x490   : > { %10552 = vmatprep.subr.bf16.mxu0 %v16581_v5 }
 0x492   : > { %6929 = vmatmul.mubr.f32.gmra.mrb[30].mxu0 %v14431_v9 }
 0x493   : > { %10554 = vmatpush3.bf16.msra.mxu0 %v16582_v22  ;;  %7064 = vmatprep.mubr.f32.mxu0 %v14417_v51  ;;  %v16590_v22 = vld [vmem:[#allocation155_spill] sm:$0xff] }
 0x494   : > { %10556 = vmatprep.subr.bf16.mxu0 %v16583_v25 }
 0x497   : > { %10558 = vmatpush3.bf16.msra.mxu0 %v16584_v16 }
 0x498   : > { %10560 = vmatprep.subr.bf16.mxu0 %v16585_v20  ;;  %v16591_v20 = vpack.c.bf16 %v13923_v14, %v13921_v33 }
 0x49b   : > { %10562 = vmatpush3.bf16.msra.mxu0 %v16586_v6  ;;  %v16592_v6 = vld [vmem:[#allocation47_spill] sm:$0xff] }
 0x49c   : > { %10564 = vmatprep.subr.bf16.mxu0 %v16587_v11  ;;  %v16593_v11 = vld [vmem:[#allocation46_spill] sm:$0xff] }
 0x49d   : > { %v8381_v17 = vpop.f32.mrb[10].mxu1 }
 0x49e   : > { %v8382_v26 = vpop.f32.mrb[11].mxu1 }
 0x49f   : > { %v8383_v12 = vadd.f32 %v8382_v26, %v8381_v17  ;;  %10566 = vmatpush3.bf16.msra.mxu0 %v16588_v46  ;;  %v16594_v17 = vpack.c.bf16 %v16592_v6, %v16593_v11  ;;  %v16595_v26 = vld [vmem:[#allocation157_spill] sm:$0xff] }
 0x4a0   : > { %10568 = vmatprep.subr.bf16.mxu0 %v16589_v53  ;;  %v16597_v53 = vld [vmem:[#allocation156_spill] sm:$0xff] }
 0x4a1   : > { %v5261_v4 = vadd.f32 %v8383_v12, %v5014_v7  ;;  %v8384_v48 = vpop.f32.mrb[12].mxu1  ;;  %v16598_v12 = vld [vmem:[#allocation49_spill] sm:$0xff] }
 0x4a2   : > { %v8385_v5 = vpop.f32.mrb[13].mxu1  ;;  %v16600_v44 = vpack.c.bf16 %v16598_v12, %v16599_v13 }
 0x4a3   : > { %v5406_v25 = vadd.f32 %v16590_v22, %v5261_v4  ;;  %v8386_v16 = vadd.f32 %v8385_v5, %v8384_v48  ;;  %10570 = vmatpush3.bf16.msra.mxu0 %v16591_v20  ;;  %v16601_v4 = vld [vmem:[#allocation50_spill] sm:$0xff]  ;;  %v16602_v48 = vld [vmem:[#allocation153_spill] sm:$0xff] }
 0x4a4   : > { %10572 = vmatprep.subr.bf16.mxu0 %v16594_v17  ;;  %v16603_v5 = vpack.c.bf16 %v16601_v4, %v16602_v48  ;;  %v16604_v22 = vld [vmem:[#allocation161_spill] sm:$0xff]  ;;  %v16606_v17 = vld [vmem:[#allocation160_spill] sm:$0xff] }
 0x4a5   : > { %v5523_v46 = vadd.f32 %v16595_v26, %v5406_v25  ;;  %v5268_v41 = vadd.f32 %v8386_v16, %v5029_v18  ;;  %v16607_v25 = vld [vmem:[#allocation52_spill] sm:$0xff]  ;;  %v16608_v18 = vld [vmem:[#allocation51_spill] sm:$0xff]  ;;  %v16611_v26 = vld [vmem:[#allocation130_spill] sm:$0xff] }
 0x4a6   : > { %v16609_v16 = vpack.c.bf16 %v16607_v25, %v16608_v18 }
 0x4a7   : > { %v5702_v29 = vadd.f32 %v16596_v32, %v5523_v46  ;;  %v5415_v7 = vadd.f32 %v16597_v53, %v5268_v41  ;;  %10574 = vmatpush3.bf16.msra.mxu0 %v16600_v44  ;;  %v16610_v32 = vld [vmem:[#allocation28_spill] sm:$0xff]  ;;  %v16612_v46 = vld [vmem:[#allocation162_spill] sm:$0xff] }
 0x4a8   : > { %10576 = vmatprep.subr.bf16.mxu0 %v16603_v5  ;;  %v16614_v5 = vld [vmem:[#allocation149_spill] sm:$0xff] }
 0x4a9   : > { %v5813_v20 = vadd.f32 %v16604_v22, %v5702_v29  ;;  %v5534_v58 = vadd.f32 %v16605_v36, %v5415_v7  ;;  %v16615_v36 = vld [vmem:[#allocation134_spill] sm:$0xff] }
 0x4aa   : > { %v16616_v29 = vld [vmem:[#allocation14_spill] sm:$0xff] }
 0x4ab   : > { %v5709_v60 = vadd.f32 %v16606_v17, %v5534_v58  ;;  %10578 = vmatpush3.bf16.msra.mxu0 %v16609_v16  ;;  %v10874_v41 = vadd.f32 %v16610_v32, %v5813_v20  ;;  %v16617_v20 = vld [vmem:[#allocation20_spill] sm:$0xff]  ;;  %v16618_v17 = vand.u32 4294901760, %v14417_v51  ;;  %v16619_v32 = vld [vmem:[#allocation22_spill] sm:$0xff] }
 0x4ac   : > { %10580 = vmatprep.subr.bf16.mxu0 %v16611_v26  ;;  %v16620_v26 = vld [vmem:[#allocation112_spill] sm:$0xff] }
 0x4ad   : > { %v5820_v44 = vadd.f32 %v16612_v46, %v5709_v60  ;;  %v6509_v53 = vmax.f32 %v10874_v41, 0.0 }
 0x4ae   : > { %7067 = vmatmul.mubr.f32.vlgmr.msra.gmra.mrb[32].mxu0 %v16613_v42 }
 0x4af   : > { %v10873_v30 = vadd.f32 %v16614_v5, %v5820_v44  ;;  %7073 = vmatprep.mubr.f32.mxu0 %v14454_v39  ;;  %10582 = vmatpush3.bf16.msra.mxu0 %v16615_v36  ;;  %v14645_v58 = vand.u32 4294901760, %v6509_v53  ;;  %v16622_v5 = vld [vmem:[#allocation146_spill] sm:$0xff] }
 0x4b0   : > { %10584 = vmatprep.subr.bf16.mxu0 %v16616_v29  ;;  %v16623_v29 = vld [vmem:[#allocation23_spill] sm:$0xff] }
 0x4b1   : > { %v6512_v7 = vmax.f32 %v10873_v30, 0.0  ;;  %v14649_v22 = vsub.f32 %v6509_v53, %v14645_v58  ;;  %v16621_v53 = vld [vmem:[#allocation120_spill] sm:$0xff] }
 0x4b2   : > { %7076 = vmatmul.mubr.f32.gmra.mrb[34].mxu0 %v14448_v28 }
 0x4b3   : > { %v14652_v60 = vand.u32 4294901760, %v6512_v7  ;;  %10586 = vmatpush3.bf16.msra.mxu0 %v16617_v20  ;;  %7180 = vmatprep.mubr.f32.mxu0 %v16618_v17  ;;  %v7569_v16 = vand.u32 4294901760, %v14649_v22  ;;  %v16625_v20 = vld [vmem:[#allocation25_spill] sm:$0xff]  ;;  %v16626_v17 = vld [vmem:[#allocation27_spill] sm:$0xff] }
 0x4b4   : > { %10588 = vmatprep.subr.bf16.mxu0 %v16619_v32  ;;  %v16627_v32 = vld [vmem:[#allocation30_spill] sm:$0xff] }
 0x4b5   : > { %v14660_v41 = vsub.f32 %v6512_v7, %v14652_v60  ;;  %v7570_v30 = vsub.f32 %v14649_v22, %v7569_v16  ;;  %v16624_v7 = vld [vmem:[#allocation24_spill] sm:$0xff] }
 0x4b7   : > { %10590 = vmatpush3.bf16.msra.mxu0 %v16620_v26  ;;  %v7571_v46 = vand.u32 4294901760, %v7570_v30  ;;  %v7579_v44 = vand.u32 4294901760, %v14660_v41  ;;  %v16628_v30 = vld [vmem:[#allocation44_spill] sm:$0xff]  ;;  %v16629_v26 = vld [vmem:[#allocation45_spill] sm:$0xff] }
 0x4b8   : > { %10592 = vmatprep.subr.bf16.mxu0 %v16621_v53  ;;  %v16631_v53 = vand.u32 4294901760, %v13791_v0  ;;  %v16639_v0 = vand.u32 4294901760, %v13829_v63 }
 0x4b9   : > { %9297 = vmatprep.mubr.f32.mxu1 %v7571_v46  ;;  %v7580_v51 = vsub.f32 %v14660_v41, %v7579_v44  ;;  %v16630_v46 = vand.u32 4294901760, %v13789_v55  ;;  %v16638_v55 = vand.u32 4294901760, %v14454_v39  ;;  %v16644_v39 = vand.u32 4294901760, %v16545_v1  ;;  %v16652_v1 = vld [vmem:[#allocation54_spill] sm:$0xff] }
 0x4bb   : > { %10594 = vmatpush3.bf16.msra.mxu0 %v16622_v5  ;;  %v7581_v36 = vand.u32 4294901760, %v7580_v51  ;;  %v10611_v51 = vpack.c.bf16 %v16631_v53, %v16630_v46  ;;  %v16632_v5 = vld [vmem:[#allocation151_spill] sm:$0xff]  ;;  %v16647_v53 = vand.u32 4294901760, %v16548_v45  ;;  %v16654_v45 = vand.u32 4294901760, %v13881_v27  ;;  %v16660_v27 = vld [vmem:[#allocation58_spill] sm:$0xff] }
 0x4bc   : > { %10596 = vmatprep.subr.bf16.mxu0 %v16623_v29  ;;  %v16634_v29 = vand.u32 4294901760, %v16531_v24  ;;  %v16641_v24 = vand.u32 4294901760, %v16543_v52 }
 0x4bd   : > { %9298 = vmatmul.mubr.f32.vlgmr.msra.gmra.mrb[18].mxu1 %v7581_v36  ;;  %v16633_v36 = vand.u32 4294901760, %v13793_v61  ;;  %v16640_v61 = vand.u32 4294901760, %v16542_v3  ;;  %v16646_v3 = vand.u32 4294901760, %v16547_v47  ;;  %v16655_v47 = vand.u32 4294901760, %v13885_v2 }
 0x4bf   : > { %10598 = vmatpush3.bf16.msra.mxu0 %v16624_v7  ;;  %v10613_v7 = vpack.c.bf16 %v16634_v29, %v16633_v36  ;;  %v10623_v52 = vpack.c.bf16 %v16647_v53, %v16646_v3 }
 0x4c0   : > { %10600 = vmatprep.subr.bf16.mxu0 %v16625_v20  ;;  %v16635_v20 = vand.u32 4294901760, %v16540_v15  ;;  %v16642_v15 = vand.u32 4294901760, %v16544_v57  ;;  %v16648_v57 = vand.u32 4294901760, %v16549_v8  ;;  %v16657_v8 = vand.u32 4294901760, %v16551_v34 }
 0x4c2   : > { %v10619_v46 = vpack.c.bf16 %v16642_v15, %v16641_v24  ;;  %v16664_v24 = vand.u32 4294901760, %v13921_v33  ;;  %v16665_v15 = vand.u32 4294901760, %v13923_v14  ;;  %v16668_v14 = vld [vmem:[#allocation61_spill] sm:$0xff] }
 0x4c3   : > { %10602 = vmatpush3.bf16.msra.mxu0 %v16626_v17  ;;  %v16636_v17 = vand.u32 4294901760, %v16541_v19  ;;  %v16643_v19 = vand.u32 4294901760, %v14448_v28  ;;  %v16649_v28 = vand.u32 4294901760, %v13879_v40  ;;  %v16656_v40 = vand.u32 4294901760, %v16550_v38 }
 0x4c4   : > { %10604 = vmatprep.subr.bf16.mxu0 %v16627_v32  ;;  %v16669_v3 = vand.u32 4294901760, %v16668_v14 }
 0x4c5   : > { %v10615_v32 = vpack.c.bf16 %v16636_v17, %v16635_v20  ;;  %v10629_v20 = vpack.c.bf16 %v16657_v8, %v16656_v40 }
 0x4c7   : > { %10606 = vmatpush3.bf16.msra.mxu0 %v16628_v30  ;;  %v16637_v30 = vand.u32 4294901760, %v16613_v42  ;;  %v16645_v42 = vand.u32 4294901760, %v16546_v54  ;;  %v16653_v54 = vand.u32 4294901760, %v16652_v1 }
 0x4c8   : > { %10608 = vmatprep.subr.bf16.mxu0 %v16629_v26  ;;  %v10617_v26 = vpack.c.bf16 %v16640_v61, %v16639_v0  ;;  %v16661_v61 = vand.u32 4294901760, %v16660_v27 }
 0x4c9   : > { %v10621_v63 = vpack.c.bf16 %v16645_v42, %v16644_v39  ;;  %v14727_v29 = vsub.f32 %v16652_v1, %v16653_v54  ;;  %v16675_v1 = vand.u32 4294901760, %v16599_v13  ;;  %v16676_v54 = vand.u32 4294901760, %v16598_v12 }
 0x4ca   : > { %v14746_v2 = vsub.f32 %v16660_v27, %v16661_v61 }
 0x4cb   : > { %10610 = vmatpush3.bf16.msra.mxu0 %v16632_v5  ;;  %v16650_v5 = vld [vmem:[#allocation53_spill] sm:$0xff] }
 0x4cc   : > { %10612 = vmatprep.subr.bf16.mxu0 %v10611_v51  ;;  %v10625_v51 = vpack.c.bf16 %v16649_v28, %v16648_v57  ;;  %v16651_v36 = vand.u32 4294901760, %v16650_v5  ;;  %v16672_v57 = vand.u32 4294901760, %v14423_v59 }
 0x4ce   : > { %7184 = vmatmul.mubr.f32.vlgmr.msra.gmra.mrb[36].mxu0 %v16637_v30  ;;  %v16658_v30 = vand.u32 4294901760, %v13911_v23  ;;  %v16666_v23 = vand.u32 4294901760, %v16593_v11  ;;  %v14772_v11 = vsub.f32 %v16668_v14, %v16669_v3  ;;  %v14782_v28 = vsub.f32 %v14423_v59, %v16672_v57 }
 0x4cf   : > { %7191 = vmatprep.mubr.f32.mxu0 %v16638_v55  ;;  %10614 = vmatpush3.bf16.msra.mxu0 %v10613_v7  ;;  %v10627_v7 = vpack.c.bf16 %v16655_v47, %v16654_v45  ;;  %v16659_v55 = vand.u32 4294901760, %v13913_v21  ;;  %v16667_v21 = vand.u32 4294901760, %v16592_v6  ;;  %v16670_v6 = vld [vmem:[#allocation62_spill] sm:$0xff]  ;;  %v10637_v45 = vpack.c.bf16 %v16676_v54, %v16675_v1 }
 0x4d0   : > { %10616 = vmatprep.subr.bf16.mxu0 %v10615_v32  ;;  %v7597_v32 = vand.u32 4294901760, %v14727_v29  ;;  %v16671_v53 = vand.u32 4294901760, %v16670_v6  ;;  %v16677_v47 = vand.u32 4294901760, %v16602_v48  ;;  %v7618_v13 = vand.u32 4294901760, %v14772_v11 }
 0x4d1   : > { %v10631_v0 = vpack.c.bf16 %v16659_v55, %v16658_v30  ;;  %v7632_v48 = vand.u32 4294901760, %v14782_v28  ;;  %v16679_v55 = vand.u32 4294901760, %v16608_v18  ;;  %v16684_v14 = vand.u32 4294901760, %v14497_v31 }
 0x4d2   : > { %7195 = vmatmul.mubr.f32.gmra.mrb[38].mxu0 %v16643_v19  ;;  %v10635_v19 = vpack.c.bf16 %v16667_v21, %v16666_v23  ;;  %v7598_v42 = vsub.f32 %v14727_v29, %v7597_v32  ;;  %v7619_v18 = vsub.f32 %v14772_v11, %v7618_v13 }
 0x4d3   : > { %10618 = vmatpush3.bf16.msra.mxu0 %v10617_v26  ;;  %7361 = vmatprep.mubr.f32.mxu0 %v14403_v37  ;;  %v14722_v37 = vsub.f32 %v16650_v5, %v16651_v36  ;;  %v16662_v26 = vld [vmem:[#allocation59_spill] sm:$0xff]  ;;  %v14843_v3 = vsub.f32 %v14497_v31, %v16684_v14 }
 0x4d4   : > { %10620 = vmatprep.subr.bf16.mxu0 %v10619_v46  ;;  %v16663_v38 = vand.u32 4294901760, %v16662_v26  ;;  %v10633_v46 = vpack.c.bf16 %v16665_v15, %v16664_v24  ;;  %v16682_v24 = vand.u32 4294901760, %v14470_v49 }
 0x4d5   : > { %v7590_v17 = vand.u32 4294901760, %v14722_v37  ;;  %v7667_v54 = vand.u32 4294901760, %v14843_v3 }
 0x4d6   : > { %v14751_v34 = vsub.f32 %v16662_v26, %v16663_v38  ;;  %v16681_v26 = vand.u32 4294901760, %v14465_v43  ;;  %v14819_v15 = vsub.f32 %v14470_v49, %v16682_v24 }
 0x4d7   : > { %10622 = vmatpush3.bf16.msra.mxu0 %v10621_v63  ;;  %v7591_v39 = vsub.f32 %v14722_v37, %v7590_v17  ;;  %v7604_v63 = vand.u32 4294901760, %v14746_v2 }
 0x4d8   : > { %10624 = vmatprep.subr.bf16.mxu0 %v10623_v52  ;;  %v7611_v33 = vand.u32 4294901760, %v14751_v34  ;;  %v14777_v52 = vsub.f32 %v16670_v6, %v16671_v53  ;;  %v14814_v38 = vsub.f32 %v14465_v43, %v16681_v26  ;;  %v7633_v43 = vsub.f32 %v14782_v28, %v7632_v48 }
 0x4d9   : > { %v7592_v8 = vand.u32 4294901760, %v7591_v39  ;;  %v7605_v59 = vsub.f32 %v14746_v2, %v7604_v63  ;;  %v16683_v39 = vand.u32 4294901760, %v14492_v50  ;;  %v7620_v53 = vand.u32 4294901760, %v7619_v18 }
 0x4da   : > { %v7612_v30 = vsub.f32 %v14751_v34, %v7611_v33  ;;  %v7625_v12 = vand.u32 4294901760, %v14777_v52  ;;  %v7646_v21 = vand.u32 4294901760, %v14814_v38 }
 0x4db   : > { %10626 = vmatpush3.bf16.msra.mxu0 %v10625_v51  ;;  %v16673_v51 = vld [vmem:[#allocation71_spill] sm:$0xff] }
 0x4dc   : > { %10628 = vmatprep.subr.bf16.mxu0 %v10627_v7  ;;  %v16674_v5 = vand.u32 4294901760, %v16673_v51  ;;  %v16678_v7 = vand.u32 4294901760, %v16601_v4  ;;  %v7613_v23 = vand.u32 4294901760, %v7612_v30 }
 0x4de   : > { %v14787_v36 = vsub.f32 %v16673_v51, %v16674_v5  ;;  %v10639_v40 = vpack.c.bf16 %v16678_v7, %v16677_v47  ;;  %v7634_v51 = vand.u32 4294901760, %v7633_v43 }
 0x4df   : > { %10630 = vmatpush3.bf16.msra.mxu0 %v10629_v20  ;;  %v7599_v20 = vand.u32 4294901760, %v7598_v42  ;;  %v14838_v42 = vsub.f32 %v14492_v50, %v16683_v39  ;;  %v7647_v50 = vsub.f32 %v14814_v38, %v7646_v21 }
 0x4e0   : > { %10632 = vmatprep.subr.bf16.mxu0 %v10631_v0  ;;  %v7639_v4 = vand.u32 4294901760, %v14787_v36  ;;  %v16680_v0 = vand.u32 4294901760, %v16607_v25  ;;  %v7626_v25 = vsub.f32 %v14777_v52, %v7625_v12 }
 0x4e1   : > { %v10707_v61 = vpack.c.bf16 %v7599_v20, %v7592_v8  ;;  %v7660_v1 = vand.u32 4294901760, %v14838_v42  ;;  %v7648_v8 = vand.u32 4294901760, %v7647_v50 }
 0x4e2   : > { %v10641_v27 = vpack.c.bf16 %v16680_v0, %v16679_v55  ;;  %v7640_v49 = vsub.f32 %v14787_v36, %v7639_v4  ;;  %v7627_v57 = vand.u32 4294901760, %v7626_v25 }
 0x4e3   : > { %10634 = vmatpush3.bf16.msra.mxu0 %v10633_v46  ;;  %v7606_v46 = vand.u32 4294901760, %v7605_v59  ;;  %v7661_v59 = vsub.f32 %v14838_v42, %v7660_v1 }
 0x4e4   : > { %10636 = vmatprep.subr.bf16.mxu0 %v10635_v19  ;;  %v7653_v19 = vand.u32 4294901760, %v14819_v15  ;;  %v7641_v5 = vand.u32 4294901760, %v7640_v49 }
 0x4e5   : > { %v10711_v6 = vpack.c.bf16 %v7613_v23, %v7606_v46  ;;  %v7662_v46 = vand.u32 4294901760, %v7661_v59 }
 0x4e6   : > { %v7654_v31 = vsub.f32 %v14819_v15, %v7653_v19 }
 0x4e7   : > { %10638 = vmatpush3.bf16.msra.mxu0 %v10637_v45  ;;  %v10715_v45 = vpack.c.bf16 %v7627_v57, %v7620_v53 }
 0x4e8   : > { %10640 = vmatprep.subr.bf16.mxu0 %v10639_v40  ;;  %v10719_v40 = vpack.c.bf16 %v7641_v5, %v7634_v51  ;;  %v7655_v20 = vand.u32 4294901760, %v7654_v31 }
 0x4ea   : > { %v10723_v24 = vpack.c.bf16 %v7655_v20, %v7648_v8  ;;  %v10755_v8 = vpack.c.bf16 %v14819_v15, %v14814_v38  ;;  %v10759_v20 = vpack.c.bf16 %v14843_v3, %v14838_v42 }
 0x4eb   : > { %10642 = vmatpush3.bf16.msra.mxu0 %v10641_v27  ;;  %v16689_v27 = vld [vmem:[#allocation88_spill] sm:$0xff] }
 0x4ec   : > { %10708 = vmatprep.subr.bf16.mxu0 %v10707_v61 }
 0x4ee   : > { %7363 = vmatmul.mubr.f32.vlgmr.msra.gmra.mrb[40].mxu0 %v14401_v35  ;;  %v16685_v35 = vand.u32 4294901760, %v14514_v62 }
 0x4ef   : > { %7368 = vmatprep.mubr.f32.mxu0 %v14434_v10  ;;  %10710 = vmatpush3.bf16.msra.mxu0 %v10707_v61  ;;  %v16686_v10 = vand.u32 4294901760, %v14519_v56  ;;  %v16690_v61 = vand.u32 4294901760, %v16689_v27 }
 0x4f0   : > { %10712 = vmatprep.subr.bf16.mxu0 %v10711_v6  ;;  %v14858_v47 = vsub.f32 %v14514_v62, %v16685_v35  ;;  %v7668_v62 = vsub.f32 %v14843_v3, %v7667_v54  ;;  %v10743_v35 = vpack.c.bf16 %v14751_v34, %v14746_v2 }
 0x4f1   : > { %v14863_v7 = vsub.f32 %v14519_v56, %v16686_v10  ;;  %v14883_v26 = vsub.f32 %v16689_v27, %v16690_v61  ;;  %v10747_v10 = vpack.c.bf16 %v14777_v52, %v14772_v11  ;;  %v16693_v27 = vld [vmem:[#allocation72_spill] sm:$0xff]  ;;  %v16694_v61 = vld [vmem:[#allocation78_spill] sm:$0xff] }
 0x4f2   : > { %7370 = vmatmul.mubr.f32.gmra.mrb[42].mxu0 %v14431_v9  ;;  %v7674_v56 = vand.u32 4294901760, %v14858_v47  ;;  %v16687_v9 = vld [vmem:[#allocation82_spill] sm:$0xff]  ;;  %v7669_v23 = vand.u32 4294901760, %v7668_v62 }
 0x4f3   : > { %10714 = vmatpush3.bf16.msra.mxu0 %v10711_v6  ;;  %9332 = vmatprep.mubr.f32.mxu0 %v14645_v58  ;;  %v7681_v30 = vand.u32 4294901760, %v14863_v7  ;;  %v16688_v55 = vand.u32 4294901760, %v16687_v9  ;;  %v7695_v49 = vand.u32 4294901760, %v14883_v26  ;;  %v10763_v59 = vpack.c.bf16 %v14863_v7, %v14858_v47 }
 0x4f4   : > { %10716 = vmatprep.subr.bf16.mxu0 %v10715_v45  ;;  %v7675_v18 = vsub.f32 %v14858_v47, %v7674_v56  ;;  %v10727_v39 = vpack.c.bf16 %v7669_v23, %v7662_v46 }
 0x4f5   : > { %v14878_v0 = vsub.f32 %v16687_v9, %v16688_v55  ;;  %v7682_v25 = vsub.f32 %v14863_v7, %v7681_v30  ;;  %v7696_v57 = vsub.f32 %v14883_v26, %v7695_v49  ;;  %v16691_v9 = vld [vmem:[#allocation55_spill] sm:$0xff]  ;;  %v16692_v55 = vld [vmem:[#allocation69_spill] sm:$0xff] }
 0x4f6   : > { %v7676_v14 = vand.u32 4294901760, %v7675_v18  ;;  %v16695_v18 = vld [vmem:[#allocation79_spill] sm:$0xff] }
 0x4f7   : > { %10718 = vmatpush3.bf16.msra.mxu0 %v10715_v45  ;;  %v7688_v43 = vand.u32 4294901760, %v14878_v0  ;;  %v7683_v6 = vand.u32 4294901760, %v7682_v25  ;;  %v7697_v50 = vand.u32 4294901760, %v7696_v57  ;;  %v10739_v45 = vpack.c.bf16 %v14727_v29, %v14722_v37  ;;  %v16697_v57 = vld [vmem:[#allocation89_spill] sm:$0xff] }
 0x4f8   : > { %10720 = vmatprep.subr.bf16.mxu0 %v10719_v40  ;;  %v10767_v62 = vpack.c.bf16 %v14883_v26, %v14878_v0  ;;  %v10811_v37 = vpack.c.bf16 %v7625_v12, %v7618_v13  ;;  %v10815_v29 = vpack.c.bf16 %v7639_v4, %v7632_v48 }
 0x4f9   : > { %v7689_v53 = vsub.f32 %v14878_v0, %v7688_v43  ;;  %v10731_v51 = vpack.c.bf16 %v7683_v6, %v7676_v14  ;;  %v10831_v11 = vpack.c.bf16 %v7695_v49, %v7688_v43 }
 0x4fb   : > { %10722 = vmatpush3.bf16.msra.mxu0 %v10719_v40  ;;  %v7690_v5 = vand.u32 4294901760, %v7689_v53  ;;  %v10751_v40 = vpack.c.bf16 %v14787_v36, %v14782_v28 }
 0x4fc   : > { %10724 = vmatprep.subr.bf16.mxu0 %v10723_v24 }
 0x4fd   : > { %v10735_v31 = vpack.c.bf16 %v7697_v50, %v7690_v5 }
 0x4ff   : > { %10726 = vmatpush3.bf16.msra.mxu0 %v10723_v24 }
 0x500   : > { %10728 = vmatprep.subr.bf16.mxu0 %v10727_v39 }
 0x503   : > { %10730 = vmatpush3.bf16.msra.mxu0 %v10727_v39  ;;  %v16696_v39 = vld [vmem:[#allocation81_spill] sm:$0xff] }
 0x504   : > { %10732 = vmatprep.subr.bf16.mxu0 %v10731_v51 }
 0x507   : > { %10734 = vmatpush3.bf16.msra.mxu0 %v10731_v51 }
 0x508   : > { %10736 = vmatprep.subr.bf16.mxu0 %v10735_v31 }
 0x50b   : > { %10738 = vmatpush3.bf16.msra.mxu0 %v10735_v31  ;;  %v16698_v31 = vld [vmem:[#allocation91_spill] sm:$0xff] }
 0x50c   : > { %10740 = vmatprep.subr.bf16.mxu0 %v10739_v45 }
 0x50e   : > { %9333 = vmatmul.mubr.f32.vlgmr.msra.gmra.mrb[44].mxu0 %v14652_v60 }
 0x50f   : > { %10742 = vmatpush3.bf16.msra.mxu0 %v10739_v45  ;;  %9367 = vmatprep.mubr.f32.mxu0 %v14649_v22  ;;  %v10803_v45 = vpack.c.bf16 %v7597_v32, %v7590_v17  ;;  %v8266_v17 = vld [vmem:[#allocation2] ss:$0 sm:$0xff]  ;;  %v10827_v32 = vpack.c.bf16 %v7681_v30, %v7674_v56 }
 0x510   : > { %10744 = vmatprep.subr.bf16.mxu0 %v10743_v35 }
 0x513   : > { %10746 = vmatpush3.bf16.msra.mxu0 %v10743_v35  ;;  %v10807_v35 = vpack.c.bf16 %v7611_v33, %v7604_v63 }
 0x514   : > { %10748 = vmatprep.subr.bf16.mxu0 %v10747_v10 }
 0x517   : > { %10750 = vmatpush3.bf16.msra.mxu0 %v10747_v10 }
 0x518   : > { %10752 = vmatprep.subr.bf16.mxu0 %v10751_v40 }
 0x51b   : > { %10754 = vmatpush3.bf16.msra.mxu0 %v10751_v40 }
 0x51c   : > { %10756 = vmatprep.subr.bf16.mxu0 %v10755_v8 }
 0x51f   : > { %10758 = vmatpush3.bf16.msra.mxu0 %v10755_v8 }
 0x520   : > { %10760 = vmatprep.subr.bf16.mxu0 %v10759_v20 }
 0x523   : > { %10762 = vmatpush3.bf16.msra.mxu0 %v10759_v20 }
 0x524   : > { %10764 = vmatprep.subr.bf16.mxu0 %v10763_v59 }
 0x527   : > { %10766 = vmatpush3.bf16.msra.mxu0 %v10763_v59 }
 0x528   : > { %10768 = vmatprep.subr.bf16.mxu0 %v10767_v62 }
 0x52b   : > { %10770 = vmatpush3.bf16.msra.mxu0 %v10767_v62 }
 0x52c   : > { %10772 = vmatprep.subr.bf16.mxu0 %v16691_v9 }
 0x52e   : > { %9368 = vmatmul.mubr.f32.vlgmr.msra.gmra.mrb[44].mxu0 %v14660_v41  ;;  %v10819_v41 = vpack.c.bf16 %v7653_v19, %v7646_v21 }
 0x52f   : > { %10774 = vmatpush3.bf16.msra.mxu0 %v16691_v9  ;;  %9402 = vmatprep.mubr.f32.mxu0 %v7569_v16 }
 0x530   : > { %10776 = vmatprep.subr.bf16.mxu0 %v16692_v55 }
 0x533   : > { %10778 = vmatpush3.bf16.msra.mxu0 %v16692_v55 }
 0x534   : > { %10780 = vmatprep.subr.bf16.mxu0 %v16693_v27 }
 0x537   : > { %10782 = vmatpush3.bf16.msra.mxu0 %v16693_v27 }
 0x538   : > { %10784 = vmatprep.subr.bf16.mxu0 %v16694_v61 }
 0x539   : > { %v8869_v24 = vpop.f32.mrb[14].mxu1 }
 0x53a   : > { %v8870_v46 = vpop.f32.mrb[15].mxu1 }
 0x53b   : > { %v14927_v23 = vadd.f32 %v8870_v46, %v8869_v24  ;;  %10786 = vmatpush3.bf16.msra.mxu0 %v16694_v61 }
 0x53c   : > { %10788 = vmatprep.subr.bf16.mxu0 %v16695_v18 }
 0x53d   : > { %v8872_v22 = vpop.f32.mrb[16].mxu1 }
 0x53e   : > { %v8873_v16 = vpop.f32.mrb[17].mxu1 }
 0x53f   : > { %v14931_v25 = vadd.f32 %v8873_v16, %v8872_v22  ;;  %10790 = vmatpush3.bf16.msra.mxu0 %v16695_v18 }
 0x540   : > { %10792 = vmatprep.subr.bf16.mxu0 %v16696_v39 }
 0x541   : > { %v8679_v14 = vpop.f32.mrb[24].mxu0 }
 0x542   : > { %v8680_v6 = vpop.f32.mrb[25].mxu0 }
 0x543   : > { %v8681_v53 = vadd.f32 %v8680_v6, %v8679_v14  ;;  %10794 = vmatpush3.bf16.msra.mxu0 %v16696_v39 }
 0x544   : > { %10796 = vmatprep.subr.bf16.mxu0 %v16697_v57 }
 0x545   : > { %v8682_v51 = vpop.f32.mrb[26].mxu0  ;;  %v6677_v63 = vadd.f32 %v8681_v53, %v8266_v17 }
 0x546   : > { %v8683_v5 = vpop.f32.mrb[27].mxu0 }
 0x547   : > { %v8684_v50 = vadd.f32 %v8683_v5, %v8682_v51  ;;  %10798 = vmatpush3.bf16.msra.mxu0 %v16697_v57 }
 0x548   : > { %10800 = vmatprep.subr.bf16.mxu0 %v16698_v31 }
 0x549   : > { %v6692_v13 = vadd.f32 %v8684_v50, %v8266_v17 }
 0x54b   : > { %10802 = vmatpush3.bf16.msra.mxu0 %v16698_v31 }
 0x54c   : > { %10804 = vmatprep.subr.bf16.mxu0 %v10803_v45 }
 0x54e   : > { %9403 = vmatmul.mubr.f32.vlgmr.msra.gmra.mrb[44].mxu0 %v7579_v44  ;;  %v10823_v44 = vpack.c.bf16 %v7667_v54, %v7660_v1 }
 0x54f   : > { %10806 = vmatpush3.bf16.msra.mxu0 %v10803_v45  ;;  %9437 = vmatprep.mubr.f32.mxu0 %v14645_v58 }
 0x550   : > { %10808 = vmatprep.subr.bf16.mxu0 %v10807_v35 }
 0x553   : > { %10810 = vmatpush3.bf16.msra.mxu0 %v10807_v35 }
 0x554   : > { %10812 = vmatprep.subr.bf16.mxu0 %v10811_v37 }
 0x557   : > { %10814 = vmatpush3.bf16.msra.mxu0 %v10811_v37 }
 0x558   : > { %10816 = vmatprep.subr.bf16.mxu0 %v10815_v29 }
 0x55b   : > { %10818 = vmatpush3.bf16.msra.mxu0 %v10815_v29 }
 0x55c   : > { %10820 = vmatprep.subr.bf16.mxu0 %v10819_v41 }
 0x55f   : > { %10822 = vmatpush3.bf16.msra.mxu0 %v10819_v41 }
 0x560   : > { %10824 = vmatprep.subr.bf16.mxu0 %v10823_v44 }
 0x561   : > { %v8717_v2 = vpop.f32.mrb[28].mxu0 }
 0x562   : > { %v8718_v34 = vpop.f32.mrb[29].mxu0 }
 0x563   : > { %v8719_v33 = vadd.f32 %v8718_v34, %v8717_v2  ;;  %10826 = vmatpush3.bf16.msra.mxu0 %v10823_v44 }
 0x564   : > { %10828 = vmatprep.subr.bf16.mxu0 %v10827_v32 }
 0x565   : > { %v6924_v52 = vadd.f32 %v8719_v33, %v6677_v63  ;;  %v8720_v28 = vpop.f32.mrb[30].mxu0 }
 0x566   : > { %v8721_v36 = vpop.f32.mrb[31].mxu0 }
 0x567   : > { %v8722_v12 = vadd.f32 %v8721_v36, %v8720_v28  ;;  %10830 = vmatpush3.bf16.msra.mxu0 %v10827_v32 }
 0x568   : > { %10832 = vmatprep.subr.bf16.mxu0 %v10831_v11 }
 0x569   : > { %v6931_v48 = vadd.f32 %v8722_v12, %v6692_v13 }
 0x56b   : > { %10834 = vmatpush3.bf16.msra.mxu0 %v10831_v11 }
 0x56c   : > { %10836 = vmatprep.subr.bf16.mxu0 %v16691_v9 }
 0x56e   : > { %9438 = vmatmul.mubr.f32.vlgmr.msra.gmra.mrb[44].mxu0 %v14652_v60 }
 0x56f   : > { %10838 = vmatpush3.bf16.msra.mxu0 %v16691_v9  ;;  %9472 = vmatprep.mubr.f32.mxu0 %v14645_v58 }
 0x570   : > { %10840 = vmatprep.subr.bf16.mxu0 %v16692_v55 }
 0x573   : > { %10842 = vmatpush3.bf16.msra.mxu0 %v16692_v55 }
 0x574   : > { %10844 = vmatprep.subr.bf16.mxu0 %v16693_v27 }
 0x577   : > { %10846 = vmatpush3.bf16.msra.mxu0 %v16693_v27 }
 0x578   : > { %10848 = vmatprep.subr.bf16.mxu0 %v16694_v61 }
 0x57b   : > { %10850 = vmatpush3.bf16.msra.mxu0 %v16694_v61 }
 0x57c   : > { %10852 = vmatprep.subr.bf16.mxu0 %v16695_v18 }
 0x57f   : > { %10854 = vmatpush3.bf16.msra.mxu0 %v16695_v18 }
 0x580   : > { %10856 = vmatprep.subr.bf16.mxu0 %v16696_v39 }
 0x581   : > { %v8755_v4 = vpop.f32.mrb[32].mxu0 }
 0x582   : > { %v8756_v58 = vpop.f32.mrb[33].mxu0 }
 0x583   : > { %v8757_v38 = vadd.f32 %v8756_v58, %v8755_v4  ;;  %10858 = vmatpush3.bf16.msra.mxu0 %v16696_v39 }
 0x584   : > { %10860 = vmatprep.subr.bf16.mxu0 %v16697_v57 }
 0x585   : > { %v7069_v15 = vadd.f32 %v8757_v38, %v6924_v52  ;;  %v8758_v21 = vpop.f32.mrb[34].mxu0 }
 0x586   : > { %v8759_v19 = vpop.f32.mrb[35].mxu0 }
 0x587   : > { %v8760_v42 = vadd.f32 %v8759_v19, %v8758_v21  ;;  %10862 = vmatpush3.bf16.msra.mxu0 %v16697_v57 }
 0x588   : > { %10864 = vmatprep.subr.bf16.mxu0 %v16698_v31 }
 0x589   : > { %v7078_v3 = vadd.f32 %v8760_v42, %v6931_v48 }
 0x58b   : > { %10866 = vmatpush3.bf16.msra.mxu0 %v16698_v31 }
 0x58e   : > { %9473 = vmatmul.mubr.f32.vlgmr.msra.gmra.mrb[44].mxu0 %v14652_v60 }
 0x590   : > { %v9299_v1 = vpop.f32.mrb[18].mxu1 }
 0x591   : > { %v7573_v54 = vpop.f32.mrb[19].mxu1 }
 0x5a1   : > { %v8793_v47 = vpop.f32.mrb[36].mxu0 }
 0x5a2   : > { %v8794_v7 = vpop.f32.mrb[37].mxu0 }
 0x5a3   : > { %v8795_v56 = vadd.f32 %v8794_v7, %v8793_v47 }
 0x5a5   : > { %v7186_v30 = vadd.f32 %v8795_v56, %v7069_v15  ;;  %v8796_v0 = vpop.f32.mrb[38].mxu0 }
 0x5a6   : > { %v8797_v26 = vpop.f32.mrb[39].mxu0 }
 0x5a7   : > { %v8798_v43 = vadd.f32 %v8797_v26, %v8796_v0 }
 0x5a9   : > { %v7197_v49 = vadd.f32 %v8798_v43, %v7078_v3 }
 0x5c1   : > { %v8831_v10 = vpop.f32.mrb[40].mxu0 }
 0x5c2   : > { %v8832_v40 = vpop.f32.mrb[41].mxu0 }
 0x5c3   : > { %v8833_v8 = vadd.f32 %v8832_v40, %v8831_v10 }
 0x5c5   : > { %v7365_v20 = vadd.f32 %v8833_v8, %v7186_v30  ;;  %v8834_v59 = vpop.f32.mrb[42].mxu0 }
 0x5c6   : > { %v8835_v62 = vpop.f32.mrb[43].mxu0 }
 0x5c7   : > { %v8836_v9 = vadd.f32 %v8835_v62, %v8834_v59  ;;  %v7476_v60 = vadd.f32 %v14927_v23, %v7365_v20 }
 0x5c9   : > { %v7372_v55 = vadd.f32 %v8836_v9, %v7197_v49  ;;  %v7574_v27 = vadd.f32 %v7573_v54, %v7476_v60 }
 0x5cb   : > { %v7483_v61 = vadd.f32 %v14931_v25, %v7372_v55 }
 0x5cd   : > { %v7584_v24 = vadd.f32 %v9299_v1, %v7483_v61 }
 0x661   : > { %v9474_v46 = vpop.f32.mrb[44].mxu0 }
 0x662   : > { %v10876_v18 = vadd.f32 %v9474_v46, %v7584_v24  ;;  %v8160_v22 = vpop.f32.mrb[45].mxu0 }
 0x663   : > { %v10878_v16 = vadd.f32 %v8160_v22, %v7574_v27 }
 0x664   : > { %8172 = vst.msk [vmem:[%s373_s15 + $0x8] sm:$0xff] %vm8170_vm3, %v10876_v18 }
 0x665   : > { %8171 = vst.msk [vmem:[%s373_s15] sm:$0xff] %vm8170_vm3, %v10878_v16 }
 0x666 PF: > { %s22_s11 = sadd.s32 1, %s11066_s11  }
 0x667   : > { %p19_p3 = scmp.ge.s32.totalorder %s22_s11, 6  }
 0x669   :  { %21 = sbr.rel (!%p19_p3) target bundleno = 4 (0x4), region = 94 }
 0x670   :  { %8195 = vsyncpa [#allocation4], 1 }
 0x671   :  { %8197 = vsyncpa [#allocation4 + $0x1], 1 }

</bundles_post_ra>
